<compile_context>
chip_gen: v7x
topology: tpu7x:2x2x1
jax: 0.10.0
libtpu: 0.0.40
codegen_flags: <defaults>
</compile_context>

<pallas_src>
import functools
import math

import jax
import jax.numpy as jnp
from jax.experimental import pallas as pl
from jax.experimental.pallas import tpu as pltpu


# ---------------------------- fused Pallas kernel ----------------------------

def _stacker_fused_kernel(
    logi_ref, vis_ref,
    enc1_w_ref, enc1_b_ref, enc2_w_ref, enc2_b_ref,
    emb_wt_ref, emb_wb_ref, emb_b_ref,
    n1a_ref, n1b_ref,
    wq_ref, bq_ref, wk_ref, bk_ref, wv_ref, bv_ref, wo_ref, bo_ref,
    n2a_ref, n2b_ref, ff1w_ref, ff1b_ref, ff2w_ref, ff2b_ref,
    fin_a_ref, fin_b_ref, out_w_ref, out_b_ref,
    y_ref,
    *, layers, heads, eps,
):
    N, H = vis_ref.shape
    bf = jnp.bfloat16
    f32 = jnp.float32

    def norm(x, a, b):
        # LORE custom Norm: alpha * (x - mean) / (std + eps) + bias,
        # with torch.std's unbiased (N-1) estimator (differs from nn.LayerNorm).
        d = x.shape[-1]
        mean = jnp.mean(x, axis=-1, keepdims=True)
        xc = x - mean
        var = jnp.sum(xc * xc, axis=-1, keepdims=True) * (1.0 / (d - 1))
        return a * xc / (jnp.sqrt(var) + eps) + b

    # ---- logi_encoder: Linear -> ReLU -> Linear -> ReLU ----
    h = jnp.dot(logi_ref[...].astype(bf), enc1_w_ref[...], preferred_element_type=f32)
    h = jnp.maximum(h + enc1_b_ref[...], 0.0)
    h = jnp.dot(h.astype(bf), enc2_w_ref[...], preferred_element_type=f32)
    logi_emb = jnp.maximum(h + enc2_b_ref[...], 0.0)

    # ---- embed(concat([logi_emb, vis])) without materializing the concat ----
    x = (jnp.dot(logi_emb.astype(bf), emb_wt_ref[...], preferred_element_type=f32)
         + jnp.dot(vis_ref[...].astype(bf), emb_wb_ref[...], preferred_element_type=f32)
         + emb_b_ref[...])

    for l in range(layers):
        # -------- pre-norm multi-head attention (heads batched, no scatter) ----
        x2 = norm(x, n1a_ref[l], n1b_ref[l])
        x2b = jnp.broadcast_to(x2.astype(bf), (heads, N, H))
        # softmax scale already folded into wq / bq at packing time.
        q = jnp.einsum('hnk,hkd->hnd', x2b, wq_ref[l],
                       preferred_element_type=f32) + bq_ref[l]
        k = jnp.einsum('hnk,hkd->hnd', x2b, wk_ref[l],
                       preferred_element_type=f32) + bk_ref[l]
        v = jnp.einsum('hnk,hkd->hnd', x2b, wv_ref[l],
                       preferred_element_type=f32) + bv_ref[l]
        s = jnp.einsum('hqd,hkd->hqk', q, k, preferred_element_type=f32)
        s = s - jnp.max(s, axis=-1, keepdims=True)
        p = jnp.exp(s)
        p = p * pl.reciprocal(jnp.sum(p, axis=-1, keepdims=True), approx=True)
        att = jnp.einsum('hqk,hkd->hqd', p, v, preferred_element_type=f32)
        # fold each head through its slice of W_o and sum over heads
        per_head = jnp.einsum('hnd,hdk->hnk', att.astype(bf), wo_ref[l],
                              preferred_element_type=f32)
        x = x + jnp.sum(per_head, axis=0) + bo_ref[l]

        # -------- pre-norm feed-forward --------
        x2 = norm(x, n2a_ref[l], n2b_ref[l])
        ffh = jnp.maximum(
            jnp.dot(x2.astype(bf), ff1w_ref[l], preferred_element_type=f32)
            + ff1b_ref[l], 0.0)
        x = x + jnp.dot(ffh.astype(bf), ff2w_ref[l],
                        preferred_element_type=f32) + ff2b_ref[l]

    # ---- final norm + lane-dense output projection ----
    x = norm(x, fin_a_ref[...], fin_b_ref[...])
    y_ref[...] = jnp.dot(x.astype(bf), out_w_ref[...],
                         preferred_element_type=f32) + out_b_ref[...]


# ---------------------------- parameters ----------------------------

def init_linear(key, fan_in, fan_out):
    kw, kb = jax.random.split(key)
    bound = 1.0 / (fan_in ** 0.5)
    w = jax.random.uniform(kw, (fan_in, fan_out), jnp.float32, -bound, bound)
    b = jax.random.uniform(kb, (1, fan_out), jnp.float32, -bound, bound)
    return w, b


def init_stacker_params(key, input_size, hidden_size, output_size, layers, d_ff, heads):
    """Params are packed for the fused kernel:
       - per-layer tensors stacked on a leading `layers` axis
       - Q/K/V/O split per head: w[q|k|v] -> [L, heads, H, dh], wo -> [L, heads, dh, H]
       - 1/sqrt(dh) folded into wq / bq
       - embed weight pre-split into top (logi) / bottom (visual) halves
       - output weight lane-padded to a multiple of 128 columns
       - matmul weights stored in bf16 (MXU operands); biases / norms in f32."""
    H = hidden_size
    dh = H // heads
    scale = 1.0 / math.sqrt(dh)
    bf = jnp.bfloat16

    def split_heads_w(w):           # [H, H] -> [heads, H, dh]
        return jnp.transpose(w.reshape(H, heads, dh), (1, 0, 2))

    def split_heads_b(b):           # [1, H] -> [heads, 1, dh]
        return b.reshape(heads, dh)[:, None, :]

    keys = iter(jax.random.split(key, 4 + 6 * layers))
    enc1_w, enc1_b = init_linear(next(keys), input_size, H)
    enc2_w, enc2_b = init_linear(next(keys), H, H)
    emb_w, emb_b = init_linear(next(keys), 2 * H, H)

    ones = jnp.ones((1, H), jnp.float32)
    zeros = jnp.zeros((1, H), jnp.float32)
    per = {k: [] for k in ("n1a", "n1b", "wq", "bq", "wk", "bk", "wv", "bv",
                           "wo", "bo", "n2a", "n2b", "ff1w", "ff1b", "ff2w", "ff2b")}
    for _ in range(layers):
        wq, bq = init_linear(next(keys), H, H)
        wk, bk = init_linear(next(keys), H, H)
        wv, bv = init_linear(next(keys), H, H)
        wo, bo = init_linear(next(keys), H, H)
        f1w, f1b = init_linear(next(keys), H, d_ff)
        f2w, f2b = init_linear(next(keys), d_ff, H)
        per["n1a"].append(ones); per["n1b"].append(zeros)
        per["n2a"].append(ones); per["n2b"].append(zeros)
        per["wq"].append(split_heads_w(wq * scale).astype(bf))
        per["bq"].append(split_heads_b(bq * scale))
        per["wk"].append(split_heads_w(wk).astype(bf))
        per["bk"].append(split_heads_b(bk))
        per["wv"].append(split_heads_w(wv).astype(bf))
        per["bv"].append(split_heads_b(bv))
        per["wo"].append(wo.reshape(heads, dh, H).astype(bf))
        per["bo"].append(bo)
        per["ff1w"].append(f1w.astype(bf)); per["ff1b"].append(f1b)
        per["ff2w"].append(f2w.astype(bf)); per["ff2b"].append(f2b)

    out_w, out_b = init_linear(next(keys), H, output_size)
    o_pad = ((output_size + 127) // 128) * 128
    out_w_p = jnp.zeros((H, o_pad), jnp.float32).at[:, :output_size].set(out_w)
    out_b_p = jnp.zeros((1, o_pad), jnp.float32).at[:, :output_size].set(out_b)

    params = {
        "enc1_w": enc1_w.astype(bf), "enc1_b": enc1_b,
        "enc2_w": enc2_w.astype(bf), "enc2_b": enc2_b,
        "emb_w_top": emb_w[:H].astype(bf), "emb_w_bot": emb_w[H:].astype(bf),
        "emb_b": emb_b,
        "fin_a": ones, "fin_b": zeros,
        "out_w": out_w_p.astype(bf), "out_b": out_b_p,
    }
    for k, v in per.items():
        params[k] = jnp.stack(v, axis=0)
    return params


# ---------------------------- forward ----------------------------

def stacker_forward(params, outputs, logi, heads, output_size):
    """outputs: [B, N, hidden] visual features, logi: [B, N, input_size].
    mask=None / require_att=False inference path of Stacker.forward."""
    B, N, H = outputs.shape
    Din = logi.shape[-1]
    M = B * N
    L = int(params["wq"].shape[0])
    O_pad = params["out_w"].shape[1]

    kern = functools.partial(_stacker_fused_kernel,
                             layers=L, heads=heads, eps=1e-6)

    def rows(block):
        return pl.BlockSpec(block, lambda b: (b, 0))

    def resident(arr):
        return pl.BlockSpec(arr.shape, lambda b, _n=arr.ndim: (0,) * _n)

    weight_args = [
        params["enc1_w"], params["enc1_b"], params["enc2_w"], params["enc2_b"],
        params["emb_w_top"], params["emb_w_bot"], params["emb_b"],
        params["n1a"], params["n1b"],
        params["wq"], params["bq"], params["wk"], params["bk"],
        params["wv"], params["bv"], params["wo"], params["bo"],
        params["n2a"], params["n2b"],
        params["ff1w"], params["ff1b"], params["ff2w"], params["ff2b"],
        params["fin_a"], params["fin_b"], params["out_w"], params["out_b"],
    ]

    in_specs = [rows((N, Din)), rows((N, H))] + [resident(w) for w in weight_args]

    y = pl.pallas_call(
        kern,
        out_shape=jax.ShapeDtypeStruct((M, O_pad), jnp.float32),
        grid=(B,),
        in_specs=in_specs,
        out_specs=rows((N, O_pad)),
        compiler_params=pltpu.CompilerParams(dimension_semantics=("parallel",)),
    )(
        logi.reshape(M, Din).astype(jnp.float32),
        outputs.reshape(M, H).astype(jnp.float32),
        *weight_args,
    )
    return y[:, :output_size].reshape(B, N, output_size)


# ---------------------------- main ----------------------------

if __name__ == "__main__":
    B, N = 2, 8
    input_size, hidden_size, output_size = 4, 32, 4
    layers, heads = 2, 8
    # TODO(synk): the reference Transformer's FFN width is not given in the snippet
    # (tutorial default is 2048); using 2*hidden here for the synthetic kernel.
    d_ff = 64

    key = jax.random.PRNGKey(0)
    kp, ko, kl = jax.random.split(key, 3)
    params = init_stacker_params(kp, input_size, hidden_size, output_size,
                                 layers, d_ff, heads)

    outputs = jax.random.normal(ko, (B, N, hidden_size), jnp.float32)  # visual features
    logi = jax.random.normal(kl, (B, N, input_size), jnp.float32)      # logical coords

    y = stacker_forward(params, outputs, logi, heads, output_size)
    jax.block_until_ready(y)
    assert y.shape == (B, N, output_size), y.shape
    assert bool(jnp.all(jnp.isfinite(y)))
    print("KERNEL_OK")
</pallas_src>

<mosaic_0001>
module attributes {stable_mosaic.version = 11 : i64} {
  func.func @_stacker_fused_kernel(%arg0: i32, %arg1: memref<8x4xf32, #tpu.memory_space<vmem>>, %arg2: memref<8x32xf32, #tpu.memory_space<vmem>>, %arg3: memref<4x32xbf16, #tpu.memory_space<vmem>>, %arg4: memref<1x32xf32, #tpu.memory_space<vmem>>, %arg5: memref<32x32xbf16, #tpu.memory_space<vmem>>, %arg6: memref<1x32xf32, #tpu.memory_space<vmem>>, %arg7: memref<32x32xbf16, #tpu.memory_space<vmem>>, %arg8: memref<32x32xbf16, #tpu.memory_space<vmem>>, %arg9: memref<1x32xf32, #tpu.memory_space<vmem>>, %arg10: memref<2x1x32xf32, #tpu.memory_space<vmem>>, %arg11: memref<2x1x32xf32, #tpu.memory_space<vmem>>, %arg12: memref<2x8x32x4xbf16, #tpu.memory_space<vmem>>, %arg13: memref<2x8x1x4xf32, #tpu.memory_space<vmem>>, %arg14: memref<2x8x32x4xbf16, #tpu.memory_space<vmem>>, %arg15: memref<2x8x1x4xf32, #tpu.memory_space<vmem>>, %arg16: memref<2x8x32x4xbf16, #tpu.memory_space<vmem>>, %arg17: memref<2x8x1x4xf32, #tpu.memory_space<vmem>>, %arg18: memref<2x8x4x32xbf16, #tpu.memory_space<vmem>>, %arg19: memref<2x1x32xf32, #tpu.memory_space<vmem>>, %arg20: memref<2x1x32xf32, #tpu.memory_space<vmem>>, %arg21: memref<2x1x32xf32, #tpu.memory_space<vmem>>, %arg22: memref<2x32x64xbf16, #tpu.memory_space<vmem>>, %arg23: memref<2x1x64xf32, #tpu.memory_space<vmem>>, %arg24: memref<2x64x32xbf16, #tpu.memory_space<vmem>>, %arg25: memref<2x1x32xf32, #tpu.memory_space<vmem>>, %arg26: memref<1x32xf32, #tpu.memory_space<vmem>>, %arg27: memref<1x32xf32, #tpu.memory_space<vmem>>, %arg28: memref<32x128xbf16, #tpu.memory_space<vmem>>, %arg29: memref<1x128xf32, #tpu.memory_space<vmem>>, %arg30: memref<8x128xf32, #tpu.memory_space<vmem>>) attributes {dimension_semantics = [#tpu.dimension_semantics<parallel>], iteration_bounds = array<i64: 2>, scalar_prefetch = 0 : i64, scratch_operands = 0 : i64, tpu.core_type = #tpu.core_type<tc>, window_params = [{transform_indices = @transform_0, window_bounds = array<i64: 8, 4>}, {transform_indices = @transform_1, window_bounds = array<i64: 8, 32>}, {pipeline_mode = #tpu.pipeline_mode<synchronous>, transform_indices = @transform_2, window_bounds = array<i64: 4, 32>}, {pipeline_mode = #tpu.pipeline_mode<synchronous>, transform_indices = @transform_3, window_bounds = array<i64: 1, 32>}, {pipeline_mode = #tpu.pipeline_mode<synchronous>, transform_indices = @transform_4, window_bounds = array<i64: 32, 32>}, {pipeline_mode = #tpu.pipeline_mode<synchronous>, transform_indices = @transform_5, window_bounds = array<i64: 1, 32>}, {pipeline_mode = #tpu.pipeline_mode<synchronous>, transform_indices = @transform_6, window_bounds = array<i64: 32, 32>}, {pipeline_mode = #tpu.pipeline_mode<synchronous>, transform_indices = @transform_7, window_bounds = array<i64: 32, 32>}, {pipeline_mode = #tpu.pipeline_mode<synchronous>, transform_indices = @transform_8, window_bounds = array<i64: 1, 32>}, {pipeline_mode = #tpu.pipeline_mode<synchronous>, transform_indices = @transform_9, window_bounds = array<i64: 2, 1, 32>}, {pipeline_mode = #tpu.pipeline_mode<synchronous>, transform_indices = @transform_10, window_bounds = array<i64: 2, 1, 32>}, {pipeline_mode = #tpu.pipeline_mode<synchronous>, transform_indices = @transform_11, window_bounds = array<i64: 2, 8, 32, 4>}, {pipeline_mode = #tpu.pipeline_mode<synchronous>, transform_indices = @transform_12, window_bounds = array<i64: 2, 8, 1, 4>}, {pipeline_mode = #tpu.pipeline_mode<synchronous>, transform_indices = @transform_13, window_bounds = array<i64: 2, 8, 32, 4>}, {pipeline_mode = #tpu.pipeline_mode<synchronous>, transform_indices = @transform_14, window_bounds = array<i64: 2, 8, 1, 4>}, {pipeline_mode = #tpu.pipeline_mode<synchronous>, transform_indices = @transform_15, window_bounds = array<i64: 2, 8, 32, 4>}, {pipeline_mode = #tpu.pipeline_mode<synchronous>, transform_indices = @transform_16, window_bounds = array<i64: 2, 8, 1, 4>}, {pipeline_mode = #tpu.pipeline_mode<synchronous>, transform_indices = @transform_17, window_bounds = array<i64: 2, 8, 4, 32>}, {pipeline_mode = #tpu.pipeline_mode<synchronous>, transform_indices = @transform_18, window_bounds = array<i64: 2, 1, 32>}, {pipeline_mode = #tpu.pipeline_mode<synchronous>, transform_indices = @transform_19, window_bounds = array<i64: 2, 1, 32>}, {pipeline_mode = #tpu.pipeline_mode<synchronous>, transform_indices = @transform_20, window_bounds = array<i64: 2, 1, 32>}, {pipeline_mode = #tpu.pipeline_mode<synchronous>, transform_indices = @transform_21, window_bounds = array<i64: 2, 32, 64>}, {pipeline_mode = #tpu.pipeline_mode<synchronous>, transform_indices = @transform_22, window_bounds = array<i64: 2, 1, 64>}, {pipeline_mode = #tpu.pipeline_mode<synchronous>, transform_indices = @transform_23, window_bounds = array<i64: 2, 64, 32>}, {pipeline_mode = #tpu.pipeline_mode<synchronous>, transform_indices = @transform_24, window_bounds = array<i64: 2, 1, 32>}, {pipeline_mode = #tpu.pipeline_mode<synchronous>, transform_indices = @transform_25, window_bounds = array<i64: 1, 32>}, {pipeline_mode = #tpu.pipeline_mode<synchronous>, transform_indices = @transform_26, window_bounds = array<i64: 1, 32>}, {pipeline_mode = #tpu.pipeline_mode<synchronous>, transform_indices = @transform_27, window_bounds = array<i64: 32, 128>}, {pipeline_mode = #tpu.pipeline_mode<synchronous>, transform_indices = @transform_28, window_bounds = array<i64: 1, 128>}, {transform_indices = @transform_29, window_bounds = array<i64: 8, 128>}]} {
    %c0 = arith.constant 0 : index
    %c0_0 = arith.constant 0 : index
    %0 = vector.load %arg1[%c0, %c0_0] : memref<8x4xf32, #tpu.memory_space<vmem>>, vector<8x4xf32>
    %1 = arith.truncf %0 : vector<8x4xf32> to vector<8x4xbf16>
    %c0_1 = arith.constant 0 : index
    %c0_2 = arith.constant 0 : index
    %2 = vector.load %arg3[%c0_1, %c0_2] : memref<4x32xbf16, #tpu.memory_space<vmem>>, vector<4x32xbf16>
    %cst = arith.constant dense<0.000000e+00> : vector<8x32xf32>
    %3 = tpu.matmul %1, %2, %cst {dimension_numbers = #tpu.dot_dimension_numbers<[1], [0], [0], [1], [0, 0, 1, 1], [], []>} : vector<8x4xbf16>, vector<4x32xbf16>, vector<8x32xf32> -> vector<8x32xf32>
    %c0_3 = arith.constant 0 : index
    %c0_4 = arith.constant 0 : index
    %4 = vector.load %arg4[%c0_3, %c0_4] : memref<1x32xf32, #tpu.memory_space<vmem>>, vector<1x32xf32>
    %5 = vector.broadcast %4 : vector<1x32xf32> to vector<8x32xf32>
    %6 = arith.addf %3, %5 : vector<8x32xf32>
    %cst_5 = arith.constant 0.000000e+00 : f32
    %7 = vector.broadcast %cst_5 : f32 to vector<8x32xf32>
    %8 = arith.maximumf %6, %7 : vector<8x32xf32>
    %9 = arith.truncf %8 : vector<8x32xf32> to vector<8x32xbf16>
    %c0_6 = arith.constant 0 : index
    %c0_7 = arith.constant 0 : index
    %10 = vector.load %arg5[%c0_6, %c0_7] : memref<32x32xbf16, #tpu.memory_space<vmem>>, vector<32x32xbf16>
    %cst_8 = arith.constant dense<0.000000e+00> : vector<8x32xf32>
    %11 = tpu.matmul %9, %10, %cst_8 {dimension_numbers = #tpu.dot_dimension_numbers<[1], [0], [0], [1], [0, 0, 1, 1], [], []>} : vector<8x32xbf16>, vector<32x32xbf16>, vector<8x32xf32> -> vector<8x32xf32>
    %c0_9 = arith.constant 0 : index
    %c0_10 = arith.constant 0 : index
    %12 = vector.load %arg6[%c0_9, %c0_10] : memref<1x32xf32, #tpu.memory_space<vmem>>, vector<1x32xf32>
    %13 = vector.broadcast %12 : vector<1x32xf32> to vector<8x32xf32>
    %14 = arith.addf %11, %13 : vector<8x32xf32>
    %cst_11 = arith.constant 0.000000e+00 : f32
    %15 = vector.broadcast %cst_11 : f32 to vector<8x32xf32>
    %16 = arith.maximumf %14, %15 : vector<8x32xf32>
    %17 = arith.truncf %16 : vector<8x32xf32> to vector<8x32xbf16>
    %c0_12 = arith.constant 0 : index
    %c0_13 = arith.constant 0 : index
    %18 = vector.load %arg7[%c0_12, %c0_13] : memref<32x32xbf16, #tpu.memory_space<vmem>>, vector<32x32xbf16>
    %cst_14 = arith.constant dense<0.000000e+00> : vector<8x32xf32>
    %19 = tpu.matmul %17, %18, %cst_14 {dimension_numbers = #tpu.dot_dimension_numbers<[1], [0], [0], [1], [0, 0, 1, 1], [], []>} : vector<8x32xbf16>, vector<32x32xbf16>, vector<8x32xf32> -> vector<8x32xf32>
    %c0_15 = arith.constant 0 : index
    %c0_16 = arith.constant 0 : index
    %20 = vector.load %arg2[%c0_15, %c0_16] : memref<8x32xf32, #tpu.memory_space<vmem>>, vector<8x32xf32>
    %21 = arith.truncf %20 : vector<8x32xf32> to vector<8x32xbf16>
    %c0_17 = arith.constant 0 : index
    %c0_18 = arith.constant 0 : index
    %22 = vector.load %arg8[%c0_17, %c0_18] : memref<32x32xbf16, #tpu.memory_space<vmem>>, vector<32x32xbf16>
    %cst_19 = arith.constant dense<0.000000e+00> : vector<8x32xf32>
    %23 = tpu.matmul %21, %22, %cst_19 {dimension_numbers = #tpu.dot_dimension_numbers<[1], [0], [0], [1], [0, 0, 1, 1], [], []>} : vector<8x32xbf16>, vector<32x32xbf16>, vector<8x32xf32> -> vector<8x32xf32>
    %24 = arith.addf %19, %23 : vector<8x32xf32>
    %c0_20 = arith.constant 0 : index
    %c0_21 = arith.constant 0 : index
    %25 = vector.load %arg9[%c0_20, %c0_21] : memref<1x32xf32, #tpu.memory_space<vmem>>, vector<1x32xf32>
    %26 = vector.broadcast %25 : vector<1x32xf32> to vector<8x32xf32>
    %27 = arith.addf %24, %26 : vector<8x32xf32>
    %c0_22 = arith.constant 0 : index
    %c0_23 = arith.constant 0 : index
    %c0_24 = arith.constant 0 : index
    %28 = vector.load %arg10[%c0_22, %c0_23, %c0_24] : memref<2x1x32xf32, #tpu.memory_space<vmem>>, vector<1x1x32xf32>
    %29 = vector.shape_cast %28 : vector<1x1x32xf32> to vector<1x32xf32>
    %c0_25 = arith.constant 0 : index
    %c0_26 = arith.constant 0 : index
    %c0_27 = arith.constant 0 : index
    %30 = vector.load %arg11[%c0_25, %c0_26, %c0_27] : memref<2x1x32xf32, #tpu.memory_space<vmem>>, vector<1x1x32xf32>
    %31 = vector.shape_cast %30 : vector<1x1x32xf32> to vector<1x32xf32>
    %cst_28 = arith.constant dense<0.000000e+00> : vector<8xf32>
    %32 = vector.multi_reduction <add>, %27, %cst_28 [1] : vector<8x32xf32> to vector<8xf32>
    %33 = vector.shape_cast %32 : vector<8xf32> to vector<8x1xf32>
    %cst_29 = arith.constant 3.200000e+01 : f32
    %34 = vector.broadcast %cst_29 : f32 to vector<8x1xf32>
    %35 = arith.divf %33, %34 : vector<8x1xf32>
    %36 = vector.broadcast %35 : vector<8x1xf32> to vector<8x32xf32>
    %37 = arith.subf %27, %36 : vector<8x32xf32>
    %38 = arith.mulf %37, %37 : vector<8x32xf32>
    %cst_30 = arith.constant dense<0.000000e+00> : vector<8xf32>
    %39 = vector.multi_reduction <add>, %38, %cst_30 [1] : vector<8x32xf32> to vector<8xf32>
    %40 = vector.shape_cast %39 : vector<8xf32> to vector<8x1xf32>
    %cst_31 = arith.constant 0.0322580636 : f32
    %41 = vector.broadcast %cst_31 : f32 to vector<8x1xf32>
    %42 = arith.mulf %40, %41 : vector<8x1xf32>
    %43 = vector.broadcast %29 : vector<1x32xf32> to vector<8x32xf32>
    %44 = arith.mulf %43, %37 : vector<8x32xf32>
    %45 = math.sqrt %42 : vector<8x1xf32>
    %cst_32 = arith.constant 9.99999997E-7 : f32
    %46 = vector.broadcast %cst_32 : f32 to vector<8x1xf32>
    %47 = arith.addf %45, %46 : vector<8x1xf32>
    %48 = vector.broadcast %47 : vector<8x1xf32> to vector<8x32xf32>
    %49 = arith.divf %44, %48 : vector<8x32xf32>
    %50 = vector.broadcast %31 : vector<1x32xf32> to vector<8x32xf32>
    %51 = arith.addf %49, %50 : vector<8x32xf32>
    %52 = arith.truncf %51 : vector<8x32xf32> to vector<8x32xbf16>
    %53 = vector.shape_cast %52 : vector<8x32xbf16> to vector<1x8x32xbf16>
    %54 = vector.broadcast %53 : vector<1x8x32xbf16> to vector<8x8x32xbf16>
    %c0_33 = arith.constant 0 : index
    %c0_34 = arith.constant 0 : index
    %c0_35 = arith.constant 0 : index
    %c0_36 = arith.constant 0 : index
    %55 = vector.load %arg12[%c0_33, %c0_34, %c0_35, %c0_36] : memref<2x8x32x4xbf16, #tpu.memory_space<vmem>>, vector<1x8x32x4xbf16>
    %56 = vector.shape_cast %55 : vector<1x8x32x4xbf16> to vector<8x32x4xbf16>
    "tpu.trace_start"() <{level = 10 : i32, message = "hnk,hkd->hnd"}> : () -> ()
    %cst_37 = arith.constant dense<0.000000e+00> : vector<8x8x4xf32>
    %57 = tpu.matmul %54, %56, %cst_37 {dimension_numbers = #tpu.dot_dimension_numbers<[2], [1], [1], [2], [0, 0, 0, 1, 1, 2], [0], [0]>} : vector<8x8x32xbf16>, vector<8x32x4xbf16>, vector<8x8x4xf32> -> vector<8x8x4xf32>
    "tpu.trace_stop"() : () -> ()
    %c0_38 = arith.constant 0 : index
    %c0_39 = arith.constant 0 : index
    %c0_40 = arith.constant 0 : index
    %c0_41 = arith.constant 0 : index
    %58 = vector.load %arg13[%c0_38, %c0_39, %c0_40, %c0_41] : memref<2x8x1x4xf32, #tpu.memory_space<vmem>>, vector<1x8x1x4xf32>
    %59 = vector.shape_cast %58 : vector<1x8x1x4xf32> to vector<8x1x4xf32>
    %60 = vector.broadcast %59 : vector<8x1x4xf32> to vector<8x8x4xf32>
    %61 = arith.addf %57, %60 : vector<8x8x4xf32>
    %c0_42 = arith.constant 0 : index
    %c0_43 = arith.constant 0 : index
    %c0_44 = arith.constant 0 : index
    %c0_45 = arith.constant 0 : index
    %62 = vector.load %arg14[%c0_42, %c0_43, %c0_44, %c0_45] : memref<2x8x32x4xbf16, #tpu.memory_space<vmem>>, vector<1x8x32x4xbf16>
    %63 = vector.shape_cast %62 : vector<1x8x32x4xbf16> to vector<8x32x4xbf16>
    "tpu.trace_start"() <{level = 10 : i32, message = "hnk,hkd->hnd"}> : () -> ()
    %cst_46 = arith.constant dense<0.000000e+00> : vector<8x8x4xf32>
    %64 = tpu.matmul %54, %63, %cst_46 {dimension_numbers = #tpu.dot_dimension_numbers<[2], [1], [1], [2], [0, 0, 0, 1, 1, 2], [0], [0]>} : vector<8x8x32xbf16>, vector<8x32x4xbf16>, vector<8x8x4xf32> -> vector<8x8x4xf32>
    "tpu.trace_stop"() : () -> ()
    %c0_47 = arith.constant 0 : index
    %c0_48 = arith.constant 0 : index
    %c0_49 = arith.constant 0 : index
    %c0_50 = arith.constant 0 : index
    %65 = vector.load %arg15[%c0_47, %c0_48, %c0_49, %c0_50] : memref<2x8x1x4xf32, #tpu.memory_space<vmem>>, vector<1x8x1x4xf32>
    %66 = vector.shape_cast %65 : vector<1x8x1x4xf32> to vector<8x1x4xf32>
    %67 = vector.broadcast %66 : vector<8x1x4xf32> to vector<8x8x4xf32>
    %68 = arith.addf %64, %67 : vector<8x8x4xf32>
    %c0_51 = arith.constant 0 : index
    %c0_52 = arith.constant 0 : index
    %c0_53 = arith.constant 0 : index
    %c0_54 = arith.constant 0 : index
    %69 = vector.load %arg16[%c0_51, %c0_52, %c0_53, %c0_54] : memref<2x8x32x4xbf16, #tpu.memory_space<vmem>>, vector<1x8x32x4xbf16>
    %70 = vector.shape_cast %69 : vector<1x8x32x4xbf16> to vector<8x32x4xbf16>
    "tpu.trace_start"() <{level = 10 : i32, message = "hnk,hkd->hnd"}> : () -> ()
    %cst_55 = arith.constant dense<0.000000e+00> : vector<8x8x4xf32>
    %71 = tpu.matmul %54, %70, %cst_55 {dimension_numbers = #tpu.dot_dimension_numbers<[2], [1], [1], [2], [0, 0, 0, 1, 1, 2], [0], [0]>} : vector<8x8x32xbf16>, vector<8x32x4xbf16>, vector<8x8x4xf32> -> vector<8x8x4xf32>
    "tpu.trace_stop"() : () -> ()
    %c0_56 = arith.constant 0 : index
    %c0_57 = arith.constant 0 : index
    %c0_58 = arith.constant 0 : index
    %c0_59 = arith.constant 0 : index
    %72 = vector.load %arg17[%c0_56, %c0_57, %c0_58, %c0_59] : memref<2x8x1x4xf32, #tpu.memory_space<vmem>>, vector<1x8x1x4xf32>
    %73 = vector.shape_cast %72 : vector<1x8x1x4xf32> to vector<8x1x4xf32>
    %74 = vector.broadcast %73 : vector<8x1x4xf32> to vector<8x8x4xf32>
    %75 = arith.addf %71, %74 : vector<8x8x4xf32>
    "tpu.trace_start"() <{level = 10 : i32, message = "hqd,hkd->hqk"}> : () -> ()
    %cst_60 = arith.constant dense<0.000000e+00> : vector<8x8x8xf32>
    %76 = tpu.matmul %61, %68, %cst_60 {dimension_numbers = #tpu.dot_dimension_numbers<[2], [2], [1], [1], [0, 0, 0, 1, 1, 1], [0], [0]>} : vector<8x8x4xf32>, vector<8x8x4xf32>, vector<8x8x8xf32> -> vector<8x8x8xf32>
    "tpu.trace_stop"() : () -> ()
    %cst_61 = arith.constant dense<0xFF800000> : vector<8x8xf32>
    %77 = vector.multi_reduction <maximumf>, %76, %cst_61 [2] : vector<8x8x8xf32> to vector<8x8xf32>
    %78 = vector.shape_cast %77 : vector<8x8xf32> to vector<8x8x1xf32>
    %79 = vector.broadcast %78 : vector<8x8x1xf32> to vector<8x8x8xf32>
    %80 = arith.subf %76, %79 : vector<8x8x8xf32>
    %81 = math.exp %80 : vector<8x8x8xf32>
    %cst_62 = arith.constant dense<0.000000e+00> : vector<8x8xf32>
    %82 = vector.multi_reduction <add>, %81, %cst_62 [2] : vector<8x8x8xf32> to vector<8x8xf32>
    %83 = vector.shape_cast %82 : vector<8x8xf32> to vector<8x8x1xf32>
    %84 = tpu.reciprocal %83 {approx = true} : vector<8x8x1xf32> -> vector<8x8x1xf32>
    %85 = vector.broadcast %84 : vector<8x8x1xf32> to vector<8x8x8xf32>
    %86 = arith.mulf %81, %85 : vector<8x8x8xf32>
    "tpu.trace_start"() <{level = 10 : i32, message = "hqk,hkd->hqd"}> : () -> ()
    %cst_63 = arith.constant dense<0.000000e+00> : vector<8x8x4xf32>
    %87 = tpu.matmul %86, %75, %cst_63 {dimension_numbers = #tpu.dot_dimension_numbers<[2], [1], [1], [2], [0, 0, 0, 1, 1, 2], [0], [0]>} : vector<8x8x8xf32>, vector<8x8x4xf32>, vector<8x8x4xf32> -> vector<8x8x4xf32>
    "tpu.trace_stop"() : () -> ()
    %88 = arith.truncf %87 : vector<8x8x4xf32> to vector<8x8x4xbf16>
    %c0_64 = arith.constant 0 : index
    %c0_65 = arith.constant 0 : index
    %c0_66 = arith.constant 0 : index
    %c0_67 = arith.constant 0 : index
    %89 = vector.load %arg18[%c0_64, %c0_65, %c0_66, %c0_67] : memref<2x8x4x32xbf16, #tpu.memory_space<vmem>>, vector<1x8x4x32xbf16>
    %90 = vector.shape_cast %89 : vector<1x8x4x32xbf16> to vector<8x4x32xbf16>
    "tpu.trace_start"() <{level = 10 : i32, message = "hnd,hdk->hnk"}> : () -> ()
    %cst_68 = arith.constant dense<0.000000e+00> : vector<8x8x32xf32>
    %91 = tpu.matmul %88, %90, %cst_68 {dimension_numbers = #tpu.dot_dimension_numbers<[2], [1], [1], [2], [0, 0, 0, 1, 1, 2], [0], [0]>} : vector<8x8x4xbf16>, vector<8x4x32xbf16>, vector<8x8x32xf32> -> vector<8x8x32xf32>
    "tpu.trace_stop"() : () -> ()
    %cst_69 = arith.constant dense<0.000000e+00> : vector<8x32xf32>
    %92 = vector.multi_reduction <add>, %91, %cst_69 [0] : vector<8x8x32xf32> to vector<8x32xf32>
    %93 = arith.addf %27, %92 : vector<8x32xf32>
    %c0_70 = arith.constant 0 : index
    %c0_71 = arith.constant 0 : index
    %c0_72 = arith.constant 0 : index
    %94 = vector.load %arg19[%c0_70, %c0_71, %c0_72] : memref<2x1x32xf32, #tpu.memory_space<vmem>>, vector<1x1x32xf32>
    %95 = vector.shape_cast %94 : vector<1x1x32xf32> to vector<1x32xf32>
    %96 = vector.broadcast %95 : vector<1x32xf32> to vector<8x32xf32>
    %97 = arith.addf %93, %96 : vector<8x32xf32>
    %c0_73 = arith.constant 0 : index
    %c0_74 = arith.constant 0 : index
    %c0_75 = arith.constant 0 : index
    %98 = vector.load %arg20[%c0_73, %c0_74, %c0_75] : memref<2x1x32xf32, #tpu.memory_space<vmem>>, vector<1x1x32xf32>
    %99 = vector.shape_cast %98 : vector<1x1x32xf32> to vector<1x32xf32>
    %c0_76 = arith.constant 0 : index
    %c0_77 = arith.constant 0 : index
    %c0_78 = arith.constant 0 : index
    %100 = vector.load %arg21[%c0_76, %c0_77, %c0_78] : memref<2x1x32xf32, #tpu.memory_space<vmem>>, vector<1x1x32xf32>
    %101 = vector.shape_cast %100 : vector<1x1x32xf32> to vector<1x32xf32>
    %cst_79 = arith.constant dense<0.000000e+00> : vector<8xf32>
    %102 = vector.multi_reduction <add>, %97, %cst_79 [1] : vector<8x32xf32> to vector<8xf32>
    %103 = vector.shape_cast %102 : vector<8xf32> to vector<8x1xf32>
    %cst_80 = arith.constant 3.200000e+01 : f32
    %104 = vector.broadcast %cst_80 : f32 to vector<8x1xf32>
    %105 = arith.divf %103, %104 : vector<8x1xf32>
    %106 = vector.broadcast %105 : vector<8x1xf32> to vector<8x32xf32>
    %107 = arith.subf %97, %106 : vector<8x32xf32>
    %108 = arith.mulf %107, %107 : vector<8x32xf32>
    %cst_81 = arith.constant dense<0.000000e+00> : vector<8xf32>
    %109 = vector.multi_reduction <add>, %108, %cst_81 [1] : vector<8x32xf32> to vector<8xf32>
    %110 = vector.shape_cast %109 : vector<8xf32> to vector<8x1xf32>
    %cst_82 = arith.constant 0.0322580636 : f32
    %111 = vector.broadcast %cst_82 : f32 to vector<8x1xf32>
    %112 = arith.mulf %110, %111 : vector<8x1xf32>
    %113 = vector.broadcast %99 : vector<1x32xf32> to vector<8x32xf32>
    %114 = arith.mulf %113, %107 : vector<8x32xf32>
    %115 = math.sqrt %112 : vector<8x1xf32>
    %cst_83 = arith.constant 9.99999997E-7 : f32
    %116 = vector.broadcast %cst_83 : f32 to vector<8x1xf32>
    %117 = arith.addf %115, %116 : vector<8x1xf32>
    %118 = vector.broadcast %117 : vector<8x1xf32> to vector<8x32xf32>
    %119 = arith.divf %114, %118 : vector<8x32xf32>
    %120 = vector.broadcast %101 : vector<1x32xf32> to vector<8x32xf32>
    %121 = arith.addf %119, %120 : vector<8x32xf32>
    %122 = arith.truncf %121 : vector<8x32xf32> to vector<8x32xbf16>
    %c0_84 = arith.constant 0 : index
    %c0_85 = arith.constant 0 : index
    %c0_86 = arith.constant 0 : index
    %123 = vector.load %arg22[%c0_84, %c0_85, %c0_86] : memref<2x32x64xbf16, #tpu.memory_space<vmem>>, vector<1x32x64xbf16>
    %124 = vector.shape_cast %123 : vector<1x32x64xbf16> to vector<32x64xbf16>
    %cst_87 = arith.constant dense<0.000000e+00> : vector<8x64xf32>
    %125 = tpu.matmul %122, %124, %cst_87 {dimension_numbers = #tpu.dot_dimension_numbers<[1], [0], [0], [1], [0, 0, 1, 1], [], []>} : vector<8x32xbf16>, vector<32x64xbf16>, vector<8x64xf32> -> vector<8x64xf32>
    %c0_88 = arith.constant 0 : index
    %c0_89 = arith.constant 0 : index
    %c0_90 = arith.constant 0 : index
    %126 = vector.load %arg23[%c0_88, %c0_89, %c0_90] : memref<2x1x64xf32, #tpu.memory_space<vmem>>, vector<1x1x64xf32>
    %127 = vector.shape_cast %126 : vector<1x1x64xf32> to vector<1x64xf32>
    %128 = vector.broadcast %127 : vector<1x64xf32> to vector<8x64xf32>
    %129 = arith.addf %125, %128 : vector<8x64xf32>
    %cst_91 = arith.constant 0.000000e+00 : f32
    %130 = vector.broadcast %cst_91 : f32 to vector<8x64xf32>
    %131 = arith.maximumf %129, %130 : vector<8x64xf32>
    %132 = arith.truncf %131 : vector<8x64xf32> to vector<8x64xbf16>
    %c0_92 = arith.constant 0 : index
    %c0_93 = arith.constant 0 : index
    %c0_94 = arith.constant 0 : index
    %133 = vector.load %arg24[%c0_92, %c0_93, %c0_94] : memref<2x64x32xbf16, #tpu.memory_space<vmem>>, vector<1x64x32xbf16>
    %134 = vector.shape_cast %133 : vector<1x64x32xbf16> to vector<64x32xbf16>
    %cst_95 = arith.constant dense<0.000000e+00> : vector<8x32xf32>
    %135 = tpu.matmul %132, %134, %cst_95 {dimension_numbers = #tpu.dot_dimension_numbers<[1], [0], [0], [1], [0, 0, 1, 1], [], []>} : vector<8x64xbf16>, vector<64x32xbf16>, vector<8x32xf32> -> vector<8x32xf32>
    %136 = arith.addf %97, %135 : vector<8x32xf32>
    %c0_96 = arith.constant 0 : index
    %c0_97 = arith.constant 0 : index
    %c0_98 = arith.constant 0 : index
    %137 = vector.load %arg25[%c0_96, %c0_97, %c0_98] : memref<2x1x32xf32, #tpu.memory_space<vmem>>, vector<1x1x32xf32>
    %138 = vector.shape_cast %137 : vector<1x1x32xf32> to vector<1x32xf32>
    %139 = vector.broadcast %138 : vector<1x32xf32> to vector<8x32xf32>
    %140 = arith.addf %136, %139 : vector<8x32xf32>
    %c1 = arith.constant 1 : index
    %c0_99 = arith.constant 0 : index
    %c0_100 = arith.constant 0 : index
    %141 = vector.load %arg10[%c1, %c0_99, %c0_100] : memref<2x1x32xf32, #tpu.memory_space<vmem>>, vector<1x1x32xf32>
    %142 = vector.shape_cast %141 : vector<1x1x32xf32> to vector<1x32xf32>
    %c1_101 = arith.constant 1 : index
    %c0_102 = arith.constant 0 : index
    %c0_103 = arith.constant 0 : index
    %143 = vector.load %arg11[%c1_101, %c0_102, %c0_103] : memref<2x1x32xf32, #tpu.memory_space<vmem>>, vector<1x1x32xf32>
    %144 = vector.shape_cast %143 : vector<1x1x32xf32> to vector<1x32xf32>
    %cst_104 = arith.constant dense<0.000000e+00> : vector<8xf32>
    %145 = vector.multi_reduction <add>, %140, %cst_104 [1] : vector<8x32xf32> to vector<8xf32>
    %146 = vector.shape_cast %145 : vector<8xf32> to vector<8x1xf32>
    %cst_105 = arith.constant 3.200000e+01 : f32
    %147 = vector.broadcast %cst_105 : f32 to vector<8x1xf32>
    %148 = arith.divf %146, %147 : vector<8x1xf32>
    %149 = vector.broadcast %148 : vector<8x1xf32> to vector<8x32xf32>
    %150 = arith.subf %140, %149 : vector<8x32xf32>
    %151 = arith.mulf %150, %150 : vector<8x32xf32>
    %cst_106 = arith.constant dense<0.000000e+00> : vector<8xf32>
    %152 = vector.multi_reduction <add>, %151, %cst_106 [1] : vector<8x32xf32> to vector<8xf32>
    %153 = vector.shape_cast %152 : vector<8xf32> to vector<8x1xf32>
    %cst_107 = arith.constant 0.0322580636 : f32
    %154 = vector.broadcast %cst_107 : f32 to vector<8x1xf32>
    %155 = arith.mulf %153, %154 : vector<8x1xf32>
    %156 = vector.broadcast %142 : vector<1x32xf32> to vector<8x32xf32>
    %157 = arith.mulf %156, %150 : vector<8x32xf32>
    %158 = math.sqrt %155 : vector<8x1xf32>
    %cst_108 = arith.constant 9.99999997E-7 : f32
    %159 = vector.broadcast %cst_108 : f32 to vector<8x1xf32>
    %160 = arith.addf %158, %159 : vector<8x1xf32>
    %161 = vector.broadcast %160 : vector<8x1xf32> to vector<8x32xf32>
    %162 = arith.divf %157, %161 : vector<8x32xf32>
    %163 = vector.broadcast %144 : vector<1x32xf32> to vector<8x32xf32>
    %164 = arith.addf %162, %163 : vector<8x32xf32>
    %165 = arith.truncf %164 : vector<8x32xf32> to vector<8x32xbf16>
    %166 = vector.shape_cast %165 : vector<8x32xbf16> to vector<1x8x32xbf16>
    %167 = vector.broadcast %166 : vector<1x8x32xbf16> to vector<8x8x32xbf16>
    %c1_109 = arith.constant 1 : index
    %c0_110 = arith.constant 0 : index
    %c0_111 = arith.constant 0 : index
    %c0_112 = arith.constant 0 : index
    %168 = vector.load %arg12[%c1_109, %c0_110, %c0_111, %c0_112] : memref<2x8x32x4xbf16, #tpu.memory_space<vmem>>, vector<1x8x32x4xbf16>
    %169 = vector.shape_cast %168 : vector<1x8x32x4xbf16> to vector<8x32x4xbf16>
    "tpu.trace_start"() <{level = 10 : i32, message = "hnk,hkd->hnd"}> : () -> ()
    %cst_113 = arith.constant dense<0.000000e+00> : vector<8x8x4xf32>
    %170 = tpu.matmul %167, %169, %cst_113 {dimension_numbers = #tpu.dot_dimension_numbers<[2], [1], [1], [2], [0, 0, 0, 1, 1, 2], [0], [0]>} : vector<8x8x32xbf16>, vector<8x32x4xbf16>, vector<8x8x4xf32> -> vector<8x8x4xf32>
    "tpu.trace_stop"() : () -> ()
    %c1_114 = arith.constant 1 : index
    %c0_115 = arith.constant 0 : index
    %c0_116 = arith.constant 0 : index
    %c0_117 = arith.constant 0 : index
    %171 = vector.load %arg13[%c1_114, %c0_115, %c0_116, %c0_117] : memref<2x8x1x4xf32, #tpu.memory_space<vmem>>, vector<1x8x1x4xf32>
    %172 = vector.shape_cast %171 : vector<1x8x1x4xf32> to vector<8x1x4xf32>
    %173 = vector.broadcast %172 : vector<8x1x4xf32> to vector<8x8x4xf32>
    %174 = arith.addf %170, %173 : vector<8x8x4xf32>
    %c1_118 = arith.constant 1 : index
    %c0_119 = arith.constant 0 : index
    %c0_120 = arith.constant 0 : index
    %c0_121 = arith.constant 0 : index
    %175 = vector.load %arg14[%c1_118, %c0_119, %c0_120, %c0_121] : memref<2x8x32x4xbf16, #tpu.memory_space<vmem>>, vector<1x8x32x4xbf16>
    %176 = vector.shape_cast %175 : vector<1x8x32x4xbf16> to vector<8x32x4xbf16>
    "tpu.trace_start"() <{level = 10 : i32, message = "hnk,hkd->hnd"}> : () -> ()
    %cst_122 = arith.constant dense<0.000000e+00> : vector<8x8x4xf32>
    %177 = tpu.matmul %167, %176, %cst_122 {dimension_numbers = #tpu.dot_dimension_numbers<[2], [1], [1], [2], [0, 0, 0, 1, 1, 2], [0], [0]>} : vector<8x8x32xbf16>, vector<8x32x4xbf16>, vector<8x8x4xf32> -> vector<8x8x4xf32>
    "tpu.trace_stop"() : () -> ()
    %c1_123 = arith.constant 1 : index
    %c0_124 = arith.constant 0 : index
    %c0_125 = arith.constant 0 : index
    %c0_126 = arith.constant 0 : index
    %178 = vector.load %arg15[%c1_123, %c0_124, %c0_125, %c0_126] : memref<2x8x1x4xf32, #tpu.memory_space<vmem>>, vector<1x8x1x4xf32>
    %179 = vector.shape_cast %178 : vector<1x8x1x4xf32> to vector<8x1x4xf32>
    %180 = vector.broadcast %179 : vector<8x1x4xf32> to vector<8x8x4xf32>
    %181 = arith.addf %177, %180 : vector<8x8x4xf32>
    %c1_127 = arith.constant 1 : index
    %c0_128 = arith.constant 0 : index
    %c0_129 = arith.constant 0 : index
    %c0_130 = arith.constant 0 : index
    %182 = vector.load %arg16[%c1_127, %c0_128, %c0_129, %c0_130] : memref<2x8x32x4xbf16, #tpu.memory_space<vmem>>, vector<1x8x32x4xbf16>
    %183 = vector.shape_cast %182 : vector<1x8x32x4xbf16> to vector<8x32x4xbf16>
    "tpu.trace_start"() <{level = 10 : i32, message = "hnk,hkd->hnd"}> : () -> ()
    %cst_131 = arith.constant dense<0.000000e+00> : vector<8x8x4xf32>
    %184 = tpu.matmul %167, %183, %cst_131 {dimension_numbers = #tpu.dot_dimension_numbers<[2], [1], [1], [2], [0, 0, 0, 1, 1, 2], [0], [0]>} : vector<8x8x32xbf16>, vector<8x32x4xbf16>, vector<8x8x4xf32> -> vector<8x8x4xf32>
    "tpu.trace_stop"() : () -> ()
    %c1_132 = arith.constant 1 : index
    %c0_133 = arith.constant 0 : index
    %c0_134 = arith.constant 0 : index
    %c0_135 = arith.constant 0 : index
    %185 = vector.load %arg17[%c1_132, %c0_133, %c0_134, %c0_135] : memref<2x8x1x4xf32, #tpu.memory_space<vmem>>, vector<1x8x1x4xf32>
    %186 = vector.shape_cast %185 : vector<1x8x1x4xf32> to vector<8x1x4xf32>
    %187 = vector.broadcast %186 : vector<8x1x4xf32> to vector<8x8x4xf32>
    %188 = arith.addf %184, %187 : vector<8x8x4xf32>
    "tpu.trace_start"() <{level = 10 : i32, message = "hqd,hkd->hqk"}> : () -> ()
    %cst_136 = arith.constant dense<0.000000e+00> : vector<8x8x8xf32>
    %189 = tpu.matmul %174, %181, %cst_136 {dimension_numbers = #tpu.dot_dimension_numbers<[2], [2], [1], [1], [0, 0, 0, 1, 1, 1], [0], [0]>} : vector<8x8x4xf32>, vector<8x8x4xf32>, vector<8x8x8xf32> -> vector<8x8x8xf32>
    "tpu.trace_stop"() : () -> ()
    %cst_137 = arith.constant dense<0xFF800000> : vector<8x8xf32>
    %190 = vector.multi_reduction <maximumf>, %189, %cst_137 [2] : vector<8x8x8xf32> to vector<8x8xf32>
    %191 = vector.shape_cast %190 : vector<8x8xf32> to vector<8x8x1xf32>
    %192 = vector.broadcast %191 : vector<8x8x1xf32> to vector<8x8x8xf32>
    %193 = arith.subf %189, %192 : vector<8x8x8xf32>
    %194 = math.exp %193 : vector<8x8x8xf32>
    %cst_138 = arith.constant dense<0.000000e+00> : vector<8x8xf32>
    %195 = vector.multi_reduction <add>, %194, %cst_138 [2] : vector<8x8x8xf32> to vector<8x8xf32>
    %196 = vector.shape_cast %195 : vector<8x8xf32> to vector<8x8x1xf32>
    %197 = tpu.reciprocal %196 {approx = true} : vector<8x8x1xf32> -> vector<8x8x1xf32>
    %198 = vector.broadcast %197 : vector<8x8x1xf32> to vector<8x8x8xf32>
    %199 = arith.mulf %194, %198 : vector<8x8x8xf32>
    "tpu.trace_start"() <{level = 10 : i32, message = "hqk,hkd->hqd"}> : () -> ()
    %cst_139 = arith.constant dense<0.000000e+00> : vector<8x8x4xf32>
    %200 = tpu.matmul %199, %188, %cst_139 {dimension_numbers = #tpu.dot_dimension_numbers<[2], [1], [1], [2], [0, 0, 0, 1, 1, 2], [0], [0]>} : vector<8x8x8xf32>, vector<8x8x4xf32>, vector<8x8x4xf32> -> vector<8x8x4xf32>
    "tpu.trace_stop"() : () -> ()
    %201 = arith.truncf %200 : vector<8x8x4xf32> to vector<8x8x4xbf16>
    %c1_140 = arith.constant 1 : index
    %c0_141 = arith.constant 0 : index
    %c0_142 = arith.constant 0 : index
    %c0_143 = arith.constant 0 : index
    %202 = vector.load %arg18[%c1_140, %c0_141, %c0_142, %c0_143] : memref<2x8x4x32xbf16, #tpu.memory_space<vmem>>, vector<1x8x4x32xbf16>
    %203 = vector.shape_cast %202 : vector<1x8x4x32xbf16> to vector<8x4x32xbf16>
    "tpu.trace_start"() <{level = 10 : i32, message = "hnd,hdk->hnk"}> : () -> ()
    %cst_144 = arith.constant dense<0.000000e+00> : vector<8x8x32xf32>
    %204 = tpu.matmul %201, %203, %cst_144 {dimension_numbers = #tpu.dot_dimension_numbers<[2], [1], [1], [2], [0, 0, 0, 1, 1, 2], [0], [0]>} : vector<8x8x4xbf16>, vector<8x4x32xbf16>, vector<8x8x32xf32> -> vector<8x8x32xf32>
    "tpu.trace_stop"() : () -> ()
    %cst_145 = arith.constant dense<0.000000e+00> : vector<8x32xf32>
    %205 = vector.multi_reduction <add>, %204, %cst_145 [0] : vector<8x8x32xf32> to vector<8x32xf32>
    %206 = arith.addf %140, %205 : vector<8x32xf32>
    %c1_146 = arith.constant 1 : index
    %c0_147 = arith.constant 0 : index
    %c0_148 = arith.constant 0 : index
    %207 = vector.load %arg19[%c1_146, %c0_147, %c0_148] : memref<2x1x32xf32, #tpu.memory_space<vmem>>, vector<1x1x32xf32>
    %208 = vector.shape_cast %207 : vector<1x1x32xf32> to vector<1x32xf32>
    %209 = vector.broadcast %208 : vector<1x32xf32> to vector<8x32xf32>
    %210 = arith.addf %206, %209 : vector<8x32xf32>
    %c1_149 = arith.constant 1 : index
    %c0_150 = arith.constant 0 : index
    %c0_151 = arith.constant 0 : index
    %211 = vector.load %arg20[%c1_149, %c0_150, %c0_151] : memref<2x1x32xf32, #tpu.memory_space<vmem>>, vector<1x1x32xf32>
    %212 = vector.shape_cast %211 : vector<1x1x32xf32> to vector<1x32xf32>
    %c1_152 = arith.constant 1 : index
    %c0_153 = arith.constant 0 : index
    %c0_154 = arith.constant 0 : index
    %213 = vector.load %arg21[%c1_152, %c0_153, %c0_154] : memref<2x1x32xf32, #tpu.memory_space<vmem>>, vector<1x1x32xf32>
    %214 = vector.shape_cast %213 : vector<1x1x32xf32> to vector<1x32xf32>
    %cst_155 = arith.constant dense<0.000000e+00> : vector<8xf32>
    %215 = vector.multi_reduction <add>, %210, %cst_155 [1] : vector<8x32xf32> to vector<8xf32>
    %216 = vector.shape_cast %215 : vector<8xf32> to vector<8x1xf32>
    %cst_156 = arith.constant 3.200000e+01 : f32
    %217 = vector.broadcast %cst_156 : f32 to vector<8x1xf32>
    %218 = arith.divf %216, %217 : vector<8x1xf32>
    %219 = vector.broadcast %218 : vector<8x1xf32> to vector<8x32xf32>
    %220 = arith.subf %210, %219 : vector<8x32xf32>
    %221 = arith.mulf %220, %220 : vector<8x32xf32>
    %cst_157 = arith.constant dense<0.000000e+00> : vector<8xf32>
    %222 = vector.multi_reduction <add>, %221, %cst_157 [1] : vector<8x32xf32> to vector<8xf32>
    %223 = vector.shape_cast %222 : vector<8xf32> to vector<8x1xf32>
    %cst_158 = arith.constant 0.0322580636 : f32
    %224 = vector.broadcast %cst_158 : f32 to vector<8x1xf32>
    %225 = arith.mulf %223, %224 : vector<8x1xf32>
    %226 = vector.broadcast %212 : vector<1x32xf32> to vector<8x32xf32>
    %227 = arith.mulf %226, %220 : vector<8x32xf32>
    %228 = math.sqrt %225 : vector<8x1xf32>
    %cst_159 = arith.constant 9.99999997E-7 : f32
    %229 = vector.broadcast %cst_159 : f32 to vector<8x1xf32>
    %230 = arith.addf %228, %229 : vector<8x1xf32>
    %231 = vector.broadcast %230 : vector<8x1xf32> to vector<8x32xf32>
    %232 = arith.divf %227, %231 : vector<8x32xf32>
    %233 = vector.broadcast %214 : vector<1x32xf32> to vector<8x32xf32>
    %234 = arith.addf %232, %233 : vector<8x32xf32>
    %235 = arith.truncf %234 : vector<8x32xf32> to vector<8x32xbf16>
    %c1_160 = arith.constant 1 : index
    %c0_161 = arith.constant 0 : index
    %c0_162 = arith.constant 0 : index
    %236 = vector.load %arg22[%c1_160, %c0_161, %c0_162] : memref<2x32x64xbf16, #tpu.memory_space<vmem>>, vector<1x32x64xbf16>
    %237 = vector.shape_cast %236 : vector<1x32x64xbf16> to vector<32x64xbf16>
    %cst_163 = arith.constant dense<0.000000e+00> : vector<8x64xf32>
    %238 = tpu.matmul %235, %237, %cst_163 {dimension_numbers = #tpu.dot_dimension_numbers<[1], [0], [0], [1], [0, 0, 1, 1], [], []>} : vector<8x32xbf16>, vector<32x64xbf16>, vector<8x64xf32> -> vector<8x64xf32>
    %c1_164 = arith.constant 1 : index
    %c0_165 = arith.constant 0 : index
    %c0_166 = arith.constant 0 : index
    %239 = vector.load %arg23[%c1_164, %c0_165, %c0_166] : memref<2x1x64xf32, #tpu.memory_space<vmem>>, vector<1x1x64xf32>
    %240 = vector.shape_cast %239 : vector<1x1x64xf32> to vector<1x64xf32>
    %241 = vector.broadcast %240 : vector<1x64xf32> to vector<8x64xf32>
    %242 = arith.addf %238, %241 : vector<8x64xf32>
    %cst_167 = arith.constant 0.000000e+00 : f32
    %243 = vector.broadcast %cst_167 : f32 to vector<8x64xf32>
    %244 = arith.maximumf %242, %243 : vector<8x64xf32>
    %245 = arith.truncf %244 : vector<8x64xf32> to vector<8x64xbf16>
    %c1_168 = arith.constant 1 : index
    %c0_169 = arith.constant 0 : index
    %c0_170 = arith.constant 0 : index
    %246 = vector.load %arg24[%c1_168, %c0_169, %c0_170] : memref<2x64x32xbf16, #tpu.memory_space<vmem>>, vector<1x64x32xbf16>
    %247 = vector.shape_cast %246 : vector<1x64x32xbf16> to vector<64x32xbf16>
    %cst_171 = arith.constant dense<0.000000e+00> : vector<8x32xf32>
    %248 = tpu.matmul %245, %247, %cst_171 {dimension_numbers = #tpu.dot_dimension_numbers<[1], [0], [0], [1], [0, 0, 1, 1], [], []>} : vector<8x64xbf16>, vector<64x32xbf16>, vector<8x32xf32> -> vector<8x32xf32>
    %249 = arith.addf %210, %248 : vector<8x32xf32>
    %c1_172 = arith.constant 1 : index
    %c0_173 = arith.constant 0 : index
    %c0_174 = arith.constant 0 : index
    %250 = vector.load %arg25[%c1_172, %c0_173, %c0_174] : memref<2x1x32xf32, #tpu.memory_space<vmem>>, vector<1x1x32xf32>
    %251 = vector.shape_cast %250 : vector<1x1x32xf32> to vector<1x32xf32>
    %252 = vector.broadcast %251 : vector<1x32xf32> to vector<8x32xf32>
    %253 = arith.addf %249, %252 : vector<8x32xf32>
    %c0_175 = arith.constant 0 : index
    %c0_176 = arith.constant 0 : index
    %254 = vector.load %arg26[%c0_175, %c0_176] : memref<1x32xf32, #tpu.memory_space<vmem>>, vector<1x32xf32>
    %c0_177 = arith.constant 0 : index
    %c0_178 = arith.constant 0 : index
    %255 = vector.load %arg27[%c0_177, %c0_178] : memref<1x32xf32, #tpu.memory_space<vmem>>, vector<1x32xf32>
    %cst_179 = arith.constant dense<0.000000e+00> : vector<8xf32>
    %256 = vector.multi_reduction <add>, %253, %cst_179 [1] : vector<8x32xf32> to vector<8xf32>
    %257 = vector.shape_cast %256 : vector<8xf32> to vector<8x1xf32>
    %cst_180 = arith.constant 3.200000e+01 : f32
    %258 = vector.broadcast %cst_180 : f32 to vector<8x1xf32>
    %259 = arith.divf %257, %258 : vector<8x1xf32>
    %260 = vector.broadcast %259 : vector<8x1xf32> to vector<8x32xf32>
    %261 = arith.subf %253, %260 : vector<8x32xf32>
    %262 = arith.mulf %261, %261 : vector<8x32xf32>
    %cst_181 = arith.constant dense<0.000000e+00> : vector<8xf32>
    %263 = vector.multi_reduction <add>, %262, %cst_181 [1] : vector<8x32xf32> to vector<8xf32>
    %264 = vector.shape_cast %263 : vector<8xf32> to vector<8x1xf32>
    %cst_182 = arith.constant 0.0322580636 : f32
    %265 = vector.broadcast %cst_182 : f32 to vector<8x1xf32>
    %266 = arith.mulf %264, %265 : vector<8x1xf32>
    %267 = vector.broadcast %254 : vector<1x32xf32> to vector<8x32xf32>
    %268 = arith.mulf %267, %261 : vector<8x32xf32>
    %269 = math.sqrt %266 : vector<8x1xf32>
    %cst_183 = arith.constant 9.99999997E-7 : f32
    %270 = vector.broadcast %cst_183 : f32 to vector<8x1xf32>
    %271 = arith.addf %269, %270 : vector<8x1xf32>
    %272 = vector.broadcast %271 : vector<8x1xf32> to vector<8x32xf32>
    %273 = arith.divf %268, %272 : vector<8x32xf32>
    %274 = vector.broadcast %255 : vector<1x32xf32> to vector<8x32xf32>
    %275 = arith.addf %273, %274 : vector<8x32xf32>
    %276 = arith.truncf %275 : vector<8x32xf32> to vector<8x32xbf16>
    %c0_184 = arith.constant 0 : index
    %c0_185 = arith.constant 0 : index
    %277 = vector.load %arg28[%c0_184, %c0_185] : memref<32x128xbf16, #tpu.memory_space<vmem>>, vector<32x128xbf16>
    %cst_186 = arith.constant dense<0.000000e+00> : vector<8x128xf32>
    %278 = tpu.matmul %276, %277, %cst_186 {dimension_numbers = #tpu.dot_dimension_numbers<[1], [0], [0], [1], [0, 0, 1, 1], [], []>} : vector<8x32xbf16>, vector<32x128xbf16>, vector<8x128xf32> -> vector<8x128xf32>
    %c0_187 = arith.constant 0 : index
    %c0_188 = arith.constant 0 : index
    %279 = vector.load %arg29[%c0_187, %c0_188] : memref<1x128xf32, #tpu.memory_space<vmem>>, vector<1x128xf32>
    %280 = vector.broadcast %279 : vector<1x128xf32> to vector<8x128xf32>
    %281 = arith.addf %278, %280 : vector<8x128xf32>
    %c0_189 = arith.constant 0 : index
    %c0_190 = arith.constant 0 : index
    %282 = vector.load %arg30[%c0_189, %c0_190] : memref<8x128xf32, #tpu.memory_space<vmem>>, vector<8x128xf32>
    tpu.vector_store %arg30[%c0_189, %c0_190], %281 {strides = array<i32>} : memref<8x128xf32, #tpu.memory_space<vmem>>, vector<8x128xf32>,
    return
  }
  func.func @transform_0(%arg0: i32) -> (i32, i32) {
    %c0_i32 = arith.constant 0 : i32
    %c0_i32_0 = arith.constant 0 : i32
    return %arg0, %c0_i32 : i32, i32
  }
  func.func @transform_1(%arg0: i32) -> (i32, i32) {
    %c0_i32 = arith.constant 0 : i32
    %c0_i32_0 = arith.constant 0 : i32
    return %arg0, %c0_i32 : i32, i32
  }
  func.func @transform_2(%arg0: i32) -> (i32, i32) {
    %c0_i32 = arith.constant 0 : i32
    %c0_i32_0 = arith.constant 0 : i32
    %c0_i32_1 = arith.constant 0 : i32
    return %c0_i32, %c0_i32_0 : i32, i32
  }
  func.func @transform_3(%arg0: i32) -> (i32, i32) {
    %c0_i32 = arith.constant 0 : i32
    %c0_i32_0 = arith.constant 0 : i32
    %c0_i32_1 = arith.constant 0 : i32
    return %c0_i32, %c0_i32_0 : i32, i32
  }
  func.func @transform_4(%arg0: i32) -> (i32, i32) {
    %c0_i32 = arith.constant 0 : i32
    %c0_i32_0 = arith.constant 0 : i32
    %c0_i32_1 = arith.constant 0 : i32
    return %c0_i32, %c0_i32_0 : i32, i32
  }
  func.func @transform_5(%arg0: i32) -> (i32, i32) {
    %c0_i32 = arith.constant 0 : i32
    %c0_i32_0 = arith.constant 0 : i32
    %c0_i32_1 = arith.constant 0 : i32
    return %c0_i32, %c0_i32_0 : i32, i32
  }
  func.func @transform_6(%arg0: i32) -> (i32, i32) {
    %c0_i32 = arith.constant 0 : i32
    %c0_i32_0 = arith.constant 0 : i32
    %c0_i32_1 = arith.constant 0 : i32
    return %c0_i32, %c0_i32_0 : i32, i32
  }
  func.func @transform_7(%arg0: i32) -> (i32, i32) {
    %c0_i32 = arith.constant 0 : i32
    %c0_i32_0 = arith.constant 0 : i32
    %c0_i32_1 = arith.constant 0 : i32
    return %c0_i32, %c0_i32_0 : i32, i32
  }
  func.func @transform_8(%arg0: i32) -> (i32, i32) {
    %c0_i32 = arith.constant 0 : i32
    %c0_i32_0 = arith.constant 0 : i32
    %c0_i32_1 = arith.constant 0 : i32
    return %c0_i32, %c0_i32_0 : i32, i32
  }
  func.func @transform_9(%arg0: i32) -> (i32, i32, i32) {
    %c0_i32 = arith.constant 0 : i32
    %c0_i32_0 = arith.constant 0 : i32
    %c0_i32_1 = arith.constant 0 : i32
    %c0_i32_2 = arith.constant 0 : i32
    return %c0_i32, %c0_i32_0, %c0_i32_1 : i32, i32, i32
  }
  func.func @transform_10(%arg0: i32) -> (i32, i32, i32) {
    %c0_i32 = arith.constant 0 : i32
    %c0_i32_0 = arith.constant 0 : i32
    %c0_i32_1 = arith.constant 0 : i32
    %c0_i32_2 = arith.constant 0 : i32
    return %c0_i32, %c0_i32_0, %c0_i32_1 : i32, i32, i32
  }
  func.func @transform_11(%arg0: i32) -> (i32, i32, i32, i32) {
    %c0_i32 = arith.constant 0 : i32
    %c0_i32_0 = arith.constant 0 : i32
    %c0_i32_1 = arith.constant 0 : i32
    %c0_i32_2 = arith.constant 0 : i32
    %c0_i32_3 = arith.constant 0 : i32
    return %c0_i32, %c0_i32_0, %c0_i32_1, %c0_i32_2 : i32, i32, i32, i32
  }
  func.func @transform_12(%arg0: i32) -> (i32, i32, i32, i32) {
    %c0_i32 = arith.constant 0 : i32
    %c0_i32_0 = arith.constant 0 : i32
    %c0_i32_1 = arith.constant 0 : i32
    %c0_i32_2 = arith.constant 0 : i32
    %c0_i32_3 = arith.constant 0 : i32
    return %c0_i32, %c0_i32_0, %c0_i32_1, %c0_i32_2 : i32, i32, i32, i32
  }
  func.func @transform_13(%arg0: i32) -> (i32, i32, i32, i32) {
    %c0_i32 = arith.constant 0 : i32
    %c0_i32_0 = arith.constant 0 : i32
    %c0_i32_1 = arith.constant 0 : i32
    %c0_i32_2 = arith.constant 0 : i32
    %c0_i32_3 = arith.constant 0 : i32
    return %c0_i32, %c0_i32_0, %c0_i32_1, %c0_i32_2 : i32, i32, i32, i32
  }
  func.func @transform_14(%arg0: i32) -> (i32, i32, i32, i32) {
    %c0_i32 = arith.constant 0 : i32
    %c0_i32_0 = arith.constant 0 : i32
    %c0_i32_1 = arith.constant 0 : i32
    %c0_i32_2 = arith.constant 0 : i32
    %c0_i32_3 = arith.constant 0 : i32
    return %c0_i32, %c0_i32_0, %c0_i32_1, %c0_i32_2 : i32, i32, i32, i32
  }
  func.func @transform_15(%arg0: i32) -> (i32, i32, i32, i32) {
    %c0_i32 = arith.constant 0 : i32
    %c0_i32_0 = arith.constant 0 : i32
    %c0_i32_1 = arith.constant 0 : i32
    %c0_i32_2 = arith.constant 0 : i32
    %c0_i32_3 = arith.constant 0 : i32
    return %c0_i32, %c0_i32_0, %c0_i32_1, %c0_i32_2 : i32, i32, i32, i32
  }
  func.func @transform_16(%arg0: i32) -> (i32, i32, i32, i32) {
    %c0_i32 = arith.constant 0 : i32
    %c0_i32_0 = arith.constant 0 : i32
    %c0_i32_1 = arith.constant 0 : i32
    %c0_i32_2 = arith.constant 0 : i32
    %c0_i32_3 = arith.constant 0 : i32
    return %c0_i32, %c0_i32_0, %c0_i32_1, %c0_i32_2 : i32, i32, i32, i32
  }
  func.func @transform_17(%arg0: i32) -> (i32, i32, i32, i32) {
    %c0_i32 = arith.constant 0 : i32
    %c0_i32_0 = arith.constant 0 : i32
    %c0_i32_1 = arith.constant 0 : i32
    %c0_i32_2 = arith.constant 0 : i32
    %c0_i32_3 = arith.constant 0 : i32
    return %c0_i32, %c0_i32_0, %c0_i32_1, %c0_i32_2 : i32, i32, i32, i32
  }
  func.func @transform_18(%arg0: i32) -> (i32, i32, i32) {
    %c0_i32 = arith.constant 0 : i32
    %c0_i32_0 = arith.constant 0 : i32
    %c0_i32_1 = arith.constant 0 : i32
    %c0_i32_2 = arith.constant 0 : i32
    return %c0_i32, %c0_i32_0, %c0_i32_1 : i32, i32, i32
  }
  func.func @transform_19(%arg0: i32) -> (i32, i32, i32) {
    %c0_i32 = arith.constant 0 : i32
    %c0_i32_0 = arith.constant 0 : i32
    %c0_i32_1 = arith.constant 0 : i32
    %c0_i32_2 = arith.constant 0 : i32
    return %c0_i32, %c0_i32_0, %c0_i32_1 : i32, i32, i32
  }
  func.func @transform_20(%arg0: i32) -> (i32, i32, i32) {
    %c0_i32 = arith.constant 0 : i32
    %c0_i32_0 = arith.constant 0 : i32
    %c0_i32_1 = arith.constant 0 : i32
    %c0_i32_2 = arith.constant 0 : i32
    return %c0_i32, %c0_i32_0, %c0_i32_1 : i32, i32, i32
  }
  func.func @transform_21(%arg0: i32) -> (i32, i32, i32) {
    %c0_i32 = arith.constant 0 : i32
    %c0_i32_0 = arith.constant 0 : i32
    %c0_i32_1 = arith.constant 0 : i32
    %c0_i32_2 = arith.constant 0 : i32
    return %c0_i32, %c0_i32_0, %c0_i32_1 : i32, i32, i32
  }
  func.func @transform_22(%arg0: i32) -> (i32, i32, i32) {
    %c0_i32 = arith.constant 0 : i32
    %c0_i32_0 = arith.constant 0 : i32
    %c0_i32_1 = arith.constant 0 : i32
    %c0_i32_2 = arith.constant 0 : i32
    return %c0_i32, %c0_i32_0, %c0_i32_1 : i32, i32, i32
  }
  func.func @transform_23(%arg0: i32) -> (i32, i32, i32) {
    %c0_i32 = arith.constant 0 : i32
    %c0_i32_0 = arith.constant 0 : i32
    %c0_i32_1 = arith.constant 0 : i32
    %c0_i32_2 = arith.constant 0 : i32
    return %c0_i32, %c0_i32_0, %c0_i32_1 : i32, i32, i32
  }
  func.func @transform_24(%arg0: i32) -> (i32, i32, i32) {
    %c0_i32 = arith.constant 0 : i32
    %c0_i32_0 = arith.constant 0 : i32
    %c0_i32_1 = arith.constant 0 : i32
    %c0_i32_2 = arith.constant 0 : i32
    return %c0_i32, %c0_i32_0, %c0_i32_1 : i32, i32, i32
  }
  func.func @transform_25(%arg0: i32) -> (i32, i32) {
    %c0_i32 = arith.constant 0 : i32
    %c0_i32_0 = arith.constant 0 : i32
    %c0_i32_1 = arith.constant 0 : i32
    return %c0_i32, %c0_i32_0 : i32, i32
  }
  func.func @transform_26(%arg0: i32) -> (i32, i32) {
    %c0_i32 = arith.constant 0 : i32
    %c0_i32_0 = arith.constant 0 : i32
    %c0_i32_1 = arith.constant 0 : i32
    return %c0_i32, %c0_i32_0 : i32, i32
  }
  func.func @transform_27(%arg0: i32) -> (i32, i32) {
    %c0_i32 = arith.constant 0 : i32
    %c0_i32_0 = arith.constant 0 : i32
    %c0_i32_1 = arith.constant 0 : i32
    return %c0_i32, %c0_i32_0 : i32, i32
  }
  func.func @transform_28(%arg0: i32) -> (i32, i32) {
    %c0_i32 = arith.constant 0 : i32
    %c0_i32_0 = arith.constant 0 : i32
    %c0_i32_1 = arith.constant 0 : i32
    return %c0_i32, %c0_i32_0 : i32, i32
  }
  func.func @transform_29(%arg0: i32) -> (i32, i32) {
    %c0_i32 = arith.constant 0 : i32
    %c0_i32_0 = arith.constant 0 : i32
    return %arg0, %c0_i32 : i32, i32
  }
}

</mosaic_0001>

<bundles_post_ra>
// kernel: tpu_custom_call.1
= control target key start
LH: loop header
LB: loop body
LE: loop exit
PB: predicated region body
PF: predicated region fallthrough
CT: control target
= control target key end

     0   :  { %s10053_s6 = smov 1   ;;  %s10054_s10 = smov 2   ;;  %s11274_s0 = inlined_call_operand.smem [shape: u32[30], index: -1, kind: input, shape index: {}] }
   0x1   :  { %s10093_s5 = sld [smem:[%s11274_s0]]   ;;  %s10055_s14 = smov 3  }
   0x2   :  { %s10098_s9 = sld [smem:[%s11274_s0 + %s10053_s6]]   ;;  %s10056_s18 = smov 4  }
   0x3   :  { %s10103_s13 = sld [smem:[%s11274_s0 + %s10054_s10]]   ;;  %s10057_s22 = smov 5  }
   0x4   :  { %s10108_s17 = sld [smem:[%s11274_s0 + %s10055_s14]]   ;;  %s10058_s26 = smov 6  }
   0x5   :  { %s10113_s21 = sld [smem:[%s11274_s0 + %s10056_s18]]   ;;  %s10059_s30 = smov 7  }
   0x6   :  { %s10118_s25 = sld [smem:[%s11274_s0 + %s10057_s22]]   ;;  %s10060_s4 = smov 8  }
   0x7   :  { %11297 = sst [smem:[#allocation5_spill]] %s10093_s5  ;;  %s10061_s10 = smov 9  }
   0x8   :  { %11298 = sst [smem:[#allocation6_spill]] %s10098_s9  ;;  %s10062_s15 = smov 10  }
   0x9   :  { %11299 = sst [smem:[#allocation7_spill]] %s10103_s13  ;;  %s10063_s20 = smov 11  }
   0xa   :  { %11300 = sst [smem:[#allocation8_spill]] %s10108_s17  ;;  %s10065_s1 = smov 13  }
   0xb   :  { %11301 = sst [smem:[#allocation9_spill]] %s10113_s21  ;;  %s10066_s7 = smov 14  }
   0xc   :  { %s10123_s29 = sld [smem:[%s11274_s0 + %s10058_s26]]   ;;  %s10064_s26 = smov 12  }
   0xd   :  { %s10128_s3 = sld [smem:[%s11274_s0 + %s10059_s30]]   ;;  %s10068_s22 = smov 16  }
   0xe   :  { %s10133_s8 = sld [smem:[%s11274_s0 + %s10060_s4]]   ;;  %s10069_s28 = smov 17  }
   0xf   :  { %s10138_s14 = sld [smem:[%s11274_s0 + %s10061_s10]]  }
  0x10   :  { %s10143_s19 = sld [smem:[%s11274_s0 + %s10062_s15]]   ;;  %s10067_s15 = smov 15  }
  0x11   :  { %s10148_s24 = sld [smem:[%s11274_s0 + %s10063_s20]]  }
  0x12   :  { %s10153_s30 = sld [smem:[%s11274_s0 + %s10064_s26]]  }
  0x13   :  { %11302 = sst [smem:[#allocation10_spill]] %s10128_s3 }
  0x14   :  { %11303 = sst [smem:[#allocation11_spill]] %s10133_s8 }
  0x15   :  { %11304 = sst [smem:[#allocation12_spill]] %s10138_s14 }
  0x16   :  { %s10158_s6 = sld [smem:[%s11274_s0 + %s10065_s1]]  }
  0x17   :  { %s10163_s12 = sld [smem:[%s11274_s0 + %s10066_s7]]   ;;  %s10070_s7 = smov 18  }
  0x18   :  { %11305 = sst [smem:[#allocation13_spill]] %s10153_s30 }
  0x19   :  { %s10168_s20 = sld [smem:[%s11274_s0 + %s10067_s15]]   ;;  %s10071_s15 = smov 19  }
  0x1a   :  { %s10173_s27 = sld [smem:[%s11274_s0 + %s10068_s22]]   ;;  %s10072_s22 = smov 20  }
  0x1b   :  { %s10178_s4 = sld [smem:[%s11274_s0 + %s10069_s28]]   ;;  %s10073_s28 = smov 21  }
  0x1c   :  { %11306 = sst [smem:[#allocation14_spill]] %s10158_s6 }
  0x1d   :  { %11307 = sst [smem:[#allocation15_spill]] %s10163_s12 }
  0x1e   :  { %s10183_s30 = sld [smem:[%s11274_s0 + %s10070_s7]]   ;;  %s10074_s7 = smov 22  }
  0x1f   :  { %s10188_s12 = sld [smem:[%s11274_s0 + %s10071_s15]]   ;;  %s10075_s15 = smov 23  }
  0x20   :  { %11308 = sst [smem:[#allocation16_spill]] %s10173_s27 }
  0x21   :  { %11309 = sst [smem:[#allocation17_spill]] %s10178_s4 }
  0x22   :  { %s10193_s27 = sld [smem:[%s11274_s0 + %s10072_s22]]   ;;  %s10076_s22 = smov 24  }
  0x23   :  { %s10198_s4 = sld [smem:[%s11274_s0 + %s10073_s28]]   ;;  %s10077_s28 = smov 25  }
  0x24   :  { %11310 = sst [smem:[#allocation18_spill]] %s10183_s30 }
  0x25   :  { %11311 = sst [smem:[#allocation19_spill]] %s10188_s12 }
  0x26   :  { %s10203_s30 = sld [smem:[%s11274_s0 + %s10074_s7]]   ;;  %s10078_s7 = smov 26  }
  0x27   :  { %s10208_s12 = sld [smem:[%s11274_s0 + %s10075_s15]]   ;;  %s10079_s15 = smov 27  }
  0x28   :  { %11312 = sst [smem:[#allocation20_spill]] %s10193_s27 }
  0x29   :  { %11313 = sst [smem:[#allocation21_spill]] %s10198_s4 }
  0x2a   :  { %s10213_s27 = sld [smem:[%s11274_s0 + %s10076_s22]]   ;;  %s10080_s22 = smov 28  }
  0x2b   :  { %s10218_s4 = sld [smem:[%s11274_s0 + %s10077_s28]]   ;;  %s10081_s28 = smov 29  }
  0x2c   :  { %11314 = sst [smem:[#allocation22_spill]] %s10203_s30 }
  0x2d   :  { %11315 = sst [smem:[#allocation23_spill]] %s10208_s12 }
  0x2e   :  { %s10223_s30 = sld [smem:[%s11274_s0 + %s10078_s7]]  }
  0x2f   :  { %s10228_s12 = sld [smem:[%s11274_s0 + %s10079_s15]]  }
  0x30   :  { %11316 = sst [smem:[#allocation24_spill]] %s10213_s27 }
  0x31   :  { %11317 = sst [smem:[#allocation25_spill]] %s10218_s4 }
  0x32   :  { %s10233_s27 = sld [smem:[%s11274_s0 + %s10080_s22]]  }
  0x33   :  { %s10238_s4 = sld [smem:[%s11274_s0 + %s10081_s28]]  }
  0x35   :  { %11318 = sst [smem:[#allocation26_spill]] %s10228_s12 }
  0x36   :  { %64 = vsyncpa [#allocation3], 0 }
  0x37   :  { %66 = vsyncpa [#allocation3 + $0x1], 0  ;;  %s10240_s7 = smov 0   ;;  %s10242_s10 = smov 0  }
  0x38   :  { %s10244_s11 = smov 0   ;;  %s10246_s15 = smov 0  }
  0x39 LB: > { %s11319_s14 = sld [smem:[#allocation12_spill]]  ;;  %s11320_s12 = sld [smem:[#allocation26_spill]]  ;;  %s10039_s7 = sphi %s10240_s7, %s11343_s7   ;;  %s10051_s15 = sphi %s10246_s15, %s11346_s15   ;;  %s10047_s11 = sphi %s10244_s11, %s11345_s11   ;;  %s10043_s10 = sphi %s10242_s10, %s11344_s10  }
  0x3a   : > { %s11321_s6 = sld [smem:[#allocation14_spill]]  ;;  %s11322_s21 = sld [smem:[#allocation9_spill]] }
  0x3b   : > { %s11323_s3 = sld [smem:[#allocation10_spill]]  ;;  %s10261_s0 = sadd.s32 4294967295, %s10051_s15  }
  0x3c   : > { %s8268_s16 = sadd.s32 4294967294, %s10051_s15   ;;  %s10265_s18 = sadd.s32 1, %s10051_s15  }
  0x3d   : > { %s698_s22 = sadd.s32 1, %s10047_s11  ;;  %s695_s23 = ssub.s32 %s10051_s15, %s10265_s18 }
  0x3e   : > { %p708_p0 = scmp.ne.s32.totalorder %s10047_s11, %s10043_s10  ;;  %p696_p1 = scmp.eq.s32.totalorder %s695_s23, 0 }
  0x3f   : > { %p709_p2 = scmp.eq.s32.totalorder %s10261_s0, 1  ;;  %p714_p3 = scmp.ne.s32.totalorder %s10043_s10, %s10039_s7 }
  0x40   : > { %p715_p4 = scmp.eq.s32.totalorder %s8268_s16, 1  ;;  %p8271_p7 = scmp.ge.s32.totalorder %s10051_s15, 1 }
  0x41   : > { %s10276_s26 = scalar_select %p696_p1, %s10047_s11, %s698_s22  }
  0x42   : > { %p10278_p5 = por %p709_p2, %p708_p0  ;;  %p10282_p6 = por %p715_p4, %p714_p3 }
  0x43   : > { %p828_p8 = scmp.lt.s32.totalorder %s10051_s15, 3 }
  0x45   : > { %p829_p9 = pnand %p8271_p7, %p828_p8 }
  0x46   : > { %s11326_s13 = sld [smem:[#allocation7_spill]] (!%p829_p9)  ;;  %s11327_s5 = sld [smem:[#allocation5_spill]] (!%p829_p9)  ;;  %vm930_vm0 = vcmask (!%p829_p9), 1041408   ;;  %v10082_v1 = vmov (!%p829_p9), 0.0   ;;  %vm10083_vm1 = vmmov (!%p829_p9), 0   ;;  %vm926_vm2 = vcmask (!%p829_p9), 31744  }
  0x47   : > { %832 = sbr.rel (%p829_p9) target bundleno = 5950 (0x173e), region = 136  ;;  %p907_p10 = scmp.lt.s32.totalorder (!%p829_p9), %s10261_s0, 1  ;;  %9001 = vmatprep.subr.bf16.mxu0 (!%p829_p9), %v10082_v1  ;;  %9003 = vmatprep.mubr.msk.bf16.mxu0 (!%p829_p9), %vm10083_vm1, %v10082_v1  ;;  %v9789_v5 = vld [vmem:[%s11322_s21] sm:$0xff] (!%p829_p9)   ;;  %v9790_v6 = vld [vmem:[%s11322_s21 + $0x8] sm:$0xff] (!%p829_p9)   ;;  %vm999_vm3 = vcmask (!%p829_p9), 261120   ;;  %v9796_v47 = vld [vmem:[%s10148_s24 + $0x10] sm:$0xff] (!%p829_p9)  }
  0x48   : > { %9007 = vmatprep.subr.bf16.mxu1 (!%p829_p9), %v10082_v1  ;;  %9011 = vmatprep.mubr.msk.bf16.mxu1 (!%p829_p9), %vm10083_vm1, %v10082_v1  ;;  %s11328_s17 = sld [smem:[#allocation8_spill]] (!%p829_p9)  ;;  %s11329_s9 = sld [smem:[#allocation6_spill]] (!%p829_p9)  ;;  %v9791_v7 = vld [vmem:[%s11323_s3] sm:$0xff] (!%p829_p9)   ;;  %v9793_v18 = vld [vmem:[%s11323_s3 + $0x8] sm:$0xff] (!%p829_p9)   ;;  %v9798_v49 = vld [vmem:[%s10148_s24 + $0x18] sm:$0xff] (!%p829_p9)   ;;  %vm3334_vm6 = vcmask (!%p829_p9), 64512  }
  0x49   : > { %9008 = vmatpush3.bf16.msra.mxu1 (!%p829_p9), %v9789_v5  ;;  %v9792_v17 = vld [vmem:[%s10123_s29] sm:$0xff] (!%p829_p9)   ;;  %v9794_v20 = vld [vmem:[%s10123_s29 + $0x8] sm:$0xff] (!%p829_p9)   ;;  %s11330_s8 = sld [smem:[#allocation11_spill]] (!%p829_p9)  ;;  %v9802_v5 = vld [vmem:[%s10148_s24 + $0x38] sm:$0xff] (!%p829_p9)   ;;  %s11335_s3 = sld [smem:[#allocation18_spill]] (!%p829_p9)  ;;  %vm4552_vm9 = vcmask (!%p829_p9), 523264  }
  0x4a   : > { %9009 = vmatprep.subr.bf16.mxu1 (!%p829_p9), %v10082_v1  ;;  %v8277_v21 = vld [vmem:[%s10118_s25] ss:$0 sm:$0xff] (!%p829_p9)  ;;  %v9797_v48 = vld [vmem:[%s10148_s24 + $0x8] sm:$0xff] (!%p829_p9)   ;;  %s11341_s21 = sld [smem:[#allocation24_spill]] (!%p829_p9) }
  0x4b   : > { %v9795_v46 = vld [vmem:[%s10148_s24] sm:$0xff] (!%p829_p9)  }
  0x4c   : > { %v918_v0 = vld [vmem:[%s11326_s13] sm:$0x3] (!%p829_p9)  ;;  %s11339_s13 = sld [smem:[#allocation20_spill]] (!%p829_p9) }
  0x4d   : > { %v932_v2 = vsel (!%p829_p9), %vm930_vm0, %v918_v0, 0  ;;  %9010 = vmatpush3.bf16.msra.mxu1 (!%p829_p9), %v9790_v6  ;;  %v8288_v58 = vld [vmem:[%s11319_s14] ss:$0 sm:$0xff] (!%p829_p9) }
  0x4e   : > { %9002 = vmatpush3.bf16.msra.mxu0 %v932_v2  ;;  %s10295_s2 = scalar_select %p907_p10, %s10261_s0, 1  ;;  %9023 = vmatprep.subr.bf16.mxu1 %v10082_v1  ;;  %v8275_v8 = vld [vmem:[%s11328_s17] ss:$0 sm:$0xff]  ;;  %v9800_v2 = vld [vmem:[%s10148_s24 + $0x30] sm:$0xff]  }
  0x4f   : > { %9015 = vmatprep.subr.bf16.mxu0 %v10082_v1  ;;  %v8287_v34 = vld [vmem:[%s11330_s8] ss:$0 sm:$0xff]  ;;  %s11337_s8 = sld [smem:[#allocation23_spill]]  ;;  %s11340_s17 = sld [smem:[#allocation22_spill]] }
  0x50   : > { %s8273_s16 = sshll.u32 %s10295_s2, 3  ;;  %v8289_v61 = vld [vmem:[%s10143_s19] ss:$0 sm:$0xff]  ;;  %s11331_s2 = sld [smem:[#allocation15_spill]] }
  0x51   : > { %s910_s22 = scalar_lea.vmem %s11327_s5, %s8273_s16  ;;  %s914_s23 = scalar_lea.vmem %s11329_s9, %s8273_s16  ;;  %v9799_v0 = vld [vmem:[%s10148_s24 + $0x20] sm:$0xff]  }
  0x52   : > { %v916_v3 = vld [vmem:[%s910_s22] sm:$0xff]  ;;  %s11332_s16 = sld [smem:[#allocation13_spill]]  ;;  %s11333_s22 = sld [smem:[#allocation16_spill]] }
  0x53   : > { %v917_v4 = vpack.c.bf16 %v916_v3, %v916_v3  ;;  %v1049_v16 = vld [vmem:[%s914_s23] sm:$0xff]  ;;  %s11334_s23 = sld [smem:[#allocation17_spill]]  ;;  %s11336_s5 = sld [smem:[#allocation21_spill]] }
  0x54   : > { %v1050_v19 = vpack.c.bf16 %v1049_v16, %v1049_v16  ;;  %v9803_v6 = vld [vmem:[%s10148_s24 + $0x40] sm:$0xff]   ;;  %v9813_v16 = vld [vmem:[%s11321_s6 + $0x8] sm:$0xff]   ;;  %s11338_s9 = sld [smem:[#allocation19_spill]] }
  0x55   : > { %9004 = vmatmul.mubr.msk.bf16.vlgmr.msra.gmra.mrb[0].mxu0 %vm926_vm2, %v917_v4  ;;  %v9801_v4 = vld [vmem:[%s10148_s24 + $0x28] sm:$0xff]  }
  0x56   : > { %9019 = vmatprep.mubr.msk.bf16.mxu0 %vm10083_vm1, %v10082_v1  ;;  %9016 = vmatpush3.bf16.msra.mxu0 %v9791_v7  ;;  %v9804_v7 = vld [vmem:[%s10148_s24 + $0x50] sm:$0xff]  }
  0x57   : > { %9017 = vmatprep.subr.bf16.mxu0 %v10082_v1 }
  0x5a   : > { %9018 = vmatpush3.bf16.msra.mxu0 %v9793_v18  ;;  %v9815_v18 = vld [vmem:[%s11321_s6 + $0x20] sm:$0xff]  }
  0x5b   : > { %9031 = vmatprep.subr.bf16.mxu0 %v10082_v1 }
  0x5d   : > { %9020 = vmatmul.mubr.msk.bf16.vlgmr.msra.gmra.mrb[4].mxu0 %vm999_vm3, %v1050_v19  ;;  %v9816_v19 = vld [vmem:[%s11321_s6 + $0x30] sm:$0xff]  }
  0x5e   : > { %9035 = vmatprep.mubr.msk.bf16.mxu0 %vm10083_vm1, %v10082_v1  ;;  %9032 = vmatpush3.bf16.msra.mxu0 %v9795_v46  ;;  %v9842_v46 = vld [vmem:[%s10168_s20 + $0x78] sm:$0xff]  }
  0x5f   : > { %9033 = vmatprep.subr.bf16.mxu0 %v10082_v1 }
  0x62   : > { %9034 = vmatpush3.bf16.msra.mxu0 %v9797_v48 }
  0x63   : > { %9047 = vmatprep.subr.bf16.mxu0 %v10082_v1 }
 0x128   : > { %v968_v9 = vpop.f32.mrb[0].mxu0 }
 0x129   : > { %v969_v10 = vadd.f32 %v8275_v8, %v968_v9  ;;  %v9005_v11 = vpop.f32.mrb[1].mxu0  ;;  %v9805_v8 = vld [vmem:[%s10148_s24 + $0x48] sm:$0xff]   ;;  %v9806_v9 = vld [vmem:[%s10148_s24 + $0x58] sm:$0xff]  }
 0x12a   : > { %v971_v12 = vpop.f32.mrb[2].mxu0  ;;  %v9808_v11 = vld [vmem:[%s10148_s24 + $0x70] sm:$0xff]  }
 0x12b   : > { %v974_v13 = vmax.f32 %v969_v10, 0.0  ;;  %v9006_v14 = vpop.f32.mrb[3].mxu0  ;;  %v9807_v10 = vld [vmem:[%s10148_s24 + $0x60] sm:$0xff]   ;;  %v9809_v12 = vld [vmem:[%s10148_s24 + $0x68] sm:$0xff]  }
 0x12c   : > { %v9811_v14 = vld [vmem:[%s11321_s6] sm:$0xff]  }
 0x12d   : > { %v975_v15 = vpack.c.bf16 %v974_v13, %v974_v13  ;;  %v9810_v13 = vld [vmem:[%s10148_s24 + $0x78] sm:$0xff]  }
 0x12f   : > { %9012 = vmatmul.mubr.msk.bf16.vlgmr.msra.gmra.mrb[0].mxu1 %vm999_vm3, %v975_v15  ;;  %v9812_v15 = vld [vmem:[%s11321_s6 + $0x10] sm:$0xff]  }
 0x130   : > { %9027 = vmatprep.mubr.msk.bf16.mxu1 %vm10083_vm1, %v10082_v1  ;;  %9024 = vmatpush3.bf16.msra.mxu1 %v9792_v17  ;;  %v1104_v29 = vpop.f32.mrb[4].mxu0  ;;  %v9814_v17 = vld [vmem:[%s11321_s6 + $0x18] sm:$0xff]  }
 0x131   : > { %9025 = vmatprep.subr.bf16.mxu1 %v10082_v1  ;;  %v9021_v30 = vpop.f32.mrb[5].mxu0 }
 0x132   : > { %v1107_v31 = vpop.f32.mrb[6].mxu0  ;;  %v9827_v30 = vld [vmem:[%s10168_s20] sm:$0xff]  }
 0x133   : > { %v9022_v32 = vpop.f32.mrb[7].mxu0  ;;  %v9828_v31 = vld [vmem:[%s10168_s20 + $0x10] sm:$0xff]  }
 0x134   : > { %9026 = vmatpush3.bf16.msra.mxu1 %v9794_v20  ;;  %v9817_v20 = vld [vmem:[%s11321_s6 + $0x28] sm:$0xff]  }
 0x135   : > { %9039 = vmatprep.subr.bf16.mxu1 %v10082_v1  ;;  %v9829_v32 = vld [vmem:[%s10168_s20 + $0x8] sm:$0xff]  }
 0x202   : > { %v1037_v22 = vpop.f32.mrb[0].mxu1 }
 0x203   : > { %v1038_v23 = vadd.f32 %v8277_v21, %v1037_v22  ;;  %v9013_v24 = vpop.f32.mrb[1].mxu1  ;;  %v9818_v21 = vld [vmem:[%s11321_s6 + $0x38] sm:$0xff]   ;;  %v9819_v22 = vld [vmem:[%s11321_s6 + $0x40] sm:$0xff]  }
 0x204   : > { %v1040_v25 = vpop.f32.mrb[2].mxu1  ;;  %v9821_v24 = vld [vmem:[%s11321_s6 + $0x48] sm:$0xff]  }
 0x205   : > { %v1043_v26 = vmax.f32 %v1038_v23, 0.0  ;;  %v9014_v27 = vpop.f32.mrb[3].mxu1  ;;  %v9820_v23 = vld [vmem:[%s11321_s6 + $0x50] sm:$0xff]   ;;  %v9822_v25 = vld [vmem:[%s11321_s6 + $0x58] sm:$0xff]  }
 0x206   : > { %v9824_v27 = vld [vmem:[%s11321_s6 + $0x70] sm:$0xff]  }
 0x207   : > { %v1044_v28 = vpack.c.bf16 %v1043_v26, %v1043_v26  ;;  %v9823_v26 = vld [vmem:[%s11321_s6 + $0x60] sm:$0xff]  }
 0x209   : > { %9028 = vmatmul.mubr.msk.bf16.vlgmr.msra.gmra.mrb[4].mxu1 %vm999_vm3, %v1044_v28  ;;  %v9825_v28 = vld [vmem:[%s11321_s6 + $0x68] sm:$0xff]  }
 0x20a   : > { %9043 = vmatprep.mubr.msk.bf16.mxu1 %vm10083_vm1, %v10082_v1  ;;  %9040 = vmatpush3.bf16.msra.mxu1 %v9796_v47 }
 0x20b   : > { %9041 = vmatprep.subr.bf16.mxu1 %v10082_v1 }
 0x20e   : > { %9042 = vmatpush3.bf16.msra.mxu1 %v9798_v49 }
 0x20f   : > { %9055 = vmatprep.subr.bf16.mxu1 %v10082_v1 }
 0x2dc   : > { %v1159_v33 = vpop.f32.mrb[4].mxu1 }
 0x2dd   : > { %v1160_v35 = vadd.f32 %v1159_v33, %v1104_v29  ;;  %v9029_v36 = vpop.f32.mrb[5].mxu1  ;;  %v9826_v29 = vld [vmem:[%s11321_s6 + $0x78] sm:$0xff]  }
 0x2de   : > { %v1162_v37 = vpop.f32.mrb[6].mxu1  ;;  %v9830_v33 = vld [vmem:[%s10168_s20 + $0x18] sm:$0xff]   ;;  %v9833_v36 = vld [vmem:[%s10168_s20 + $0x28] sm:$0xff]  }
 0x2df   : > { %v10331_v38 = vadd.f32 %v8287_v34, %v1160_v35  ;;  %v9030_v39 = vpop.f32.mrb[7].mxu1  ;;  %v9831_v34 = vld [vmem:[%s10168_s20 + $0x20] sm:$0xff]   ;;  %v9832_v35 = vld [vmem:[%s10168_s20 + $0x30] sm:$0xff]   ;;  %v9834_v37 = vld [vmem:[%s10168_s20 + $0x38] sm:$0xff]  }
 0x2e0   : > { %v9835_v39 = vld [vmem:[%s10168_s20 + $0x40] sm:$0xff]  }
 0x2e1   : > { %v1175_v40 = vsel %vm999_vm3, %v10331_v38, 0.0 }
 0x2e2   : > { %1176 = vadd.xlane.f32.xlu0 %v1175_v40  ;;  %v9836_v40 = vld [vmem:[%s10168_s20 + $0x50] sm:$0xff]  }
 0x36f   : > { %v1177_v41 = vpop.xlane.xlu0 %1176 }
 0x370   : > { %v1179_v42 = vmul.f32 0.03125, %v1177_v41  ;;  %v9837_v41 = vld [vmem:[%s10168_s20 + $0x48] sm:$0xff]  }
 0x372   : > { %v1180_v43 = vsub.f32 %v10331_v38, %v1179_v42  ;;  %v9838_v42 = vld [vmem:[%s10168_s20 + $0x58] sm:$0xff]  }
 0x374   : > { %v1181_v44 = vmul.f32 %v1180_v43, %v1180_v43  ;;  %v1192_v59 = vmul.f32 %v8288_v58, %v1180_v43  ;;  %v9839_v43 = vld [vmem:[%s10168_s20 + $0x60] sm:$0xff]  }
 0x376   : > { %v1182_v45 = vsel %vm999_vm3, %v1181_v44, 0.0  ;;  %v9840_v44 = vld [vmem:[%s10168_s20 + $0x70] sm:$0xff]  }
 0x377   : > { %1183 = vadd.xlane.f32.xlu0 %v1182_v45  ;;  %v9841_v45 = vld [vmem:[%s10168_s20 + $0x68] sm:$0xff]  }
 0x404   : > { %v1184_v50 = vpop.xlane.xlu0 %1183 }
 0x405   : > { %v1185_v51 = vmul.f32 0.032258064, %v1184_v50 }
 0x407   : > { %9905 = vrsqrt.f32 %v1185_v51  ;;  %vm1195_vm4 = vcmp.eq.f32.partialorder %v1185_v51, inf  ;;  %v1198_v54 = vand.u32 2147483648, %v1185_v51  ;;  %vm1197_vm5 = vcmp.eq.f32.partialorder %v1185_v51, 0.0 }
 0x411   : > { %v9906_v52 = vpop.eup %9905 }
 0x412   : > { %v1194_v53 = vmul.f32 %v9906_v52, %v1185_v51 }
 0x414   : > { %v1196_v55 = vsel %vm1195_vm4, %v1185_v51, %v1194_v53 }
 0x415   : > { %v1199_v56 = vsel %vm1197_vm5, %v1198_v54, %v1196_v55 }
 0x416   : > { %v1200_v57 = vadd.f32 1e-06, %v1199_v56 }
 0x418   : > { %9907 = vrcp.f32 %v1200_v57 }
 0x422   : > { %v9908_v60 = vpop.eup %9907 }
 0x423   : > { %v1202_v62 = vmul.f32 %v9908_v60, %v1192_v59 }
 0x425   : > { %v1209_v63 = vadd.f32 %v8289_v61, %v1202_v62 }
 0x427   : > { %v10349_v3 = vpack.c.bf16 %v1209_v63, %v1209_v63 }
 0x429   : > { %9036 = vmatmul.mubr.msk.bf16.vlgmr.msra.gmra.mrb[8].mxu0 %vm999_vm3, %v10349_v3  ;;  %9044 = vmatmul.mubr.msk.bf16.vlgmr.msra.gmra.mrb[8].mxu1 %vm999_vm3, %v10349_v3 }
 0x42a   : > { %9048 = vmatpush3.bf16.msra.mxu0 %v9799_v0  ;;  %9056 = vmatpush3.bf16.msra.mxu1 %v9800_v2 }
 0x42b   : > { %9049 = vmatprep.subr.bf16.mxu0 %v10082_v1  ;;  %9057 = vmatprep.subr.bf16.mxu1 %v10082_v1 }
 0x42c   : > { %9051 = vmatprep.mubr.msk.bf16.mxu0 %vm10083_vm1, %v10082_v1  ;;  %9059 = vmatprep.mubr.msk.bf16.mxu1 %vm10083_vm1, %v10082_v1 }
 0x42e   : > { %9050 = vmatpush3.bf16.msra.mxu0 %v9801_v4  ;;  %9058 = vmatpush3.bf16.msra.mxu1 %v9802_v5 }
 0x42f   : > { %9063 = vmatprep.subr.bf16.mxu0 %v10082_v1  ;;  %9071 = vmatprep.subr.bf16.mxu1 %v10082_v1 }
 0x431   : > { %9052 = vmatmul.mubr.msk.bf16.vlgmr.msra.gmra.mrb[12].mxu0 %vm999_vm3, %v10349_v3  ;;  %9060 = vmatmul.mubr.msk.bf16.vlgmr.msra.gmra.mrb[12].mxu1 %vm999_vm3, %v10349_v3 }
 0x432   : > { %9064 = vmatpush3.bf16.msra.mxu0 %v9803_v6  ;;  %9072 = vmatpush3.bf16.msra.mxu1 %v9804_v7 }
 0x433   : > { %9065 = vmatprep.subr.bf16.mxu0 %v10082_v1  ;;  %9073 = vmatprep.subr.bf16.mxu1 %v10082_v1 }
 0x434   : > { %9067 = vmatprep.mubr.msk.bf16.mxu0 %vm10083_vm1, %v10082_v1  ;;  %9075 = vmatprep.mubr.msk.bf16.mxu1 %vm10083_vm1, %v10082_v1 }
 0x436   : > { %9066 = vmatpush3.bf16.msra.mxu0 %v9805_v8  ;;  %9074 = vmatpush3.bf16.msra.mxu1 %v9806_v9 }
 0x437   : > { %9079 = vmatprep.subr.bf16.mxu0 %v10082_v1  ;;  %9087 = vmatprep.subr.bf16.mxu1 %v10082_v1 }
 0x439   : > { %9068 = vmatmul.mubr.msk.bf16.vlgmr.msra.gmra.mrb[16].mxu0 %vm999_vm3, %v10349_v3  ;;  %9076 = vmatmul.mubr.msk.bf16.vlgmr.msra.gmra.mrb[16].mxu1 %vm999_vm3, %v10349_v3 }
 0x43a   : > { %9080 = vmatpush3.bf16.msra.mxu0 %v9807_v10  ;;  %9088 = vmatpush3.bf16.msra.mxu1 %v9808_v11 }
 0x43b   : > { %9081 = vmatprep.subr.bf16.mxu0 %v10082_v1  ;;  %9089 = vmatprep.subr.bf16.mxu1 %v10082_v1 }
 0x43c   : > { %9083 = vmatprep.mubr.msk.bf16.mxu0 %vm10083_vm1, %v10082_v1  ;;  %9091 = vmatprep.mubr.msk.bf16.mxu1 %vm10083_vm1, %v10082_v1 }
 0x43e   : > { %9082 = vmatpush3.bf16.msra.mxu0 %v9809_v12  ;;  %9090 = vmatpush3.bf16.msra.mxu1 %v9810_v13 }
 0x43f   : > { %9095 = vmatprep.subr.bf16.mxu0 %v10082_v1  ;;  %9103 = vmatprep.subr.bf16.mxu1 %v10082_v1 }
 0x441   : > { %9084 = vmatmul.mubr.msk.bf16.vlgmr.msra.gmra.mrb[20].mxu0 %vm999_vm3, %v10349_v3  ;;  %9092 = vmatmul.mubr.msk.bf16.vlgmr.msra.gmra.mrb[20].mxu1 %vm999_vm3, %v10349_v3 }
 0x442   : > { %9096 = vmatpush3.bf16.msra.mxu0 %v9811_v14  ;;  %9104 = vmatpush3.bf16.msra.mxu1 %v9812_v15 }
 0x443   : > { %9097 = vmatprep.subr.bf16.mxu0 %v10082_v1  ;;  %9105 = vmatprep.subr.bf16.mxu1 %v10082_v1 }
 0x444   : > { %9099 = vmatprep.mubr.msk.bf16.mxu0 %vm10083_vm1, %v10082_v1  ;;  %9107 = vmatprep.mubr.msk.bf16.mxu1 %vm10083_vm1, %v10082_v1 }
 0x446   : > { %9098 = vmatpush3.bf16.msra.mxu0 %v9813_v16  ;;  %9106 = vmatpush3.bf16.msra.mxu1 %v9814_v17  ;;  %v8322_v16 = vld [vmem:[%s11331_s2] ss:$0 sm:$0xff] }
 0x447   : > { %9111 = vmatprep.subr.bf16.mxu0 %v10082_v1  ;;  %9119 = vmatprep.subr.bf16.mxu1 %v10082_v1 }
 0x449   : > { %9100 = vmatmul.mubr.msk.bf16.vlgmr.msra.gmra.mrb[24].mxu0 %vm999_vm3, %v10349_v3  ;;  %9108 = vmatmul.mubr.msk.bf16.vlgmr.msra.gmra.mrb[24].mxu1 %vm999_vm3, %v10349_v3 }
 0x44a   : > { %9112 = vmatpush3.bf16.msra.mxu0 %v9815_v18  ;;  %9120 = vmatpush3.bf16.msra.mxu1 %v9816_v19  ;;  %v8290_v19 = vld [vmem:[%s11332_s16] ss:$0 sm:$0xff] }
 0x44b   : > { %9113 = vmatprep.subr.bf16.mxu0 %v10082_v1  ;;  %9121 = vmatprep.subr.bf16.mxu1 %v10082_v1 }
 0x44c   : > { %9115 = vmatprep.mubr.msk.bf16.mxu0 %vm10083_vm1, %v10082_v1  ;;  %9123 = vmatprep.mubr.msk.bf16.mxu1 %vm10083_vm1, %v10082_v1 }
 0x44e   : > { %9114 = vmatpush3.bf16.msra.mxu0 %v9817_v20  ;;  %9122 = vmatpush3.bf16.msra.mxu1 %v9818_v21 }
 0x44f   : > { %9127 = vmatprep.subr.bf16.mxu0 %v10082_v1  ;;  %9135 = vmatprep.subr.bf16.mxu1 %v10082_v1 }
 0x451   : > { %9116 = vmatmul.mubr.msk.bf16.vlgmr.msra.gmra.mrb[28].mxu0 %vm999_vm3, %v10349_v3  ;;  %9124 = vmatmul.mubr.msk.bf16.vlgmr.msra.gmra.mrb[28].mxu1 %vm999_vm3, %v10349_v3 }
 0x452   : > { %9128 = vmatpush3.bf16.msra.mxu0 %v9819_v22  ;;  %9136 = vmatpush3.bf16.msra.mxu1 %v9820_v23  ;;  %v8323_v23 = vld [vmem:[%s11331_s2 + $0x1] ss:$0 sm:$0xff] }
 0x453   : > { %9129 = vmatprep.subr.bf16.mxu0 %v10082_v1  ;;  %9137 = vmatprep.subr.bf16.mxu1 %v10082_v1 }
 0x454   : > { %9131 = vmatprep.mubr.msk.bf16.mxu0 %vm10083_vm1, %v10082_v1  ;;  %9139 = vmatprep.mubr.msk.bf16.mxu1 %vm10083_vm1, %v10082_v1 }
 0x456   : > { %9130 = vmatpush3.bf16.msra.mxu0 %v9821_v24  ;;  %9138 = vmatpush3.bf16.msra.mxu1 %v9822_v25 }
 0x457   : > { %9143 = vmatprep.subr.bf16.mxu0 %v10082_v1  ;;  %9151 = vmatprep.subr.bf16.mxu1 %v10082_v1 }
 0x459   : > { %9132 = vmatmul.mubr.msk.bf16.vlgmr.msra.gmra.mrb[32].mxu0 %vm999_vm3, %v10349_v3  ;;  %9140 = vmatmul.mubr.msk.bf16.vlgmr.msra.gmra.mrb[32].mxu1 %vm999_vm3, %v10349_v3 }
 0x45a   : > { %9144 = vmatpush3.bf16.msra.mxu0 %v9823_v26  ;;  %9152 = vmatpush3.bf16.msra.mxu1 %v9824_v27 }
 0x45b   : > { %9145 = vmatprep.subr.bf16.mxu0 %v10082_v1  ;;  %9153 = vmatprep.subr.bf16.mxu1 %v10082_v1 }
 0x45c   : > { %9147 = vmatprep.mubr.msk.bf16.mxu0 %vm10083_vm1, %v10082_v1  ;;  %9155 = vmatprep.mubr.msk.bf16.mxu1 %vm10083_vm1, %v10082_v1 }
 0x45e   : > { %9146 = vmatpush3.bf16.msra.mxu0 %v9825_v28  ;;  %9154 = vmatpush3.bf16.msra.mxu1 %v9826_v29  ;;  %v8291_v29 = vld [vmem:[%s11332_s16 + $0x1] ss:$0 sm:$0xff] }
 0x45f   : > { %9159 = vmatprep.subr.bf16.mxu0 %v10082_v1  ;;  %9167 = vmatprep.subr.bf16.mxu1 %v10082_v1 }
 0x461   : > { %9148 = vmatmul.mubr.msk.bf16.vlgmr.msra.gmra.mrb[36].mxu0 %vm999_vm3, %v10349_v3  ;;  %9156 = vmatmul.mubr.msk.bf16.vlgmr.msra.gmra.mrb[36].mxu1 %vm999_vm3, %v10349_v3 }
 0x462   : > { %9160 = vmatpush3.bf16.msra.mxu0 %v9827_v30  ;;  %9168 = vmatpush3.bf16.msra.mxu1 %v9828_v31  ;;  %v8324_v31 = vld [vmem:[%s11331_s2 + $0x2] ss:$0 sm:$0xff] }
 0x463   : > { %9161 = vmatprep.subr.bf16.mxu0 %v10082_v1  ;;  %9169 = vmatprep.subr.bf16.mxu1 %v10082_v1 }
 0x464   : > { %9163 = vmatprep.mubr.msk.bf16.mxu0 %vm10083_vm1, %v10082_v1  ;;  %9171 = vmatprep.mubr.msk.bf16.mxu1 %vm10083_vm1, %v10082_v1 }
 0x466   : > { %9162 = vmatpush3.bf16.msra.mxu0 %v9829_v32  ;;  %9170 = vmatpush3.bf16.msra.mxu1 %v9830_v33  ;;  %v8325_v32 = vld [vmem:[%s11331_s2 + $0x3] ss:$0 sm:$0xff] }
 0x467   : > { %9175 = vmatprep.subr.bf16.mxu0 %v10082_v1  ;;  %9183 = vmatprep.subr.bf16.mxu1 %v10082_v1 }
 0x469   : > { %9164 = vmatmul.mubr.msk.bf16.vlgmr.msra.gmra.mrb[40].mxu0 %vm999_vm3, %v10349_v3  ;;  %9172 = vmatmul.mubr.msk.bf16.vlgmr.msra.gmra.mrb[40].mxu1 %vm999_vm3, %v10349_v3 }
 0x46a   : > { %9176 = vmatpush3.bf16.msra.mxu0 %v9831_v34  ;;  %9184 = vmatpush3.bf16.msra.mxu1 %v9832_v35 }
 0x46b   : > { %9177 = vmatprep.subr.bf16.mxu0 %v10082_v1  ;;  %9185 = vmatprep.subr.bf16.mxu1 %v10082_v1 }
 0x46c   : > { %9179 = vmatprep.mubr.msk.bf16.mxu0 %vm10083_vm1, %v10082_v1  ;;  %9187 = vmatprep.mubr.msk.bf16.mxu1 %vm10083_vm1, %v10082_v1 }
 0x46e   : > { %9178 = vmatpush3.bf16.msra.mxu0 %v9833_v36  ;;  %9186 = vmatpush3.bf16.msra.mxu1 %v9834_v37  ;;  %v8292_v36 = vld [vmem:[%s11332_s16 + $0x2] ss:$0 sm:$0xff]  ;;  %v8293_v37 = vld [vmem:[%s11332_s16 + $0x3] ss:$0 sm:$0xff] }
 0x46f   : > { %9191 = vmatprep.subr.bf16.mxu0 %v10082_v1  ;;  %9199 = vmatprep.subr.bf16.mxu1 %v10082_v1 }
 0x471   : > { %9180 = vmatmul.mubr.msk.bf16.vlgmr.msra.gmra.mrb[44].mxu0 %vm999_vm3, %v10349_v3  ;;  %9188 = vmatmul.mubr.msk.bf16.vlgmr.msra.gmra.mrb[44].mxu1 %vm999_vm3, %v10349_v3 }
 0x472   : > { %9192 = vmatpush3.bf16.msra.mxu0 %v9835_v39  ;;  %9200 = vmatpush3.bf16.msra.mxu1 %v9836_v40 }
 0x473   : > { %9193 = vmatprep.subr.bf16.mxu0 %v10082_v1  ;;  %9201 = vmatprep.subr.bf16.mxu1 %v10082_v1 }
 0x474   : > { %9195 = vmatprep.mubr.msk.bf16.mxu0 %vm10083_vm1, %v10082_v1  ;;  %9203 = vmatprep.mubr.msk.bf16.mxu1 %vm10083_vm1, %v10082_v1 }
 0x476   : > { %9194 = vmatpush3.bf16.msra.mxu0 %v9837_v41  ;;  %9202 = vmatpush3.bf16.msra.mxu1 %v9838_v42 }
 0x477   : > { %9207 = vmatprep.subr.bf16.mxu0 %v10082_v1  ;;  %9215 = vmatprep.subr.bf16.mxu1 %v10082_v1 }
 0x479   : > { %9196 = vmatmul.mubr.msk.bf16.vlgmr.msra.gmra.mrb[48].mxu0 %vm999_vm3, %v10349_v3  ;;  %9204 = vmatmul.mubr.msk.bf16.vlgmr.msra.gmra.mrb[48].mxu1 %vm999_vm3, %v10349_v3 }
 0x47a   : > { %9208 = vmatpush3.bf16.msra.mxu0 %v9839_v43  ;;  %9216 = vmatpush3.bf16.msra.mxu1 %v9840_v44 }
 0x47b   : > { %9209 = vmatprep.subr.bf16.mxu0 %v10082_v1  ;;  %9217 = vmatprep.subr.bf16.mxu1 %v10082_v1 }
 0x47c   : > { %9211 = vmatprep.mubr.msk.bf16.mxu0 %vm10083_vm1, %v10082_v1  ;;  %9219 = vmatprep.mubr.msk.bf16.mxu1 %vm10083_vm1, %v10082_v1 }
 0x47e   : > { %9210 = vmatpush3.bf16.msra.mxu0 %v9841_v45  ;;  %9218 = vmatpush3.bf16.msra.mxu1 %v9842_v46 }
 0x47f   : > { %9223 = vmatprep.subr.mxu0 %v10082_v1  ;;  %9233 = vmatprep.subr.mxu1 %v10082_v1 }
 0x481   : > { %9212 = vmatmul.mubr.msk.bf16.vlgmr.msra.gmra.mrb[52].mxu0 %vm999_vm3, %v10349_v3  ;;  %9220 = vmatmul.mubr.msk.bf16.vlgmr.msra.gmra.mrb[52].mxu1 %vm999_vm3, %v10349_v3 }
 0x482   : > { %9225 = vmatprep.mubr.msk.f32.mxu0 %vm10083_vm1, %v10082_v1  ;;  %9235 = vmatprep.mubr.msk.f32.mxu1 %vm10083_vm1, %v10082_v1 }
 0x4fc   : > { %v1348_v47 = vpop.f32.mrb[8].mxu0  ;;  %v1400_v48 = vpop.f32.mrb[8].mxu1 }
 0x4fd   : > { %v9037_v49 = vpop.f32.mrb[9].mxu0  ;;  %v9045_v50 = vpop.f32.mrb[9].mxu1  ;;  %v1349_v28 = vadd.f32 %v8290_v19, %v1348_v47  ;;  %v1401_v33 = vadd.f32 %v8291_v29, %v1400_v48 }
 0x4fe   : > { %v1351_v51 = vpop.f32.mrb[10].mxu0  ;;  %v1403_v52 = vpop.f32.mrb[10].mxu1  ;;  %v8326_v49 = vld [vmem:[%s11331_s2 + $0x4] ss:$0 sm:$0xff]  ;;  %v8327_v50 = vld [vmem:[%s11331_s2 + $0x5] ss:$0 sm:$0xff] }
 0x4ff   : > { %v9038_v53 = vpop.f32.mrb[11].mxu0  ;;  %v9046_v54 = vpop.f32.mrb[11].mxu1 }
 0x500   : > { %v8294_v53 = vld [vmem:[%s11332_s16 + $0x4] ss:$0 sm:$0xff]  ;;  %v8295_v54 = vld [vmem:[%s11332_s16 + $0x5] ss:$0 sm:$0xff] }
 0x504   : > { %v10533_v55 = vpop.f32.mrb[12].mxu0  ;;  %v10535_v56 = vpop.f32.mrb[12].mxu1 }
 0x505   : > { %v9053_v57 = vpop.f32.mrb[13].mxu0  ;;  %v9061_v58 = vpop.f32.mrb[13].mxu1  ;;  %v1453_v47 = vadd.f32 %v8292_v36, %v10533_v55  ;;  %v1505_v48 = vadd.f32 %v8293_v37, %v10535_v56 }
 0x506   : > { %v1455_v59 = vpop.f32.mrb[14].mxu0  ;;  %v1507_v60 = vpop.f32.mrb[14].mxu1 }
 0x507   : > { %v9054_v61 = vpop.f32.mrb[15].mxu0  ;;  %v9062_v62 = vpop.f32.mrb[15].mxu1 }
 0x50c   : > { %v10537_v63 = vpop.f32.mrb[16].mxu0  ;;  %v10539_v0 = vpop.f32.mrb[16].mxu1 }
 0x50d   : > { %v9069_v2 = vpop.f32.mrb[17].mxu0  ;;  %v9077_v3 = vpop.f32.mrb[17].mxu1 }
 0x50e   : > { %v1559_v4 = vpop.f32.mrb[18].mxu0  ;;  %v1611_v5 = vpop.f32.mrb[18].mxu1  ;;  %v1557_v2 = vadd.f32 %v8294_v53, %v10537_v63  ;;  %v1609_v3 = vadd.f32 %v8295_v54, %v10539_v0  ;;  %v8297_v0 = vld [vmem:[%s11332_s16 + $0x7] ss:$0 sm:$0xff] }
 0x50f   : > { %v9070_v6 = vpop.f32.mrb[19].mxu0  ;;  %v9078_v7 = vpop.f32.mrb[19].mxu1  ;;  %v8328_v4 = vld [vmem:[%s11331_s2 + $0x6] ss:$0 sm:$0xff]  ;;  %v8329_v5 = vld [vmem:[%s11331_s2 + $0x7] ss:$0 sm:$0xff] }
 0x510   : > { %v8296_v7 = vld [vmem:[%s11332_s16 + $0x6] ss:$0 sm:$0xff] }
 0x514   : > { %v10541_v8 = vpop.f32.mrb[20].mxu0  ;;  %v10543_v9 = vpop.f32.mrb[20].mxu1 }
 0x515   : > { %v9085_v10 = vpop.f32.mrb[21].mxu0  ;;  %v9093_v11 = vpop.f32.mrb[21].mxu1  ;;  %v1713_v19 = vadd.f32 %v8297_v0, %v10543_v9 }
 0x516   : > { %v1663_v12 = vpop.f32.mrb[22].mxu0  ;;  %v1715_v13 = vpop.f32.mrb[22].mxu1 }
 0x517   : > { %v9086_v14 = vpop.f32.mrb[23].mxu0  ;;  %v9094_v15 = vpop.f32.mrb[23].mxu1 }
 0x51c   : > { %v1852_v17 = vpop.f32.mrb[24].mxu0  ;;  %v1904_v18 = vpop.f32.mrb[24].mxu1 }
 0x51d   : > { %v1853_v20 = vadd.f32 %v8322_v16, %v1852_v17  ;;  %v9101_v21 = vpop.f32.mrb[25].mxu0  ;;  %v9109_v22 = vpop.f32.mrb[25].mxu1  ;;  %v1905_v30 = vadd.f32 %v8323_v23, %v1904_v18  ;;  %v1661_v18 = vadd.f32 %v8296_v7, %v10541_v8 }
 0x51e   : > { %v1855_v24 = vpop.f32.mrb[26].mxu0  ;;  %v1907_v25 = vpop.f32.mrb[26].mxu1  ;;  %v8355_v21 = vld [vmem:[%s11333_s22 + $0x1] ss:$0 sm:$0xff] }
 0x51f   : > { %v9102_v26 = vpop.f32.mrb[27].mxu0  ;;  %v9110_v27 = vpop.f32.mrb[27].mxu1  ;;  %9224 = vmatpush3.xpose.msk.msra.mxu0 %vm926_vm2, %v1853_v20  ;;  %v8354_v20 = vld [vmem:[%s11333_s22] ss:$0 sm:$0xff] }
 0x520   : > { %9228 = vmatprep.subr.mxu0 %v10082_v1 }
 0x522   : > { %9226 = vmatmul.mubr.msk.f32.vlgmr.msra.gmra.mrb[56].mxu0 %vm926_vm2, %v1349_v28 }
 0x523   : > { %9229 = vmatpush3.xpose.msk.msra.mxu0 %vm926_vm2, %v1905_v30  ;;  %9230 = vmatprep.mubr.msk.f32.mxu0 %vm10083_vm1, %v10082_v1 }
 0x524   : > { %v1956_v34 = vpop.f32.mrb[28].mxu0  ;;  %v2008_v35 = vpop.f32.mrb[28].mxu1  ;;  %9238 = vmatprep.subr.mxu0 %v10082_v1 }
 0x525   : > { %v1957_v39 = vadd.f32 %v8324_v31, %v1956_v34  ;;  %v2009_v40 = vadd.f32 %v8325_v32, %v2008_v35  ;;  %v9117_v41 = vpop.f32.mrb[29].mxu0  ;;  %v9125_v42 = vpop.f32.mrb[29].mxu1 }
 0x526   : > { %v1959_v43 = vpop.f32.mrb[30].mxu0  ;;  %v2011_v44 = vpop.f32.mrb[30].mxu1  ;;  %9231 = vmatmul.mubr.msk.f32.vlgmr.msra.gmra.mrb[58].mxu0 %vm926_vm2, %v1401_v33 }
 0x527   : > { %v9118_v45 = vpop.f32.mrb[31].mxu0  ;;  %v9126_v46 = vpop.f32.mrb[31].mxu1  ;;  %9234 = vmatpush3.xpose.msk.msra.mxu1 %vm926_vm2, %v1957_v39  ;;  %9239 = vmatpush3.xpose.msk.msra.mxu0 %vm926_vm2, %v2009_v40 }
 0x528   : > { %9240 = vmatprep.mubr.msk.f32.mxu0 %vm10083_vm1, %v10082_v1  ;;  %9243 = vmatprep.subr.mxu1 %v10082_v1 }
 0x529   : > { %9248 = vmatprep.subr.mxu0 %v10082_v1 }
 0x52a   : > { %9236 = vmatmul.mubr.msk.f32.vlgmr.msra.gmra.mrb[56].mxu1 %vm926_vm2, %v1453_v47  ;;  %9241 = vmatmul.mubr.msk.f32.vlgmr.msra.gmra.mrb[60].mxu0 %vm926_vm2, %v1505_v48 }
 0x52b   : > { %9245 = vmatprep.mubr.msk.f32.mxu1 %vm10083_vm1, %v10082_v1  ;;  %9250 = vmatprep.mubr.msk.f32.mxu0 %vm10083_vm1, %v10082_v1 }
 0x52c   : > { %v2060_v51 = vpop.f32.mrb[32].mxu0  ;;  %v2112_v52 = vpop.f32.mrb[32].mxu1 }
 0x52d   : > { %v2061_v55 = vadd.f32 %v8326_v49, %v2060_v51  ;;  %v2113_v56 = vadd.f32 %v8327_v50, %v2112_v52  ;;  %v9133_v57 = vpop.f32.mrb[33].mxu0  ;;  %v9141_v58 = vpop.f32.mrb[33].mxu1 }
 0x52e   : > { %v2063_v59 = vpop.f32.mrb[34].mxu0  ;;  %v2115_v60 = vpop.f32.mrb[34].mxu1 }
 0x52f   : > { %v9134_v61 = vpop.f32.mrb[35].mxu0  ;;  %v9142_v62 = vpop.f32.mrb[35].mxu1  ;;  %9244 = vmatpush3.xpose.msk.msra.mxu1 %vm926_vm2, %v2061_v55  ;;  %9249 = vmatpush3.xpose.msk.msra.mxu0 %vm926_vm2, %v2113_v56 }
 0x530   : > { %9253 = vmatprep.subr.mxu1 %v10082_v1  ;;  %9258 = vmatprep.subr.mxu0 %v10082_v1 }
 0x532   : > { %9246 = vmatmul.mubr.msk.f32.vlgmr.msra.gmra.mrb[58].mxu1 %vm926_vm2, %v1557_v2  ;;  %9251 = vmatmul.mubr.msk.f32.vlgmr.msra.gmra.mrb[62].mxu0 %vm926_vm2, %v1609_v3 }
 0x533   : > { %9255 = vmatprep.mubr.msk.f32.mxu1 %vm10083_vm1, %v10082_v1  ;;  %9260 = vmatprep.mubr.msk.f32.mxu0 %vm10083_vm1, %v10082_v1 }
 0x534   : > { %v2164_v6 = vpop.f32.mrb[36].mxu0  ;;  %v2216_v63 = vpop.f32.mrb[36].mxu1 }
 0x535   : > { %v2165_v10 = vadd.f32 %v8328_v4, %v2164_v6  ;;  %v2217_v11 = vadd.f32 %v8329_v5, %v2216_v63  ;;  %v9149_v12 = vpop.f32.mrb[37].mxu0  ;;  %v9157_v13 = vpop.f32.mrb[37].mxu1 }
 0x536   : > { %v2167_v14 = vpop.f32.mrb[38].mxu0  ;;  %v2219_v15 = vpop.f32.mrb[38].mxu1 }
 0x537   : > { %v9150_v16 = vpop.f32.mrb[39].mxu0  ;;  %v9158_v17 = vpop.f32.mrb[39].mxu1  ;;  %9254 = vmatpush3.xpose.msk.msra.mxu1 %vm926_vm2, %v2165_v10  ;;  %9259 = vmatpush3.xpose.msk.msra.mxu0 %vm926_vm2, %v2217_v11 }
 0x538   : > { %9263 = vmatprep.subr.mxu1 %v10082_v1  ;;  %9268 = vmatprep.subr.mxu0 %v10082_v1 }
 0x53a   : > { %9256 = vmatmul.mubr.msk.f32.vlgmr.msra.gmra.mrb[60].mxu1 %vm926_vm2, %v1661_v18  ;;  %9261 = vmatmul.mubr.msk.f32.vlgmr.msra.gmra.mrb[64].mxu0 %vm926_vm2, %v1713_v19 }
 0x53b   : > { %9265 = vmatprep.mubr.msk.f32.mxu1 %vm10083_vm1, %v10082_v1  ;;  %9270 = vmatprep.mubr.msk.f32.mxu0 %vm10083_vm1, %v10082_v1 }
 0x53c   : > { %v2356_v22 = vpop.f32.mrb[40].mxu0  ;;  %v2408_v8 = vpop.f32.mrb[40].mxu1 }
 0x53d   : > { %v2357_v23 = vadd.f32 %v8354_v20, %v2356_v22  ;;  %v2409_v9 = vadd.f32 %v8355_v21, %v2408_v8  ;;  %v9165_v24 = vpop.f32.mrb[41].mxu0  ;;  %v9173_v25 = vpop.f32.mrb[41].mxu1 }
 0x53e   : > { %v2359_v26 = vpop.f32.mrb[42].mxu0  ;;  %v2411_v27 = vpop.f32.mrb[42].mxu1 }
 0x53f   : > { %v9166_v28 = vpop.f32.mrb[43].mxu0  ;;  %v9174_v29 = vpop.f32.mrb[43].mxu1  ;;  %9264 = vmatpush3.msra.mxu1 %v2357_v23  ;;  %9269 = vmatpush3.msra.mxu0 %v2409_v9 }
 0x540   : > { %9273 = vmatprep.subr.mxu1 %v10082_v1  ;;  %9278 = vmatprep.subr.mxu0 %v10082_v1 }
 0x544   : > { %v10611_v30 = vpop.f32.mrb[44].mxu0  ;;  %v10613_v31 = vpop.f32.mrb[44].mxu1 }
 0x545   : > { %v9181_v32 = vpop.f32.mrb[45].mxu0  ;;  %v9189_v33 = vpop.f32.mrb[45].mxu1 }
 0x546   : > { %v2463_v34 = vpop.f32.mrb[46].mxu0  ;;  %v2515_v35 = vpop.f32.mrb[46].mxu1 }
 0x547   : > { %v9182_v36 = vpop.f32.mrb[47].mxu0  ;;  %v9190_v37 = vpop.f32.mrb[47].mxu1 }
 0x54c   : > { %v10615_v39 = vpop.f32.mrb[48].mxu0  ;;  %v10617_v40 = vpop.f32.mrb[48].mxu1 }
 0x54d   : > { %v9197_v41 = vpop.f32.mrb[49].mxu0  ;;  %v9205_v42 = vpop.f32.mrb[49].mxu1 }
 0x54e   : > { %v2567_v43 = vpop.f32.mrb[50].mxu0  ;;  %v2619_v44 = vpop.f32.mrb[50].mxu1 }
 0x54f   : > { %v9198_v45 = vpop.f32.mrb[51].mxu0  ;;  %v9206_v46 = vpop.f32.mrb[51].mxu1 }
 0x554   : > { %v10619_v47 = vpop.f32.mrb[52].mxu0  ;;  %v10621_v48 = vpop.f32.mrb[52].mxu1 }
 0x555   : > { %v9213_v49 = vpop.f32.mrb[53].mxu0  ;;  %v9221_v50 = vpop.f32.mrb[53].mxu1 }
 0x556   : > { %v2671_v51 = vpop.f32.mrb[54].mxu0  ;;  %v2723_v52 = vpop.f32.mrb[54].mxu1 }
 0x557   : > { %v9214_v53 = vpop.f32.mrb[55].mxu0  ;;  %v9222_v54 = vpop.f32.mrb[55].mxu1 }
 0x5f5   : > { %v2798_v55 = vpop.f32.mrb[56].mxu0 }
 0x5f6   : > { %v9227_v56 = vpop.f32.mrb[57].mxu0  ;;  %v3335_v57 = vsel %vm3334_vm6, %v2798_v55, -inf }
 0x5f7   : > { %3336 = vmax.xlane.f32.xlu1 %v3335_v57 }
 0x5f9   : > { %v2874_v58 = vpop.f32.mrb[58].mxu0 }
 0x5fa   : > { %v9232_v59 = vpop.f32.mrb[59].mxu0  ;;  %v3338_v60 = vsel %vm3334_vm6, %v2874_v58, -inf }
 0x5fb   : > { %3339 = vmax.xlane.f32.xlu1 %v3338_v60 }
 0x5fd   : > { %v2950_v61 = vpop.f32.mrb[56].mxu1  ;;  %v3026_v62 = vpop.f32.mrb[60].mxu0 }
 0x5fe   : > { %v9237_v2 = vpop.f32.mrb[57].mxu1  ;;  %v9242_v3 = vpop.f32.mrb[61].mxu0  ;;  %v3341_v4 = vsel %vm3334_vm6, %v2950_v61, -inf  ;;  %v3344_v5 = vsel %vm3334_vm6, %v3026_v62, -inf }
 0x5ff   : > { %3342 = vmax.xlane.f32.xlu0 %v3341_v4  ;;  %3345 = vmax.xlane.f32.xlu1 %v3344_v5 }
 0x605   : > { %v3102_v6 = vpop.f32.mrb[58].mxu1  ;;  %v3178_v63 = vpop.f32.mrb[62].mxu0 }
 0x606   : > { %v9247_v7 = vpop.f32.mrb[59].mxu1  ;;  %v9252_v0 = vpop.f32.mrb[63].mxu0  ;;  %v3347_v10 = vsel %vm3334_vm6, %v3102_v6, -inf  ;;  %v3350_v11 = vsel %vm3334_vm6, %v3178_v63, -inf }
 0x607   : > { %3348 = vmax.xlane.f32.xlu0 %v3347_v10  ;;  %3351 = vmax.xlane.f32.xlu1 %v3350_v11  ;;  %v8357_v10 = vld [vmem:[%s11333_s22 + $0x3] ss:$0 sm:$0xff] }
 0x60d   : > { %v3254_v12 = vpop.f32.mrb[60].mxu1  ;;  %v3330_v13 = vpop.f32.mrb[64].mxu0 }
 0x60e   : > { %v9257_v14 = vpop.f32.mrb[61].mxu1  ;;  %v9262_v15 = vpop.f32.mrb[65].mxu0  ;;  %v3353_v16 = vsel %vm3334_vm6, %v3254_v12, -inf  ;;  %v3356_v17 = vsel %vm3334_vm6, %v3330_v13, -inf }
 0x60f   : > { %3354 = vmax.xlane.f32.xlu0 %v3353_v16  ;;  %3357 = vmax.xlane.f32.xlu1 %v3356_v17  ;;  %v2513_v14 = vadd.f32 %v8357_v10, %v10613_v31  ;;  %v8358_v16 = vld [vmem:[%s11333_s22 + $0x4] ss:$0 sm:$0xff]  ;;  %v8359_v17 = vld [vmem:[%s11333_s22 + $0x5] ss:$0 sm:$0xff] }
 0x684   : > { %v3337_v18 = vpop.xlane.xlu1 %3336 }
 0x685   : > { %v3359_v19 = vsub.f32 %v2798_v55, %v3337_v18 }
 0x687   : > { %v3367_v20 = vmul.f32 1.442695, %v3359_v19 }
 0x688   : > { %v3340_v21 = vpop.xlane.xlu1 %3339 }
 0x689   : > { %9909 = vpow2.f32 %v3367_v20  ;;  %v3360_v22 = vsub.f32 %v2874_v58, %v3340_v21  ;;  %v2565_v20 = vadd.f32 %v8358_v16, %v10615_v39  ;;  %v2617_v21 = vadd.f32 %v8359_v17, %v10617_v40  ;;  %v8360_v39 = vld [vmem:[%s11333_s22 + $0x6] ss:$0 sm:$0xff] }
 0x68b   : > { %v3369_v8 = vmul.f32 1.442695, %v3360_v22 }
 0x68c   : > { %v3343_v23 = vpop.xlane.xlu0 %3342  ;;  %v3346_v9 = vpop.xlane.xlu1 %3345 }
 0x68d   : > { %9911 = vpow2.f32 %v3369_v8  ;;  %v3361_v24 = vsub.f32 %v2950_v61, %v3343_v23  ;;  %v3362_v25 = vsub.f32 %v3026_v62, %v3346_v9  ;;  %v8361_v23 = vld [vmem:[%s11333_s22 + $0x7] ss:$0 sm:$0xff] }
 0x68f   : > { %v3371_v26 = vmul.f32 1.442695, %v3361_v24  ;;  %v3373_v27 = vmul.f32 1.442695, %v3362_v25  ;;  %v2669_v25 = vadd.f32 %v8360_v39, %v10619_v47 }
 0x691   : > { %9913 = vpow2.f32 %v3371_v26 }
 0x692   : > { %9915 = vpow2.f32 %v3373_v27  ;;  %v2721_v27 = vadd.f32 %v8361_v23, %v10621_v48 }
 0x693   : > { %v9910_v28 = vpop.eup %9909 }
 0x694   : > { %v3349_v29 = vpop.xlane.xlu0 %3348  ;;  %v3352_v32 = vpop.xlane.xlu1 %3351  ;;  %v3383_v33 = vsel %vm3334_vm6, %v9910_v28, 0.0 }
 0x695   : > { %v3363_v34 = vsub.f32 %v3102_v6, %v3349_v29  ;;  %v3364_v35 = vsub.f32 %v3178_v63, %v3352_v32  ;;  %3384 = vadd.xlane.f32.xlu0 %v3383_v33  ;;  %v8356_v6 = vld [vmem:[%s11333_s22 + $0x2] ss:$0 sm:$0xff]  ;;  %v4015_v32 = vld [vmem:[%s11334_s23] sm:$0x3] }
 0x696   : > { %v2461_v0 = vadd.f32 %v8356_v6, %v10611_v30  ;;  %v4027_v33 = vsel %vm930_vm0, %v4015_v32, 0 }
 0x697   : > { %v9912_v36 = vpop.eup %9911  ;;  %v3375_v37 = vmul.f32 1.442695, %v3363_v34  ;;  %v3377_v41 = vmul.f32 1.442695, %v3364_v35  ;;  %v4016_v34 = vld [vmem:[%s11334_s23 + $0x2] sm:$0x3] }
 0x698   : > { %v3386_v42 = vsel %vm3334_vm6, %v9912_v36, 0.0  ;;  %v4073_v35 = vsel %vm930_vm0, %v4016_v34, 0 }
 0x699   : > { %9917 = vpow2.f32 %v3375_v37  ;;  %3387 = vadd.xlane.f32.xlu1 %v3386_v42 }
 0x69a   : > { %9919 = vpow2.f32 %v3377_v41 }
 0x69b   : > { %v9914_v43 = vpop.eup %9913 }
 0x69c   : > { %v9916_v44 = vpop.eup %9915  ;;  %v3355_v45 = vpop.xlane.xlu0 %3354  ;;  %v3389_v49 = vsel %vm3334_vm6, %v9914_v43, 0.0 }
 0x69d   : > { %v3358_v46 = vpop.xlane.xlu1 %3357  ;;  %v3365_v50 = vsub.f32 %v3254_v12, %v3355_v45  ;;  %3390 = vadd.xlane.f32.xlu0 %v3389_v49  ;;  %v3392_v52 = vsel %vm3334_vm6, %v9916_v44, 0.0 }
 0x69e   : > { %v3366_v51 = vsub.f32 %v3330_v13, %v3358_v46  ;;  %3393 = vadd.xlane.f32.xlu1 %v3392_v52 }
 0x69f   : > { %v3379_v53 = vmul.f32 1.442695, %v3365_v50 }
 0x6a0   : > { %v3381_v54 = vmul.f32 1.442695, %v3366_v51  ;;  %v4019_v51 = vld [vmem:[%s11334_s23 + $0x8] sm:$0x3] }
 0x6a1   : > { %9921 = vpow2.f32 %v3379_v53 }
 0x6a2   : > { %9923 = vpow2.f32 %v3381_v54 }
 0x6a3   : > { %v10635_v55 = vpop.eup %9917 }
 0x6a4   : > { %v10637_v56 = vpop.eup %9919  ;;  %v3395_v57 = vsel %vm3334_vm6, %v10635_v55, 0.0 }
 0x6a5   : > { %3396 = vadd.xlane.f32.xlu0 %v3395_v57  ;;  %v3398_v58 = vsel %vm3334_vm6, %v10637_v56, 0.0 }
 0x6a6   : > { %3399 = vadd.xlane.f32.xlu1 %v3398_v58  ;;  %v4020_v58 = vld [vmem:[%s11334_s23 + $0xa] sm:$0x3] }
 0x6ab   : > { %v10643_v59 = vpop.eup %9921 }
 0x6ac   : > { %v10645_v60 = vpop.eup %9923  ;;  %v3401_v61 = vsel %vm3334_vm6, %v10643_v59, 0.0 }
 0x6ad   : > { %3402 = vadd.xlane.f32.xlu0 %v3401_v61  ;;  %v3404_v62 = vsel %vm3334_vm6, %v10645_v60, 0.0  ;;  %v4021_v61 = vld [vmem:[%s11334_s23 + $0xc] sm:$0x3] }
 0x6ae   : > { %3405 = vadd.xlane.f32.xlu1 %v3404_v62 }
 0x722   : > { %v3385_v2 = vpop.xlane.xlu0 %3384 }
 0x723   : > { %9925 = vrcp.f32 %v3385_v2 }
 0x726   : > { %v3388_v3 = vpop.xlane.xlu1 %3387 }
 0x727   : > { %9927 = vrcp.f32 %v3388_v3 }
 0x72a   : > { %v3391_v4 = vpop.xlane.xlu0 %3390 }
 0x72b   : > { %9929 = vrcp.f32 %v3391_v4  ;;  %v3394_v5 = vpop.xlane.xlu1 %3393 }
 0x72c   : > { %9931 = vrcp.f32 %v3394_v5  ;;  %v4303_v5 = vsel %vm930_vm0, %v4021_v61, 0 }
 0x72d   : > { %v9926_v63 = vpop.eup %9925 }
 0x72e   : > { %v3415_v7 = vmul.f32 %v9926_v63, %v9910_v28  ;;  %v4022_v63 = vld [vmem:[%s11334_s23 + $0xe] sm:$0x3] }
 0x730   : > { %9266 = vmatmul.mubr.msk.f32.vlgmr.msra.gmra.mrb[62].mxu1 %vm3334_vm6, %v3415_v7 }
 0x731   : > { %v9928_v11 = vpop.eup %9927  ;;  %9274 = vmatpush3.msra.mxu1 %v2461_v0  ;;  %9275 = vmatprep.mubr.msk.f32.mxu1 %vm10083_vm1, %v10082_v1  ;;  %v4349_v0 = vsel %vm930_vm0, %v4022_v63, 0 }
 0x732   : > { %v3416_v12 = vmul.f32 %v9928_v11, %v9912_v36  ;;  %v3397_v13 = vpop.xlane.xlu0 %3396  ;;  %9283 = vmatprep.subr.mxu1 %v10082_v1  ;;  %v4017_v36 = vld [vmem:[%s11334_s23 + $0x4] sm:$0x3] }
 0x733   : > { %9933 = vrcp.f32 %v3397_v13  ;;  %v3400_v15 = vpop.xlane.xlu1 %3399 }
 0x734   : > { %9935 = vrcp.f32 %v3400_v15  ;;  %9271 = vmatmul.mubr.msk.f32.vlgmr.msra.gmra.mrb[66].mxu0 %vm3334_vm6, %v3416_v12 }
 0x735   : > { %v9930_v30 = vpop.eup %9929  ;;  %9279 = vmatpush3.msra.mxu0 %v2513_v14  ;;  %9280 = vmatprep.mubr.msk.f32.mxu0 %vm10083_vm1, %v10082_v1 }
 0x736   : > { %v9932_v18 = vpop.eup %9931  ;;  %v3417_v19 = vmul.f32 %v9930_v30, %v9914_v43  ;;  %9288 = vmatprep.subr.mxu0 %v10082_v1  ;;  %v4119_v43 = vsel %vm930_vm0, %v4017_v36, 0 }
 0x737   : > { %v3418_v31 = vmul.f32 %v9932_v18, %v9916_v44  ;;  %v4018_v44 = vld [vmem:[%s11334_s23 + $0x6] sm:$0x3] }
 0x738   : > { %9276 = vmatmul.mubr.msk.f32.vlgmr.msra.gmra.mrb[64].mxu1 %vm3334_vm6, %v3417_v19  ;;  %v4165_v50 = vsel %vm930_vm0, %v4018_v44, 0 }
 0x739   : > { %9281 = vmatmul.mubr.msk.f32.vlgmr.msra.gmra.mrb[68].mxu0 %vm3334_vm6, %v3418_v31  ;;  %9284 = vmatpush3.msra.mxu1 %v2565_v20 }
 0x73a   : > { %9289 = vmatpush3.msra.mxu0 %v2617_v21  ;;  %v3403_v22 = vpop.xlane.xlu0 %3402  ;;  %9285 = vmatprep.mubr.msk.f32.mxu1 %vm10083_vm1, %v10082_v1 }
 0x73b   : > { %9937 = vrcp.f32 %v3403_v22  ;;  %v3406_v8 = vpop.xlane.xlu1 %3405  ;;  %9290 = vmatprep.mubr.msk.f32.mxu0 %vm10083_vm1, %v10082_v1  ;;  %9293 = vmatprep.subr.mxu1 %v10082_v1 }
 0x73c   : > { %9939 = vrcp.f32 %v3406_v8  ;;  %9298 = vmatprep.subr.mxu0 %v10082_v1 }
 0x73d   : > { %v9934_v40 = vpop.eup %9933 }
 0x73e   : > { %v9936_v9 = vpop.eup %9935  ;;  %v3419_v24 = vmul.f32 %v9934_v40, %v10635_v55 }
 0x73f   : > { %v3420_v26 = vmul.f32 %v9936_v9, %v10637_v56  ;;  %v4211_v56 = vsel %vm930_vm0, %v4019_v51, 0 }
 0x740   : > { %9286 = vmatmul.mubr.msk.f32.vlgmr.msra.gmra.mrb[66].mxu1 %vm3334_vm6, %v3419_v24 }
 0x741   : > { %9291 = vmatmul.mubr.msk.f32.vlgmr.msra.gmra.mrb[70].mxu0 %vm3334_vm6, %v3420_v26  ;;  %9294 = vmatpush3.msra.mxu1 %v2669_v25 }
 0x742   : > { %9299 = vmatpush3.msra.mxu0 %v2721_v27  ;;  %9295 = vmatprep.mubr.msk.f32.mxu1 %vm10083_vm1, %v10082_v1 }
 0x743   : > { %9300 = vmatprep.mubr.msk.f32.mxu0 %vm10083_vm1, %v10082_v1  ;;  %9303 = vmatprep.subr.bf16.mxu1 %v10082_v1 }
 0x744   : > { %9309 = vmatprep.subr.bf16.mxu0 %v10082_v1 }
 0x745   : > { %v9938_v47 = vpop.eup %9937 }
 0x746   : > { %v9940_v48 = vpop.eup %9939  ;;  %v3421_v28 = vmul.f32 %v9938_v47, %v10643_v59 }
 0x747   : > { %v3422_v29 = vmul.f32 %v9940_v48, %v10645_v60  ;;  %v4257_v60 = vsel %vm930_vm0, %v4020_v58, 0 }
 0x748   : > { %9296 = vmatmul.mubr.msk.f32.vlgmr.msra.gmra.mrb[68].mxu1 %vm3334_vm6, %v3421_v28 }
 0x749   : > { %9301 = vmatmul.mubr.msk.f32.vlgmr.msra.gmra.mrb[72].mxu0 %vm3334_vm6, %v3422_v29  ;;  %9305 = vmatprep.mubr.msk.bf16.mxu1 %vm10083_vm1, %v10082_v1 }
 0x74a   : > { %9311 = vmatprep.mubr.msk.bf16.mxu0 %vm10083_vm1, %v10082_v1  ;;  %9304 = vmatpush3.bf16.msra.mxu1 %v4027_v33 }
 0x74b   : > { %9315 = vmatprep.subr.bf16.mxu1 %v10082_v1  ;;  %9310 = vmatpush3.bf16.msra.mxu0 %v4073_v35 }
 0x74c   : > { %9321 = vmatprep.subr.bf16.mxu0 %v10082_v1 }
 0x803   : > { %v3492_v37 = vpop.f32.mrb[62].mxu1 }
 0x804   : > { %v4007_v41 = vpack.c.bf16 %v3492_v37, %v3492_v37  ;;  %v9267_v42 = vpop.f32.mrb[63].mxu1 }
 0x806   : > { %9306 = vmatmul.mubr.msk.bf16.vlgmr.msra.gmra.mrb[72].mxu1 %vm926_vm2, %v4007_v41 }
 0x807   : > { %v3565_v45 = vpop.f32.mrb[66].mxu0  ;;  %9316 = vmatpush3.bf16.msra.mxu1 %v4119_v43  ;;  %9317 = vmatprep.mubr.msk.bf16.mxu1 %vm10083_vm1, %v10082_v1 }
 0x808   : > { %v4008_v46 = vpack.c.bf16 %v3565_v45, %v3565_v45  ;;  %v9272_v49 = vpop.f32.mrb[67].mxu0  ;;  %9327 = vmatprep.subr.bf16.mxu1 %v10082_v1 }
 0x80a   : > { %9312 = vmatmul.mubr.msk.bf16.vlgmr.msra.gmra.mrb[76].mxu0 %vm926_vm2, %v4008_v46 }
 0x80b   : > { %v3638_v52 = vpop.f32.mrb[64].mxu1  ;;  %9322 = vmatpush3.bf16.msra.mxu0 %v4165_v50  ;;  %9323 = vmatprep.mubr.msk.bf16.mxu0 %vm10083_vm1, %v10082_v1 }
 0x80c   : > { %v4009_v53 = vpack.c.bf16 %v3638_v52, %v3638_v52  ;;  %v3711_v54 = vpop.f32.mrb[68].mxu0  ;;  %v9277_v55 = vpop.f32.mrb[65].mxu1  ;;  %9333 = vmatprep.subr.bf16.mxu0 %v10082_v1 }
 0x80d   : > { %v9282_v57 = vpop.f32.mrb[69].mxu0  ;;  %v4010_v59 = vpack.c.bf16 %v3711_v54, %v3711_v54 }
 0x80e   : > { %9318 = vmatmul.mubr.msk.bf16.vlgmr.msra.gmra.mrb[76].mxu1 %vm926_vm2, %v4009_v53 }
 0x80f   : > { %9328 = vmatpush3.bf16.msra.mxu1 %v4211_v56  ;;  %9329 = vmatprep.mubr.msk.bf16.mxu1 %vm10083_vm1, %v10082_v1 }
 0x810   : > { %9339 = vmatprep.subr.bf16.mxu1 %v10082_v1 }
 0x812   : > { %9324 = vmatmul.mubr.msk.bf16.vlgmr.msra.gmra.mrb[80].mxu0 %vm926_vm2, %v4010_v59 }
 0x813   : > { %v3784_v62 = vpop.f32.mrb[66].mxu1  ;;  %9334 = vmatpush3.bf16.msra.mxu0 %v4257_v60  ;;  %9335 = vmatprep.mubr.msk.bf16.mxu0 %vm10083_vm1, %v10082_v1 }
 0x814   : > { %v4011_v2 = vpack.c.bf16 %v3784_v62, %v3784_v62  ;;  %v3857_v3 = vpop.f32.mrb[70].mxu0  ;;  %v9287_v4 = vpop.f32.mrb[67].mxu1  ;;  %9345 = vmatprep.subr.bf16.mxu0 %v10082_v1  ;;  %v8418_v62 = vld [vmem:[%s11335_s3] ss:$0 sm:$0xff] }
 0x815   : > { %v9292_v6 = vpop.f32.mrb[71].mxu0  ;;  %v4012_v7 = vpack.c.bf16 %v3857_v3, %v3857_v3 }
 0x816   : > { %9330 = vmatmul.mubr.msk.bf16.vlgmr.msra.gmra.mrb[80].mxu1 %vm926_vm2, %v4011_v2 }
 0x817   : > { %9340 = vmatpush3.bf16.msra.mxu1 %v4303_v5  ;;  %9341 = vmatprep.mubr.msk.bf16.mxu1 %vm10083_vm1, %v10082_v1 }
 0x818   : > { %9351 = vmatprep.subr.bf16.mxu1 %v10082_v1 }
 0x81a   : > { %9336 = vmatmul.mubr.msk.bf16.vlgmr.msra.gmra.mrb[84].mxu0 %vm926_vm2, %v4012_v7 }
 0x81b   : > { %v3930_v10 = vpop.f32.mrb[68].mxu1  ;;  %9346 = vmatpush3.bf16.msra.mxu0 %v4349_v0  ;;  %9347 = vmatprep.mubr.msk.bf16.mxu0 %vm10083_vm1, %v10082_v1 }
 0x81c   : > { %v4013_v11 = vpack.c.bf16 %v3930_v10, %v3930_v10  ;;  %v4003_v12 = vpop.f32.mrb[72].mxu0  ;;  %v9297_v13 = vpop.f32.mrb[69].mxu1  ;;  %9359 = vmatprep.subr.bf16.mxu0 %v10082_v1  ;;  %v9843_v10 = vld [vmem:[%s11336_s5] sm:$0xff]  }
 0x81d   : > { %v9302_v14 = vpop.f32.mrb[73].mxu0  ;;  %v4014_v15 = vpack.c.bf16 %v4003_v12, %v4003_v12  ;;  %v9846_v12 = vld [vmem:[%s11337_s8 + $0x8] sm:$0xff]  }
 0x81e   : > { %9342 = vmatmul.mubr.msk.bf16.vlgmr.msra.gmra.mrb[84].mxu1 %vm926_vm2, %v4013_v11  ;;  %v9844_v11 = vld [vmem:[%s11336_s5 + $0x8] sm:$0xff]  }
 0x81f   : > { %9355 = vmatprep.mubr.msk.bf16.mxu1 %vm10083_vm1, %v10082_v1  ;;  %9352 = vmatpush3.bf16.msra.mxu1 %v9843_v10  ;;  %v9855_v10 = vld [vmem:[%s10148_s24 + $0x98] sm:$0xff]  }
 0x820   : > { %9353 = vmatprep.subr.bf16.mxu1 %v10082_v1 }
 0x822   : > { %9348 = vmatmul.mubr.msk.bf16.vlgmr.msra.gmra.mrb[88].mxu0 %vm926_vm2, %v4014_v15 }
 0x823   : > { %9367 = vmatprep.mubr.msk.bf16.mxu0 %vm10083_vm1, %v10082_v1  ;;  %9354 = vmatpush3.bf16.msra.mxu1 %v9844_v11  ;;  %v9856_v11 = vld [vmem:[%s10148_s24 + $0xc8] sm:$0xff]  }
 0x824   : > { %9371 = vmatprep.subr.bf16.mxu1 %v10082_v1 }
 0x8d9   : > { %v4063_v16 = vpop.f32.mrb[72].mxu1 }
 0x8da   : > { %v9307_v30 = vpop.f32.mrb[73].mxu1  ;;  %v4391_v20 = vsel %vm999_vm3, %v4063_v16, 0.0 }
 0x8db   : > { %v4066_v17 = vpop.f32.mrb[74].mxu1 }
 0x8dc   : > { %v9308_v18 = vpop.f32.mrb[75].mxu1 }
 0x8dd   : > { %v4109_v19 = vpop.f32.mrb[76].mxu0 }
 0x8de   : > { %v4392_v31 = vsel %vm999_vm3, %v4109_v19, 0.0  ;;  %v9313_v21 = vpop.f32.mrb[77].mxu0 }
 0x8df   : > { %v4393_v22 = vadd.f32 %v4392_v31, %v4391_v20  ;;  %v4112_v8 = vpop.f32.mrb[78].mxu0  ;;  %v8419_v20 = vld [vmem:[%s11338_s9] ss:$0 sm:$0xff] }
 0x8e0   : > { %v9314_v39 = vpop.f32.mrb[79].mxu0 }
 0x8e1   : > { %v4155_v40 = vpop.f32.mrb[76].mxu1 }
 0x8e2   : > { %v4394_v23 = vsel %vm999_vm3, %v4155_v40, 0.0  ;;  %v9319_v9 = vpop.f32.mrb[77].mxu1 }
 0x8e3   : > { %v4395_v24 = vadd.f32 %v4394_v23, %v4393_v22  ;;  %v4158_v25 = vpop.f32.mrb[78].mxu1  ;;  %v8420_v22 = vld [vmem:[%s11339_s13] ss:$0 sm:$0xff]  ;;  %v9847_v23 = vld [vmem:[%s11337_s8 + $0x10] sm:$0xff]   ;;  %v9848_v9 = vld [vmem:[%s11337_s8 + $0x18] sm:$0xff]  }
 0x8e4   : > { %v9320_v26 = vpop.f32.mrb[79].mxu1 }
 0x8e5   : > { %v4201_v27 = vpop.f32.mrb[80].mxu0 }
 0x8e6   : > { %v4396_v47 = vsel %vm999_vm3, %v4201_v27, 0.0  ;;  %v9325_v48 = vpop.f32.mrb[81].mxu0 }
 0x8e7   : > { %v4397_v28 = vadd.f32 %v4396_v47, %v4395_v24  ;;  %v4204_v29 = vpop.f32.mrb[82].mxu0  ;;  %v8421_v24 = vld [vmem:[%s11340_s17] ss:$0 sm:$0xff] }
 0x8e8   : > { %v9326_v32 = vpop.f32.mrb[83].mxu0 }
 0x8e9   : > { %v4247_v33 = vpop.f32.mrb[80].mxu1 }
 0x8ea   : > { %v4398_v34 = vsel %vm999_vm3, %v4247_v33, 0.0  ;;  %v9331_v35 = vpop.f32.mrb[81].mxu1  ;;  %v8430_v33 = vld [vmem:[%s11341_s21] ss:$0 sm:$0xff] }
 0x8eb   : > { %v4399_v36 = vadd.f32 %v4398_v34, %v4397_v28  ;;  %v4250_v37 = vpop.f32.mrb[82].mxu1 }
 0x8ec   : > { %v9332_v41 = vpop.f32.mrb[83].mxu1 }
 0x8ed   : > { %v4293_v42 = vpop.f32.mrb[84].mxu0 }
 0x8ee   : > { %v4400_v43 = vsel %vm999_vm3, %v4293_v42, 0.0  ;;  %v9337_v44 = vpop.f32.mrb[85].mxu0 }
 0x8ef   : > { %v4401_v45 = vadd.f32 %v4400_v43, %v4399_v36  ;;  %v4296_v46 = vpop.f32.mrb[86].mxu0 }
 0x8f0   : > { %v9338_v49 = vpop.f32.mrb[87].mxu0 }
 0x8f1   : > { %v4339_v50 = vpop.f32.mrb[84].mxu1 }
 0x8f2   : > { %v4402_v51 = vsel %vm999_vm3, %v4339_v50, 0.0  ;;  %v9343_v52 = vpop.f32.mrb[85].mxu1  ;;  %v9849_v50 = vld [vmem:[%s10148_s24 + $0x80] sm:$0xff]  }
 0x8f3   : > { %v4403_v53 = vadd.f32 %v4402_v51, %v4401_v45  ;;  %v4342_v54 = vpop.f32.mrb[86].mxu1  ;;  %v9850_v51 = vld [vmem:[%s10148_s24 + $0xa0] sm:$0xff]   ;;  %v9851_v52 = vld [vmem:[%s10148_s24 + $0x88] sm:$0xff]  }
 0x8f4   : > { %v9344_v55 = vpop.f32.mrb[87].mxu1 }
 0x8f5   : > { %v4385_v56 = vpop.f32.mrb[88].mxu0 }
 0x8f6   : > { %v4404_v57 = vsel %vm999_vm3, %v4385_v56, 0.0  ;;  %v9349_v58 = vpop.f32.mrb[89].mxu0 }
 0x8f7   : > { %v4405_v59 = vadd.f32 %v4404_v57, %v4403_v53  ;;  %v4388_v60 = vpop.f32.mrb[90].mxu0  ;;  %v9852_v53 = vld [vmem:[%s10148_s24 + $0xa8] sm:$0xff]  }
 0x8f8   : > { %v9350_v61 = vpop.f32.mrb[91].mxu0 }
 0x8f9   : > { %v4406_v2 = vadd.f32 %v4405_v59, %v10331_v38  ;;  %v9845_v38 = vld [vmem:[%s11337_s8] sm:$0xff]  }
 0x8fa   : > { %9360 = vmatpush3.bf16.msra.mxu0 %v9845_v38  ;;  %v9857_v38 = vld [vmem:[%s10148_s24 + $0xb0] sm:$0xff]  }
 0x8fb   : > { %v4414_v3 = vadd.f32 %v8418_v62, %v4406_v2  ;;  %9361 = vmatprep.subr.bf16.mxu0 %v10082_v1  ;;  %v8433_v62 = vld [vmem:[%s11319_s14 + $0x1] ss:$0 sm:$0xff] }
 0x8fd   : > { %v4417_v4 = vsel %vm999_vm3, %v4414_v3, 0.0 }
 0x8fe   : > { %4418 = vadd.xlane.f32.xlu0 %v4417_v4  ;;  %9362 = vmatpush3.bf16.msra.mxu0 %v9846_v12  ;;  %v8434_v4 = vld [vmem:[%s10143_s19 + $0x1] ss:$0 sm:$0xff] }
 0x8ff   : > { %9363 = vmatprep.subr.bf16.mxu0 %v10082_v1  ;;  %v9858_v12 = vld [vmem:[%s10148_s24 + $0xe0] sm:$0xff]  }
 0x902   : > { %9364 = vmatpush3.bf16.msra.mxu0 %v9847_v23  ;;  %v9874_v23 = vld [vmem:[%s11321_s6 + $0xe0] sm:$0xff]  }
 0x903   : > { %9365 = vmatprep.subr.bf16.mxu0 %v10082_v1 }
 0x906   : > { %9366 = vmatpush3.bf16.msra.mxu0 %v9848_v9  ;;  %v9875_v9 = vld [vmem:[%s11321_s6 + $0xb8] sm:$0xff]  }
 0x907   : > { %9387 = vmatprep.subr.bf16.mxu0 %v10082_v1 }
 0x98b   : > { %v4419_v5 = vpop.xlane.xlu0 %4418 }
 0x98c   : > { %v4420_v6 = vmul.f32 0.03125, %v4419_v5 }
 0x98e   : > { %v4421_v63 = vsub.f32 %v4414_v3, %v4420_v6 }
 0x990   : > { %v4422_v7 = vmul.f32 %v4421_v63, %v4421_v63  ;;  %v4433_v31 = vmul.f32 %v8419_v20, %v4421_v63  ;;  %v9853_v63 = vld [vmem:[%s10148_s24 + $0x90] sm:$0xff]   ;;  %v9867_v20 = vld [vmem:[%s10148_s24 + $0xf8] sm:$0xff]  }
 0x992   : > { %v4423_v0 = vsel %vm999_vm3, %v4422_v7, 0.0  ;;  %v9854_v7 = vld [vmem:[%s10148_s24 + $0xc0] sm:$0xff]  }
 0x993   : > { %4424 = vadd.xlane.f32.xlu1 %v4423_v0 }
 0xa20   : > { %v4425_v13 = vpop.xlane.xlu1 %4424 }
 0xa21   : > { %v4426_v14 = vmul.f32 0.032258064, %v4425_v13  ;;  %v9859_v13 = vld [vmem:[%s10148_s24 + $0xb8] sm:$0xff]  }
 0xa23   : > { %9941 = vrsqrt.f32 %v4426_v14  ;;  %vm4436_vm7 = vcmp.eq.f32.partialorder %v4426_v14, inf  ;;  %v4439_v30 = vand.u32 2147483648, %v4426_v14  ;;  %vm4438_vm8 = vcmp.eq.f32.partialorder %v4426_v14, 0.0 }
 0xa2d   : > { %v9942_v15 = vpop.eup %9941 }
 0xa2e   : > { %v4435_v16 = vmul.f32 %v9942_v15, %v4426_v14  ;;  %v9861_v15 = vld [vmem:[%s10148_s24 + $0xd0] sm:$0xff]  }
 0xa30   : > { %v4437_v17 = vsel %vm4436_vm7, %v4426_v14, %v4435_v16  ;;  %v9860_v14 = vld [vmem:[%s10148_s24 + $0xe8] sm:$0xff]   ;;  %v9862_v16 = vld [vmem:[%s11321_s6 + $0x80] sm:$0xff]  }
 0xa31   : > { %v4440_v18 = vsel %vm4438_vm8, %v4439_v30, %v4437_v17  ;;  %v9863_v30 = vld [vmem:[%s10148_s24 + $0xd8] sm:$0xff]   ;;  %v9864_v17 = vld [vmem:[%s11321_s6 + $0x88] sm:$0xff]  }
 0xa32   : > { %v4441_v19 = vadd.f32 1e-06, %v4440_v18  ;;  %v9865_v18 = vld [vmem:[%s10148_s24 + $0xf0] sm:$0xff]  }
 0xa34   : > { %9943 = vrcp.f32 %v4441_v19  ;;  %v9866_v19 = vld [vmem:[%s11321_s6 + $0xa0] sm:$0xff]  }
 0xa3e   : > { %v9944_v21 = vpop.eup %9943 }
 0xa3f   : > { %v4443_v8 = vmul.f32 %v9944_v21, %v4433_v31  ;;  %v9868_v31 = vld [vmem:[%s11321_s6 + $0xa8] sm:$0xff]   ;;  %v9869_v21 = vld [vmem:[%s11321_s6 + $0x90] sm:$0xff]  }
 0xa41   : > { %v4450_v39 = vadd.f32 %v8420_v22, %v4443_v8  ;;  %v9870_v22 = vld [vmem:[%s11321_s6 + $0xc0] sm:$0xff]   ;;  %v9871_v8 = vld [vmem:[%s11321_s6 + $0x98] sm:$0xff]  }
 0xa43   : > { %v4451_v40 = vpack.c.bf16 %v4450_v39, %v4450_v39  ;;  %v9872_v39 = vld [vmem:[%s11321_s6 + $0xc8] sm:$0xff]  }
 0xa45   : > { %9356 = vmatmul.mubr.msk.bf16.vlgmr.msra.gmra.mrb[88].mxu1 %vm999_vm3, %v4451_v40  ;;  %v9873_v40 = vld [vmem:[%s11321_s6 + $0xb0] sm:$0xff]  }
 0xa46   : > { %9375 = vmatprep.mubr.msk.bf16.mxu1 %vm10083_vm1, %v10082_v1  ;;  %9372 = vmatpush3.bf16.msra.mxu1 %v9849_v50  ;;  %v9896_v50 = vld [vmem:[%s10168_s20 + $0xf8] sm:$0xff]  }
 0xa47   : > { %9373 = vmatprep.subr.bf16.mxu1 %v10082_v1 }
 0xa4a   : > { %9374 = vmatpush3.bf16.msra.mxu1 %v9851_v52 }
 0xa4b   : > { %9379 = vmatprep.subr.bf16.mxu1 %v10082_v1 }
 0xb18   : > { %v4512_v25 = vpop.f32.mrb[88].mxu1 }
 0xb19   : > { %v4513_v26 = vadd.f32 %v8421_v24, %v4512_v25  ;;  %v9357_v27 = vpop.f32.mrb[89].mxu1  ;;  %v9876_v24 = vld [vmem:[%s11321_s6 + $0xe8] sm:$0xff]   ;;  %v9877_v25 = vld [vmem:[%s11321_s6 + $0xd0] sm:$0xff]  }
 0xb1a   : > { %v4515_v47 = vpop.f32.mrb[90].mxu1  ;;  %v9879_v27 = vld [vmem:[%s11321_s6 + $0xd8] sm:$0xff]  }
 0xb1b   : > { %v4518_v48 = vmax.f32 %v4513_v26, 0.0  ;;  %v9358_v28 = vpop.f32.mrb[91].mxu1  ;;  %v9878_v26 = vld [vmem:[%s10168_s20 + $0x80] sm:$0xff]   ;;  %v9880_v47 = vld [vmem:[%s10168_s20 + $0x88] sm:$0xff]  }
 0xb1c   : > { %v9882_v28 = vld [vmem:[%s10168_s20 + $0xa0] sm:$0xff]  }
 0xb1d   : > { %v4519_v29 = vpack.c.bf16 %v4518_v48, %v4518_v48  ;;  %v9881_v48 = vld [vmem:[%s11321_s6 + $0xf0] sm:$0xff]  }
 0xb1f   : > { %9368 = vmatmul.mubr.msk.bf16.vlgmr.msra.gmra.mrb[92].mxu0 %vm4552_vm9, %v4519_v29  ;;  %v9883_v29 = vld [vmem:[%s11321_s6 + $0xf8] sm:$0xff]   ;;  %s8728_s6 = sshll.u32 %s10261_s0, 7 }
 0xb20   : > { %9391 = vmatprep.mubr.msk.bf16.mxu0 %vm10083_vm1, %v10082_v1  ;;  %9388 = vmatpush3.bf16.msra.mxu0 %v9850_v51 }
 0xb21   : > { %9389 = vmatprep.subr.bf16.mxu0 %v10082_v1 }
 0xb24   : > { %9390 = vmatpush3.bf16.msra.mxu0 %v9852_v53 }
 0xb25   : > { %9403 = vmatprep.subr.bf16.mxu0 %v10082_v1 }
 0xbf2   : > { %v4590_v32 = vpop.f32.mrb[92].mxu0 }
 0xbf3   : > { %v4596_v34 = vadd.f32 %v4590_v32, %v4414_v3  ;;  %v9369_v35 = vpop.f32.mrb[93].mxu0  ;;  %v9884_v32 = vld [vmem:[%s10168_s20 + $0xa8] sm:$0xff]  }
 0xbf4   : > { %v4593_v36 = vpop.f32.mrb[94].mxu0  ;;  %v9887_v35 = vld [vmem:[%s10168_s20 + $0x98] sm:$0xff]  }
 0xbf5   : > { %v10779_v37 = vadd.f32 %v8430_v33, %v4596_v34  ;;  %v9370_v41 = vpop.f32.mrb[95].mxu0  ;;  %v9885_v33 = vld [vmem:[%s10168_s20 + $0x90] sm:$0xff]   ;;  %v9886_v34 = vld [vmem:[%s10168_s20 + $0xc0] sm:$0xff]   ;;  %v9888_v36 = vld [vmem:[%s10168_s20 + $0xc8] sm:$0xff]  }
 0xbf6   : > { %v9889_v41 = vld [vmem:[%s10168_s20 + $0xb0] sm:$0xff]  }
 0xbf7   : > { %v4609_v42 = vsel %vm999_vm3, %v10779_v37, 0.0 }
 0xbf8   : > { %4610 = vadd.xlane.f32.xlu0 %v4609_v42  ;;  %v9890_v42 = vld [vmem:[%s10168_s20 + $0xe0] sm:$0xff]  }
 0xc85   : > { %v4611_v43 = vpop.xlane.xlu0 %4610 }
 0xc86   : > { %v4612_v44 = vmul.f32 0.03125, %v4611_v43  ;;  %v9891_v43 = vld [vmem:[%s10168_s20 + $0xb8] sm:$0xff]  }
 0xc88   : > { %v4613_v45 = vsub.f32 %v10779_v37, %v4612_v44  ;;  %v9892_v44 = vld [vmem:[%s10168_s20 + $0xe8] sm:$0xff]  }
 0xc8a   : > { %v4614_v46 = vmul.f32 %v4613_v45, %v4613_v45  ;;  %v4625_v2 = vmul.f32 %v8433_v62, %v4613_v45  ;;  %v9893_v45 = vld [vmem:[%s10168_s20 + $0xd0] sm:$0xff]  }
 0xc8c   : > { %v4615_v49 = vsel %vm999_vm3, %v4614_v46, 0.0  ;;  %v9894_v46 = vld [vmem:[%s10168_s20 + $0xd8] sm:$0xff]  }
 0xc8d   : > { %4616 = vadd.xlane.f32.xlu1 %v4615_v49  ;;  %v9895_v49 = vld [vmem:[%s10168_s20 + $0xf0] sm:$0xff]  }
 0xd1a   : > { %v4617_v54 = vpop.xlane.xlu1 %4616 }
 0xd1b   : > { %v4618_v55 = vmul.f32 0.032258064, %v4617_v54 }
 0xd1d   : > { %9945 = vrsqrt.f32 %v4618_v55  ;;  %vm4628_vm10 = vcmp.eq.f32.partialorder %v4618_v55, inf  ;;  %v4631_v58 = vand.u32 2147483648, %v4618_v55  ;;  %vm4630_vm11 = vcmp.eq.f32.partialorder %v4618_v55, 0.0 }
 0xd27   : > { %v9946_v56 = vpop.eup %9945 }
 0xd28   : > { %v4627_v57 = vmul.f32 %v9946_v56, %v4618_v55 }
 0xd2a   : > { %v4629_v59 = vsel %vm4628_vm10, %v4618_v55, %v4627_v57 }
 0xd2b   : > { %v4632_v60 = vsel %vm4630_vm11, %v4631_v58, %v4629_v59 }
 0xd2c   : > { %v4633_v61 = vadd.f32 1e-06, %v4632_v60 }
 0xd2e   : > { %9947 = vrcp.f32 %v4633_v61 }
 0xd38   : > { %v9948_v3 = vpop.eup %9947 }
 0xd39   : > { %v4635_v5 = vmul.f32 %v9948_v3, %v4625_v2 }
 0xd3b   : > { %v4642_v6 = vadd.f32 %v8434_v4, %v4635_v5 }
 0xd3d   : > { %v10797_v0 = vpack.c.bf16 %v4642_v6, %v4642_v6 }
 0xd3f   : > { %9376 = vmatmul.mubr.msk.bf16.vlgmr.msra.gmra.mrb[92].mxu1 %vm999_vm3, %v10797_v0  ;;  %9392 = vmatmul.mubr.msk.bf16.vlgmr.msra.gmra.mrb[96].mxu0 %vm999_vm3, %v10797_v0 }
 0xd40   : > { %9380 = vmatpush3.bf16.msra.mxu1 %v9853_v63  ;;  %9404 = vmatpush3.bf16.msra.mxu0 %v9854_v7 }
 0xd41   : > { %9381 = vmatprep.subr.bf16.mxu1 %v10082_v1  ;;  %9405 = vmatprep.subr.bf16.mxu0 %v10082_v1 }
 0xd42   : > { %9383 = vmatprep.mubr.msk.bf16.mxu1 %vm10083_vm1, %v10082_v1  ;;  %9407 = vmatprep.mubr.msk.bf16.mxu0 %vm10083_vm1, %v10082_v1 }
 0xd44   : > { %9382 = vmatpush3.bf16.msra.mxu1 %v9855_v10  ;;  %9406 = vmatpush3.bf16.msra.mxu0 %v9856_v11 }
 0xd45   : > { %9395 = vmatprep.subr.bf16.mxu1 %v10082_v1  ;;  %9419 = vmatprep.subr.bf16.mxu0 %v10082_v1 }
 0xd47   : > { %9384 = vmatmul.mubr.msk.bf16.vlgmr.msra.gmra.mrb[96].mxu1 %vm999_vm3, %v10797_v0  ;;  %9408 = vmatmul.mubr.msk.bf16.vlgmr.msra.gmra.mrb[100].mxu0 %vm999_vm3, %v10797_v0 }
 0xd48   : > { %9396 = vmatpush3.bf16.msra.mxu1 %v9857_v38  ;;  %9420 = vmatpush3.bf16.msra.mxu0 %v9858_v12 }
 0xd49   : > { %9397 = vmatprep.subr.bf16.mxu1 %v10082_v1  ;;  %9421 = vmatprep.subr.bf16.mxu0 %v10082_v1 }
 0xd4a   : > { %9399 = vmatprep.mubr.msk.bf16.mxu1 %vm10083_vm1, %v10082_v1  ;;  %9423 = vmatprep.mubr.msk.bf16.mxu0 %vm10083_vm1, %v10082_v1 }
 0xd4c   : > { %9398 = vmatpush3.bf16.msra.mxu1 %v9859_v13  ;;  %9422 = vmatpush3.bf16.msra.mxu0 %v9860_v14  ;;  %v8547_v13 = vld [vmem:[%s11331_s2 + $0x8] ss:$0 sm:$0xff] }
 0xd4d   : > { %9411 = vmatprep.subr.bf16.mxu1 %v10082_v1  ;;  %9435 = vmatprep.subr.bf16.mxu0 %v10082_v1 }
 0xd4f   : > { %9400 = vmatmul.mubr.msk.bf16.vlgmr.msra.gmra.mrb[100].mxu1 %vm999_vm3, %v10797_v0  ;;  %9424 = vmatmul.mubr.msk.bf16.vlgmr.msra.gmra.mrb[104].mxu0 %vm999_vm3, %v10797_v0 }
 0xd50   : > { %9412 = vmatpush3.bf16.msra.mxu1 %v9861_v15  ;;  %9436 = vmatpush3.bf16.msra.mxu0 %v9862_v16  ;;  %v8475_v16 = vld [vmem:[%s11332_s16 + $0x8] ss:$0 sm:$0xff] }
 0xd51   : > { %9413 = vmatprep.subr.bf16.mxu1 %v10082_v1  ;;  %9437 = vmatprep.subr.bf16.mxu0 %v10082_v1 }
 0xd52   : > { %9415 = vmatprep.mubr.msk.bf16.mxu1 %vm10083_vm1, %v10082_v1  ;;  %9439 = vmatprep.mubr.msk.bf16.mxu0 %vm10083_vm1, %v10082_v1 }
 0xd54   : > { %9414 = vmatpush3.bf16.msra.mxu1 %v9863_v30  ;;  %9438 = vmatpush3.bf16.msra.mxu0 %v9864_v17 }
 0xd55   : > { %9427 = vmatprep.subr.bf16.mxu1 %v10082_v1  ;;  %9451 = vmatprep.subr.bf16.mxu0 %v10082_v1 }
 0xd57   : > { %9416 = vmatmul.mubr.msk.bf16.vlgmr.msra.gmra.mrb[104].mxu1 %vm999_vm3, %v10797_v0  ;;  %9440 = vmatmul.mubr.msk.bf16.vlgmr.msra.gmra.mrb[108].mxu0 %vm999_vm3, %v10797_v0 }
 0xd58   : > { %9428 = vmatpush3.bf16.msra.mxu1 %v9865_v18  ;;  %9452 = vmatpush3.bf16.msra.mxu0 %v9866_v19 }
 0xd59   : > { %9429 = vmatprep.subr.bf16.mxu1 %v10082_v1  ;;  %9453 = vmatprep.subr.bf16.mxu0 %v10082_v1 }
 0xd5a   : > { %9431 = vmatprep.mubr.msk.bf16.mxu1 %vm10083_vm1, %v10082_v1  ;;  %9455 = vmatprep.mubr.msk.bf16.mxu0 %vm10083_vm1, %v10082_v1 }
 0xd5c   : > { %9430 = vmatpush3.bf16.msra.mxu1 %v9867_v20  ;;  %9454 = vmatpush3.bf16.msra.mxu0 %v9868_v31 }
 0xd5d   : > { %9443 = vmatprep.subr.bf16.mxu1 %v10082_v1  ;;  %9467 = vmatprep.subr.bf16.mxu0 %v10082_v1 }
 0xd5f   : > { %9432 = vmatmul.mubr.msk.bf16.vlgmr.msra.gmra.mrb[108].mxu1 %vm999_vm3, %v10797_v0  ;;  %9456 = vmatmul.mubr.msk.bf16.vlgmr.msra.gmra.mrb[112].mxu0 %vm999_vm3, %v10797_v0 }
 0xd60   : > { %9444 = vmatpush3.bf16.msra.mxu1 %v9869_v21  ;;  %9468 = vmatpush3.bf16.msra.mxu0 %v9870_v22 }
 0xd61   : > { %9445 = vmatprep.subr.bf16.mxu1 %v10082_v1  ;;  %9469 = vmatprep.subr.bf16.mxu0 %v10082_v1 }
 0xd62   : > { %9447 = vmatprep.mubr.msk.bf16.mxu1 %vm10083_vm1, %v10082_v1  ;;  %9471 = vmatprep.mubr.msk.bf16.mxu0 %vm10083_vm1, %v10082_v1 }
 0xd64   : > { %9446 = vmatpush3.bf16.msra.mxu1 %v9871_v8  ;;  %9470 = vmatpush3.bf16.msra.mxu0 %v9872_v39  ;;  %v8549_v8 = vld [vmem:[%s11331_s2 + $0xa] ss:$0 sm:$0xff] }
 0xd65   : > { %9459 = vmatprep.subr.bf16.mxu1 %v10082_v1  ;;  %9483 = vmatprep.subr.bf16.mxu0 %v10082_v1 }
 0xd67   : > { %9448 = vmatmul.mubr.msk.bf16.vlgmr.msra.gmra.mrb[112].mxu1 %vm999_vm3, %v10797_v0  ;;  %9472 = vmatmul.mubr.msk.bf16.vlgmr.msra.gmra.mrb[116].mxu0 %vm999_vm3, %v10797_v0 }
 0xd68   : > { %9460 = vmatpush3.bf16.msra.mxu1 %v9873_v40  ;;  %9484 = vmatpush3.bf16.msra.mxu0 %v9874_v23  ;;  %v8477_v23 = vld [vmem:[%s11332_s16 + $0xa] ss:$0 sm:$0xff] }
 0xd69   : > { %9461 = vmatprep.subr.bf16.mxu1 %v10082_v1  ;;  %9485 = vmatprep.subr.bf16.mxu0 %v10082_v1 }
 0xd6a   : > { %9463 = vmatprep.mubr.msk.bf16.mxu1 %vm10083_vm1, %v10082_v1  ;;  %9487 = vmatprep.mubr.msk.bf16.mxu0 %vm10083_vm1, %v10082_v1 }
 0xd6c   : > { %9462 = vmatpush3.bf16.msra.mxu1 %v9875_v9  ;;  %9486 = vmatpush3.bf16.msra.mxu0 %v9876_v24 }
 0xd6d   : > { %9475 = vmatprep.subr.bf16.mxu1 %v10082_v1  ;;  %9499 = vmatprep.subr.bf16.mxu0 %v10082_v1 }
 0xd6f   : > { %9464 = vmatmul.mubr.msk.bf16.vlgmr.msra.gmra.mrb[116].mxu1 %vm999_vm3, %v10797_v0  ;;  %9488 = vmatmul.mubr.msk.bf16.vlgmr.msra.gmra.mrb[120].mxu0 %vm999_vm3, %v10797_v0 }
 0xd70   : > { %9476 = vmatpush3.bf16.msra.mxu1 %v9877_v25  ;;  %9500 = vmatpush3.bf16.msra.mxu0 %v9878_v26 }
 0xd71   : > { %9477 = vmatprep.subr.bf16.mxu1 %v10082_v1  ;;  %9501 = vmatprep.subr.bf16.mxu0 %v10082_v1 }
 0xd72   : > { %9479 = vmatprep.mubr.msk.bf16.mxu1 %vm10083_vm1, %v10082_v1  ;;  %9503 = vmatprep.mubr.msk.bf16.mxu0 %vm10083_vm1, %v10082_v1 }
 0xd74   : > { %9478 = vmatpush3.bf16.msra.mxu1 %v9879_v27  ;;  %9502 = vmatpush3.bf16.msra.mxu0 %v9880_v47 }
 0xd75   : > { %9491 = vmatprep.subr.bf16.mxu1 %v10082_v1  ;;  %9515 = vmatprep.subr.bf16.mxu0 %v10082_v1 }
 0xd77   : > { %9480 = vmatmul.mubr.msk.bf16.vlgmr.msra.gmra.mrb[120].mxu1 %vm999_vm3, %v10797_v0  ;;  %9504 = vmatmul.mubr.msk.bf16.vlgmr.msra.gmra.mrb[124].mxu0 %vm999_vm3, %v10797_v0 }
 0xd78   : > { %9492 = vmatpush3.bf16.msra.mxu1 %v9881_v48  ;;  %9516 = vmatpush3.bf16.msra.mxu0 %v9882_v28 }
 0xd79   : > { %9493 = vmatprep.subr.bf16.mxu1 %v10082_v1  ;;  %9517 = vmatprep.subr.bf16.mxu0 %v10082_v1 }
 0xd7a   : > { %9495 = vmatprep.mubr.msk.bf16.mxu1 %vm10083_vm1, %v10082_v1  ;;  %9519 = vmatprep.mubr.msk.bf16.mxu0 %vm10083_vm1, %v10082_v1 }
 0xd7c   : > { %9494 = vmatpush3.bf16.msra.mxu1 %v9883_v29  ;;  %9518 = vmatpush3.bf16.msra.mxu0 %v9884_v32  ;;  %v8548_v29 = vld [vmem:[%s11331_s2 + $0x9] ss:$0 sm:$0xff]  ;;  %v8551_v32 = vld [vmem:[%s11331_s2 + $0xc] ss:$0 sm:$0xff] }
 0xd7d   : > { %9507 = vmatprep.subr.bf16.mxu1 %v10082_v1  ;;  %9531 = vmatprep.subr.bf16.mxu0 %v10082_v1 }
 0xd7f   : > { %9496 = vmatmul.mubr.msk.bf16.vlgmr.msra.gmra.mrb[124].mxu1 %vm999_vm3, %v10797_v0  ;;  %9520 = vmatmul.mubr.msk.bf16.vlgmr.msra.gmra.mrb[128].mxu0 %vm999_vm3, %v10797_v0 }
 0xd80   : > { %9508 = vmatpush3.bf16.msra.mxu1 %v9885_v33  ;;  %9532 = vmatpush3.bf16.msra.mxu0 %v9886_v34 }
 0xd81   : > { %9509 = vmatprep.subr.bf16.mxu1 %v10082_v1  ;;  %9533 = vmatprep.subr.bf16.mxu0 %v10082_v1 }
 0xd82   : > { %9511 = vmatprep.mubr.msk.bf16.mxu1 %vm10083_vm1, %v10082_v1  ;;  %9535 = vmatprep.mubr.msk.bf16.mxu0 %vm10083_vm1, %v10082_v1 }
 0xd84   : > { %9510 = vmatpush3.bf16.msra.mxu1 %v9887_v35  ;;  %9534 = vmatpush3.bf16.msra.mxu0 %v9888_v36  ;;  %v8476_v35 = vld [vmem:[%s11332_s16 + $0x9] ss:$0 sm:$0xff]  ;;  %v8479_v36 = vld [vmem:[%s11332_s16 + $0xc] ss:$0 sm:$0xff] }
 0xd85   : > { %9523 = vmatprep.subr.bf16.mxu1 %v10082_v1  ;;  %9547 = vmatprep.subr.bf16.mxu0 %v10082_v1 }
 0xd87   : > { %9512 = vmatmul.mubr.msk.bf16.vlgmr.msra.gmra.mrb[128].mxu1 %vm999_vm3, %v10797_v0  ;;  %9536 = vmatmul.mubr.msk.bf16.vlgmr.msra.gmra.mrb[132].mxu0 %vm999_vm3, %v10797_v0 }
 0xd88   : > { %9524 = vmatpush3.bf16.msra.mxu1 %v9889_v41  ;;  %9548 = vmatpush3.bf16.msra.mxu0 %v9890_v42 }
 0xd89   : > { %9525 = vmatprep.subr.bf16.mxu1 %v10082_v1  ;;  %9549 = vmatprep.subr.bf16.mxu0 %v10082_v1 }
 0xd8a   : > { %9527 = vmatprep.mubr.msk.bf16.mxu1 %vm10083_vm1, %v10082_v1  ;;  %9551 = vmatprep.mubr.msk.bf16.mxu0 %vm10083_vm1, %v10082_v1 }
 0xd8c   : > { %9526 = vmatpush3.bf16.msra.mxu1 %v9891_v43  ;;  %9550 = vmatpush3.bf16.msra.mxu0 %v9892_v44 }
 0xd8d   : > { %9539 = vmatprep.subr.bf16.mxu1 %v10082_v1  ;;  %9563 = vmatprep.subr.mxu0 %v10082_v1 }
 0xd8f   : > { %9528 = vmatmul.mubr.msk.bf16.vlgmr.msra.gmra.mrb[132].mxu1 %vm999_vm3, %v10797_v0  ;;  %9552 = vmatmul.mubr.msk.bf16.vlgmr.msra.gmra.mrb[136].mxu0 %vm999_vm3, %v10797_v0 }
 0xd90   : > { %9540 = vmatpush3.bf16.msra.mxu1 %v9893_v45  ;;  %9543 = vmatprep.mubr.msk.bf16.mxu1 %vm10083_vm1, %v10082_v1 }
 0xd91   : > { %9541 = vmatprep.subr.bf16.mxu1 %v10082_v1  ;;  %9565 = vmatprep.mubr.msk.f32.mxu0 %vm10083_vm1, %v10082_v1 }
 0xd94   : > { %9542 = vmatpush3.bf16.msra.mxu1 %v9894_v46 }
 0xd95   : > { %9555 = vmatprep.subr.bf16.mxu1 %v10082_v1 }
 0xd97   : > { %9544 = vmatmul.mubr.msk.bf16.vlgmr.msra.gmra.mrb[136].mxu1 %vm999_vm3, %v10797_v0 }
 0xd98   : > { %9556 = vmatpush3.bf16.msra.mxu1 %v9895_v49  ;;  %9559 = vmatprep.mubr.msk.bf16.mxu1 %vm10083_vm1, %v10082_v1 }
 0xd99   : > { %9557 = vmatprep.subr.bf16.mxu1 %v10082_v1 }
 0xd9c   : > { %9558 = vmatpush3.bf16.msra.mxu1 %v9896_v50 }
 0xd9d   : > { %9573 = vmatprep.subr.mxu1 %v10082_v1 }
 0xd9f   : > { %9560 = vmatmul.mubr.msk.bf16.vlgmr.msra.gmra.mrb[140].mxu1 %vm999_vm3, %v10797_v0 }
 0xda0   : > { %9575 = vmatprep.mubr.msk.f32.mxu1 %vm10083_vm1, %v10082_v1 }
 0xe12   : > { %v4783_v51 = vpop.f32.mrb[92].mxu1  ;;  %v4887_v52 = vpop.f32.mrb[96].mxu0 }
 0xe13   : > { %v9377_v53 = vpop.f32.mrb[93].mxu1  ;;  %v9393_v54 = vpop.f32.mrb[97].mxu0  ;;  %v4784_v22 = vadd.f32 %v8475_v16, %v4783_v51  ;;  %v4888_v28 = vadd.f32 %v8477_v23, %v4887_v52 }
 0xe14   : > { %v4786_v55 = vpop.f32.mrb[94].mxu1  ;;  %v4890_v56 = vpop.f32.mrb[98].mxu0  ;;  %v8550_v53 = vld [vmem:[%s11331_s2 + $0xb] ss:$0 sm:$0xff]  ;;  %v8553_v54 = vld [vmem:[%s11331_s2 + $0xe] ss:$0 sm:$0xff] }
 0xe15   : > { %v9378_v57 = vpop.f32.mrb[95].mxu1  ;;  %v9394_v58 = vpop.f32.mrb[99].mxu0 }
 0xe16   : > { %v8478_v57 = vld [vmem:[%s11332_s16 + $0xb] ss:$0 sm:$0xff]  ;;  %v8481_v58 = vld [vmem:[%s11332_s16 + $0xe] ss:$0 sm:$0xff] }
 0xe1a   : > { %v10981_v59 = vpop.f32.mrb[96].mxu1  ;;  %v10983_v60 = vpop.f32.mrb[100].mxu0 }
 0xe1b   : > { %v9385_v61 = vpop.f32.mrb[97].mxu1  ;;  %v9409_v62 = vpop.f32.mrb[101].mxu0  ;;  %v4836_v51 = vadd.f32 %v8476_v35, %v10981_v59  ;;  %v4992_v52 = vadd.f32 %v8479_v36, %v10983_v60 }
 0xe1c   : > { %v4838_v2 = vpop.f32.mrb[98].mxu1  ;;  %v4994_v3 = vpop.f32.mrb[102].mxu0 }
 0xe1d   : > { %v9386_v4 = vpop.f32.mrb[99].mxu1  ;;  %v9410_v5 = vpop.f32.mrb[103].mxu0 }
 0xe22   : > { %v10985_v6 = vpop.f32.mrb[100].mxu1  ;;  %v10987_v63 = vpop.f32.mrb[104].mxu0 }
 0xe23   : > { %v9401_v7 = vpop.f32.mrb[101].mxu1  ;;  %v9425_v0 = vpop.f32.mrb[105].mxu0 }
 0xe24   : > { %v4942_v10 = vpop.f32.mrb[102].mxu1  ;;  %v5098_v11 = vpop.f32.mrb[106].mxu0  ;;  %v4940_v7 = vadd.f32 %v8478_v57, %v10985_v6  ;;  %v5096_v0 = vadd.f32 %v8481_v58, %v10987_v63  ;;  %v8480_v63 = vld [vmem:[%s11332_s16 + $0xd] ss:$0 sm:$0xff] }
 0xe25   : > { %v9402_v38 = vpop.f32.mrb[103].mxu1  ;;  %v9426_v12 = vpop.f32.mrb[107].mxu0  ;;  %v8552_v10 = vld [vmem:[%s11331_s2 + $0xd] ss:$0 sm:$0xff]  ;;  %v8619_v11 = vld [vmem:[%s11333_s22 + $0x8] ss:$0 sm:$0xff] }
 0xe2a   : > { %v10990_v14 = vpop.f32.mrb[104].mxu1  ;;  %v5289_v15 = vpop.f32.mrb[108].mxu0 }
 0xe2b   : > { %v5290_v30 = vadd.f32 %v8547_v13, %v5289_v15  ;;  %v9417_v17 = vpop.f32.mrb[105].mxu1  ;;  %v9441_v18 = vpop.f32.mrb[109].mxu0 }
 0xe2c   : > { %v5046_v19 = vpop.f32.mrb[106].mxu1  ;;  %v5292_v20 = vpop.f32.mrb[110].mxu0 }
 0xe2d   : > { %v9418_v31 = vpop.f32.mrb[107].mxu1  ;;  %v9442_v21 = vpop.f32.mrb[111].mxu0  ;;  %9564 = vmatpush3.xpose.msk.msra.mxu0 %vm926_vm2, %v5290_v30  ;;  %v5044_v20 = vadd.f32 %v8480_v63, %v10990_v14 }
 0xe2e   : > { %9568 = vmatprep.subr.mxu0 %v10082_v1  ;;  %v8554_v31 = vld [vmem:[%s11331_s2 + $0xf] ss:$0 sm:$0xff]  ;;  %s11342_s2 = sld [smem:[#allocation25_spill]] }
 0xe30   : > { %9566 = vmatmul.mubr.msk.f32.vlgmr.msra.gmra.mrb[74].mxu0 %vm926_vm2, %v4784_v22 }
 0xe31   : > { %9570 = vmatprep.mubr.msk.f32.mxu0 %vm10083_vm1, %v10082_v1 }
 0xe32   : > { %v10999_v39 = vpop.f32.mrb[108].mxu1  ;;  %v5393_v40 = vpop.f32.mrb[112].mxu0 }
 0xe33   : > { %v5394_v9 = vadd.f32 %v8549_v8, %v5393_v40  ;;  %v9433_v24 = vpop.f32.mrb[109].mxu1  ;;  %v9457_v25 = vpop.f32.mrb[113].mxu0  ;;  %v8482_v8 = vld [vmem:[%s11332_s16 + $0xf] ss:$0 sm:$0xff] }
 0xe34   : > { %v5150_v26 = vpop.f32.mrb[110].mxu1  ;;  %v5396_v27 = vpop.f32.mrb[114].mxu0 }
 0xe35   : > { %v9434_v47 = vpop.f32.mrb[111].mxu1  ;;  %v9458_v48 = vpop.f32.mrb[115].mxu0  ;;  %9574 = vmatpush3.xpose.msk.msra.mxu1 %vm926_vm2, %v5394_v9  ;;  %v5148_v27 = vadd.f32 %v8482_v8, %v10999_v39 }
 0xe36   : > { %9583 = vmatprep.subr.mxu1 %v10082_v1  ;;  %v8620_v47 = vld [vmem:[%s11333_s22 + $0x9] ss:$0 sm:$0xff] }
 0xe38   : > { %9576 = vmatmul.mubr.msk.f32.vlgmr.msra.gmra.mrb[70].mxu1 %vm926_vm2, %v4888_v28 }
 0xe39   : > { %9585 = vmatprep.mubr.msk.f32.mxu1 %vm10083_vm1, %v10082_v1 }
 0xe3a   : > { %v5341_v33 = vpop.f32.mrb[112].mxu1  ;;  %v5497_v34 = vpop.f32.mrb[116].mxu0 }
 0xe3b   : > { %v5342_v41 = vadd.f32 %v8548_v29, %v5341_v33  ;;  %v5498_v42 = vadd.f32 %v8551_v32, %v5497_v34  ;;  %v9449_v43 = vpop.f32.mrb[113].mxu1  ;;  %v9473_v44 = vpop.f32.mrb[117].mxu0 }
 0xe3c   : > { %v5344_v45 = vpop.f32.mrb[114].mxu1  ;;  %v5500_v46 = vpop.f32.mrb[118].mxu0 }
 0xe3d   : > { %v9450_v49 = vpop.f32.mrb[115].mxu1  ;;  %v9474_v50 = vpop.f32.mrb[119].mxu0  ;;  %9569 = vmatpush3.xpose.msk.msra.mxu0 %vm926_vm2, %v5342_v41  ;;  %9584 = vmatpush3.xpose.msk.msra.mxu1 %vm926_vm2, %v5498_v42 }
 0xe3e   : > { %9578 = vmatprep.subr.mxu0 %v10082_v1  ;;  %9593 = vmatprep.subr.mxu1 %v10082_v1 }
 0xe40   : > { %9571 = vmatmul.mubr.msk.f32.vlgmr.msra.gmra.mrb[140].mxu0 %vm926_vm2, %v4836_v51  ;;  %9586 = vmatmul.mubr.msk.f32.vlgmr.msra.gmra.mrb[144].mxu1 %vm926_vm2, %v4992_v52 }
 0xe41   : > { %9580 = vmatprep.mubr.msk.f32.mxu0 %vm10083_vm1, %v10082_v1  ;;  %9595 = vmatprep.mubr.msk.f32.mxu1 %vm10083_vm1, %v10082_v1 }
 0xe42   : > { %v5445_v55 = vpop.f32.mrb[116].mxu1  ;;  %v5601_v56 = vpop.f32.mrb[120].mxu0 }
 0xe43   : > { %v5446_v59 = vadd.f32 %v8550_v53, %v5445_v55  ;;  %v5602_v60 = vadd.f32 %v8553_v54, %v5601_v56  ;;  %v9465_v61 = vpop.f32.mrb[117].mxu1  ;;  %v9489_v62 = vpop.f32.mrb[121].mxu0 }
 0xe44   : > { %v5448_v2 = vpop.f32.mrb[118].mxu1  ;;  %v5604_v3 = vpop.f32.mrb[122].mxu0 }
 0xe45   : > { %v9466_v4 = vpop.f32.mrb[119].mxu1  ;;  %v9490_v5 = vpop.f32.mrb[123].mxu0  ;;  %9579 = vmatpush3.xpose.msk.msra.mxu0 %vm926_vm2, %v5446_v59  ;;  %9594 = vmatpush3.xpose.msk.msra.mxu1 %vm926_vm2, %v5602_v60 }
 0xe46   : > { %9588 = vmatprep.subr.mxu0 %v10082_v1  ;;  %9603 = vmatprep.subr.mxu1 %v10082_v1 }
 0xe48   : > { %9581 = vmatmul.mubr.msk.f32.vlgmr.msra.gmra.mrb[142].mxu0 %vm926_vm2, %v4940_v7  ;;  %9596 = vmatmul.mubr.msk.f32.vlgmr.msra.gmra.mrb[146].mxu1 %vm926_vm2, %v5096_v0 }
 0xe49   : > { %9590 = vmatprep.mubr.msk.f32.mxu0 %vm10083_vm1, %v10082_v1  ;;  %9605 = vmatprep.mubr.msk.f32.mxu1 %vm10083_vm1, %v10082_v1 }
 0xe4a   : > { %v5549_v38 = vpop.f32.mrb[120].mxu1  ;;  %v5795_v6 = vpop.f32.mrb[124].mxu0 }
 0xe4b   : > { %v5550_v12 = vadd.f32 %v8552_v10, %v5549_v38  ;;  %v5796_v13 = vadd.f32 %v8619_v11, %v5795_v6  ;;  %v9481_v15 = vpop.f32.mrb[121].mxu1  ;;  %v9505_v16 = vpop.f32.mrb[125].mxu0 }
 0xe4c   : > { %v5552_v30 = vpop.f32.mrb[122].mxu1  ;;  %v5798_v17 = vpop.f32.mrb[126].mxu0 }
 0xe4d   : > { %v9482_v18 = vpop.f32.mrb[123].mxu1  ;;  %v9506_v19 = vpop.f32.mrb[127].mxu0  ;;  %9589 = vmatpush3.xpose.msk.msra.mxu0 %vm926_vm2, %v5550_v12  ;;  %9604 = vmatpush3.msra.mxu1 %v5796_v13 }
 0xe4e   : > { %9598 = vmatprep.subr.mxu0 %v10082_v1  ;;  %9613 = vmatprep.subr.mxu1 %v10082_v1 }
 0xe50   : > { %9591 = vmatmul.mubr.msk.f32.vlgmr.msra.gmra.mrb[144].mxu0 %vm926_vm2, %v5044_v20 }
 0xe51   : > { %9600 = vmatprep.mubr.msk.f32.mxu0 %vm10083_vm1, %v10082_v1 }
 0xe52   : > { %v5653_v21 = vpop.f32.mrb[124].mxu1  ;;  %v11050_v22 = vpop.f32.mrb[128].mxu0 }
 0xe53   : > { %v5654_v40 = vadd.f32 %v8554_v31, %v5653_v21  ;;  %v9497_v23 = vpop.f32.mrb[125].mxu1  ;;  %v9521_v9 = vpop.f32.mrb[129].mxu0 }
 0xe54   : > { %v5656_v24 = vpop.f32.mrb[126].mxu1  ;;  %v5902_v14 = vpop.f32.mrb[130].mxu0 }
 0xe55   : > { %v9498_v25 = vpop.f32.mrb[127].mxu1  ;;  %v9522_v26 = vpop.f32.mrb[131].mxu0  ;;  %9599 = vmatpush3.xpose.msk.msra.mxu0 %vm926_vm2, %v5654_v40 }
 0xe56   : > { %9608 = vmatprep.subr.mxu0 %v10082_v1 }
 0xe58   : > { %9601 = vmatmul.mubr.msk.f32.vlgmr.msra.gmra.mrb[146].mxu0 %vm926_vm2, %v5148_v27 }
 0xe59   : > { %9610 = vmatprep.mubr.msk.f32.mxu0 %vm10083_vm1, %v10082_v1 }
 0xe5a   : > { %v5847_v48 = vpop.f32.mrb[128].mxu1  ;;  %v11060_v28 = vpop.f32.mrb[132].mxu0 }
 0xe5b   : > { %v5848_v29 = vadd.f32 %v8620_v47, %v5847_v48  ;;  %v9513_v32 = vpop.f32.mrb[129].mxu1  ;;  %v9537_v33 = vpop.f32.mrb[133].mxu0 }
 0xe5c   : > { %v5850_v34 = vpop.f32.mrb[130].mxu1  ;;  %v6006_v35 = vpop.f32.mrb[134].mxu0 }
 0xe5d   : > { %v9514_v36 = vpop.f32.mrb[131].mxu1  ;;  %v9538_v41 = vpop.f32.mrb[135].mxu0  ;;  %9609 = vmatpush3.msra.mxu0 %v5848_v29 }
 0xe5e   : > { %9618 = vmatprep.subr.mxu0 %v10082_v1 }
 0xe62   : > { %v11063_v39 = vpop.f32.mrb[132].mxu1  ;;  %v11065_v42 = vpop.f32.mrb[136].mxu0 }
 0xe63   : > { %v9529_v43 = vpop.f32.mrb[133].mxu1  ;;  %v9553_v44 = vpop.f32.mrb[137].mxu0 }
 0xe64   : > { %v5954_v45 = vpop.f32.mrb[134].mxu1  ;;  %v6110_v46 = vpop.f32.mrb[138].mxu0 }
 0xe65   : > { %v9530_v49 = vpop.f32.mrb[135].mxu1  ;;  %v9554_v50 = vpop.f32.mrb[139].mxu0 }
 0xe6a   : > { %v11067_v51 = vpop.f32.mrb[136].mxu1 }
 0xe6b   : > { %v9545_v52 = vpop.f32.mrb[137].mxu1 }
 0xe6c   : > { %v6058_v53 = vpop.f32.mrb[138].mxu1 }
 0xe6d   : > { %v9546_v54 = vpop.f32.mrb[139].mxu1 }
 0xe72   : > { %v11069_v55 = vpop.f32.mrb[140].mxu1 }
 0xe73   : > { %v9561_v56 = vpop.f32.mrb[141].mxu1 }
 0xe74   : > { %v6162_v57 = vpop.f32.mrb[142].mxu1 }
 0xe75   : > { %v9562_v58 = vpop.f32.mrb[143].mxu1 }
 0xf03   : > { %v6237_v59 = vpop.f32.mrb[74].mxu0 }
 0xf04   : > { %v9567_v60 = vpop.f32.mrb[75].mxu0  ;;  %v6773_v61 = vsel %vm3334_vm6, %v6237_v59, -inf }
 0xf05   : > { %6774 = vmax.xlane.f32.xlu0 %v6773_v61 }
 0xf0b   : > { %v6389_v62 = vpop.f32.mrb[70].mxu1 }
 0xf0c   : > { %v9577_v2 = vpop.f32.mrb[71].mxu1  ;;  %v6779_v3 = vsel %vm3334_vm6, %v6389_v62, -inf }
 0xf0d   : > { %6780 = vmax.xlane.f32.xlu0 %v6779_v3 }
 0xf13   : > { %v6313_v4 = vpop.f32.mrb[140].mxu0  ;;  %v6541_v5 = vpop.f32.mrb[144].mxu1 }
 0xf14   : > { %v9572_v7 = vpop.f32.mrb[141].mxu0  ;;  %v9587_v0 = vpop.f32.mrb[145].mxu1  ;;  %v6785_v10 = vsel %vm3334_vm6, %v6541_v5, -inf  ;;  %v6776_v11 = vsel %vm3334_vm6, %v6313_v4, -inf }
 0xf15   : > { %6786 = vmax.xlane.f32.xlu0 %v6785_v10  ;;  %6777 = vmax.xlane.f32.xlu1 %v6776_v11  ;;  %v8621_v10 = vld [vmem:[%s11333_s22 + $0xa] ss:$0 sm:$0xff] }
 0xf1b   : > { %v6465_v38 = vpop.f32.mrb[142].mxu0  ;;  %v6693_v6 = vpop.f32.mrb[146].mxu1 }
 0xf1c   : > { %v9582_v63 = vpop.f32.mrb[143].mxu0  ;;  %v9597_v12 = vpop.f32.mrb[147].mxu1  ;;  %v6791_v13 = vsel %vm3334_vm6, %v6693_v6, -inf  ;;  %v6782_v15 = vsel %vm3334_vm6, %v6465_v38, -inf }
 0xf1d   : > { %6792 = vmax.xlane.f32.xlu0 %v6791_v13  ;;  %6783 = vmax.xlane.f32.xlu1 %v6782_v15  ;;  %v8623_v13 = vld [vmem:[%s11333_s22 + $0xc] ss:$0 sm:$0xff] }
 0xf23   : > { %v6617_v16 = vpop.f32.mrb[144].mxu0 }
 0xf24   : > { %v9592_v30 = vpop.f32.mrb[145].mxu0  ;;  %v6788_v17 = vsel %vm3334_vm6, %v6617_v16, -inf }
 0xf25   : > { %6789 = vmax.xlane.f32.xlu1 %v6788_v17  ;;  %v6004_v30 = vadd.f32 %v8623_v13, %v11060_v28 }
 0xf2b   : > { %v6769_v18 = vpop.f32.mrb[146].mxu0 }
 0xf2c   : > { %v9602_v19 = vpop.f32.mrb[147].mxu0  ;;  %v6794_v20 = vsel %vm3334_vm6, %v6769_v18, -inf }
 0xf2d   : > { %6795 = vmax.xlane.f32.xlu1 %v6794_v20  ;;  %v8622_v20 = vld [vmem:[%s11333_s22 + $0xb] ss:$0 sm:$0xff] }
 0xf92   : > { %v6775_v31 = vpop.xlane.xlu0 %6774 }
 0xf93   : > { %v6797_v21 = vsub.f32 %v6237_v59, %v6775_v31 }
 0xf95   : > { %v6805_v8 = vmul.f32 1.442695, %v6797_v21 }
 0xf97   : > { %9949 = vpow2.f32 %v6805_v8 }
 0xf9a   : > { %v6781_v40 = vpop.xlane.xlu0 %6780 }
 0xf9b   : > { %v6799_v23 = vsub.f32 %v6389_v62, %v6781_v40  ;;  %v5952_v40 = vadd.f32 %v8622_v20, %v11063_v39 }
 0xf9d   : > { %v6809_v9 = vmul.f32 1.442695, %v6799_v23 }
 0xf9f   : > { %9951 = vpow2.f32 %v6809_v9 }
 0xfa1   : > { %v9950_v24 = vpop.eup %9949 }
 0xfa2   : > { %v6787_v14 = vpop.xlane.xlu0 %6786  ;;  %v6778_v25 = vpop.xlane.xlu1 %6777  ;;  %v6821_v26 = vsel %vm3334_vm6, %v9950_v24, 0.0 }
 0xfa3   : > { %v6801_v27 = vsub.f32 %v6541_v5, %v6787_v14  ;;  %v6798_v47 = vsub.f32 %v6313_v4, %v6778_v25  ;;  %6822 = vadd.xlane.f32.xlu0 %v6821_v26 }
 0xfa5   : > { %v6813_v48 = vmul.f32 1.442695, %v6801_v27  ;;  %v6807_v29 = vmul.f32 1.442695, %v6798_v47  ;;  %v8626_v27 = vld [vmem:[%s11333_s22 + $0xf] ss:$0 sm:$0xff] }
 0xfa7   : > { %9953 = vpow2.f32 %v6813_v48  ;;  %v6160_v48 = vadd.f32 %v8626_v27, %v11069_v55 }
 0xfa8   : > { %9955 = vpow2.f32 %v6807_v29 }
 0xfa9   : > { %v9952_v32 = vpop.eup %9951 }
 0xfaa   : > { %v6793_v33 = vpop.xlane.xlu0 %6792  ;;  %v6784_v34 = vpop.xlane.xlu1 %6783  ;;  %v6827_v35 = vsel %vm3334_vm6, %v9952_v32, 0.0 }
 0xfab   : > { %v6803_v36 = vsub.f32 %v6693_v6, %v6793_v33  ;;  %v6800_v41 = vsub.f32 %v6465_v38, %v6784_v34  ;;  %6828 = vadd.xlane.f32.xlu0 %v6827_v35  ;;  %v5900_v6 = vadd.f32 %v8621_v10, %v11050_v22  ;;  %v8675_v33 = vld [vmem:[%s11334_s23 + $0x10] sm:$0x3]  ;;  %v8676_v34 = vld [vmem:[%s11334_s23 + $0x12] sm:$0x3] }
 0xfac   : > { %v7466_v55 = vsel %vm930_vm0, %v8675_v33, 0  ;;  %v7512_v35 = vsel %vm930_vm0, %v8676_v34, 0 }
 0xfad   : > { %v6817_v43 = vmul.f32 1.442695, %v6803_v36  ;;  %v6811_v44 = vmul.f32 1.442695, %v6800_v41  ;;  %v8677_v36 = vld [vmem:[%s11334_s23 + $0x14] sm:$0x3] }
 0xfaf   : > { %9957 = vpow2.f32 %v6817_v43 }
 0xfb0   : > { %9959 = vpow2.f32 %v6811_v44 }
 0xfb1   : > { %v9954_v45 = vpop.eup %9953 }
 0xfb2   : > { %v9956_v46 = vpop.eup %9955  ;;  %v6790_v49 = vpop.xlane.xlu1 %6789  ;;  %v6833_v50 = vsel %vm3334_vm6, %v9954_v45, 0.0 }
 0xfb3   : > { %v6802_v52 = vsub.f32 %v6617_v16, %v6790_v49  ;;  %6834 = vadd.xlane.f32.xlu0 %v6833_v50  ;;  %v6824_v53 = vsel %vm3334_vm6, %v9956_v46, 0.0 }
 0xfb4   : > { %6825 = vadd.xlane.f32.xlu1 %v6824_v53 }
 0xfb5   : > { %v6815_v54 = vmul.f32 1.442695, %v6802_v52 }
 0xfb7   : > { %9961 = vpow2.f32 %v6815_v54  ;;  %v8681_v54 = vld [vmem:[%s11334_s23 + $0x1c] sm:$0x3] }
 0xfb9   : > { %v11083_v56 = vpop.eup %9957 }
 0xfba   : > { %v11085_v57 = vpop.eup %9959  ;;  %v6796_v58 = vpop.xlane.xlu1 %6795  ;;  %v6839_v59 = vsel %vm3334_vm6, %v11083_v56, 0.0 }
 0xfbb   : > { %v6804_v60 = vsub.f32 %v6769_v18, %v6796_v58  ;;  %6840 = vadd.xlane.f32.xlu0 %v6839_v59  ;;  %v6830_v61 = vsel %vm3334_vm6, %v11085_v57, 0.0  ;;  %v8625_v18 = vld [vmem:[%s11333_s22 + $0xe] ss:$0 sm:$0xff] }
 0xfbc   : > { %6831 = vadd.xlane.f32.xlu1 %v6830_v61  ;;  %v6108_v28 = vadd.f32 %v8625_v18, %v11065_v42  ;;  %v8624_v42 = vld [vmem:[%s11333_s22 + $0xd] ss:$0 sm:$0xff]  ;;  %v7742_v61 = vsel %vm930_vm0, %v8681_v54, 0 }
 0xfbd   : > { %v6819_v62 = vmul.f32 1.442695, %v6804_v60  ;;  %v6056_v25 = vadd.f32 %v8624_v42, %v11067_v51 }
 0xfbf   : > { %9963 = vpow2.f32 %v6819_v62 }
 0xfc1   : > { %v11091_v2 = vpop.eup %9961 }
 0xfc2   : > { %v6836_v3 = vsel %vm3334_vm6, %v11091_v2, 0.0 }
 0xfc3   : > { %6837 = vadd.xlane.f32.xlu1 %v6836_v3 }
 0xfc9   : > { %v11095_v4 = vpop.eup %9963 }
 0xfca   : > { %v6842_v5 = vsel %vm3334_vm6, %v11095_v4, 0.0 }
 0xfcb   : > { %6843 = vadd.xlane.f32.xlu1 %v6842_v5 }
0x1030   : > { %v6823_v7 = vpop.xlane.xlu0 %6822 }
0x1031   : > { %9965 = vrcp.f32 %v6823_v7 }
0x1038   : > { %v6829_v0 = vpop.xlane.xlu0 %6828 }
0x1039   : > { %9967 = vrcp.f32 %v6829_v0 }
0x103b   : > { %v9966_v11 = vpop.eup %9965 }
0x103c   : > { %v6853_v38 = vmul.f32 %v9966_v11, %v9950_v24 }
0x103e   : > { %9606 = vmatmul.mubr.msk.f32.vlgmr.msra.gmra.mrb[148].mxu1 %vm3334_vm6, %v6853_v38 }
0x103f   : > { %9614 = vmatpush3.msra.mxu1 %v5900_v6  ;;  %9615 = vmatprep.mubr.msk.f32.mxu1 %vm10083_vm1, %v10082_v1 }
0x1040   : > { %v6835_v63 = vpop.xlane.xlu0 %6834  ;;  %9623 = vmatprep.subr.mxu1 %v10082_v1 }
0x1041   : > { %9969 = vrcp.f32 %v6835_v63  ;;  %v6826_v12 = vpop.xlane.xlu1 %6825  ;;  %v8682_v63 = vld [vmem:[%s11334_s23 + $0x1e] sm:$0x3] }
0x1042   : > { %9971 = vrcp.f32 %v6826_v12 }
0x1043   : > { %v9968_v15 = vpop.eup %9967 }
0x1044   : > { %v6855_v16 = vmul.f32 %v9968_v15, %v9952_v32 }
0x1046   : > { %9616 = vmatmul.mubr.msk.f32.vlgmr.msra.gmra.mrb[150].mxu1 %vm3334_vm6, %v6855_v16  ;;  %v7788_v16 = vsel %vm930_vm0, %v8682_v63, 0 }
0x1047   : > { %9624 = vmatpush3.msra.mxu1 %v6004_v30  ;;  %9625 = vmatprep.mubr.msk.f32.mxu1 %vm10083_vm1, %v10082_v1 }
0x1048   : > { %v6841_v22 = vpop.xlane.xlu0 %6840  ;;  %9633 = vmatprep.subr.mxu1 %v10082_v1 }
0x1049   : > { %9973 = vrcp.f32 %v6841_v22  ;;  %v6832_v17 = vpop.xlane.xlu1 %6831 }
0x104a   : > { %9975 = vrcp.f32 %v6832_v17 }
0x104b   : > { %v9970_v19 = vpop.eup %9969 }
0x104c   : > { %v9972_v31 = vpop.eup %9971  ;;  %v6857_v21 = vmul.f32 %v9970_v19, %v9954_v45  ;;  %v7558_v45 = vsel %vm930_vm0, %v8677_v36, 0 }
0x104d   : > { %v6854_v8 = vmul.f32 %v9972_v31, %v9956_v46  ;;  %v8679_v46 = vld [vmem:[%s11334_s23 + $0x18] sm:$0x3] }
0x104e   : > { %9626 = vmatmul.mubr.msk.f32.vlgmr.msra.gmra.mrb[152].mxu1 %vm3334_vm6, %v6857_v21  ;;  %v7650_v53 = vsel %vm930_vm0, %v8679_v46, 0 }
0x104f   : > { %9611 = vmatmul.mubr.msk.f32.vlgmr.msra.gmra.mrb[148].mxu0 %vm3334_vm6, %v6854_v8  ;;  %9634 = vmatpush3.msra.mxu1 %v6108_v28 }
0x1050   : > { %9619 = vmatpush3.msra.mxu0 %v5952_v40  ;;  %v6838_v23 = vpop.xlane.xlu1 %6837  ;;  %9620 = vmatprep.mubr.msk.f32.mxu0 %vm10083_vm1, %v10082_v1 }
0x1051   : > { %9977 = vrcp.f32 %v6838_v23  ;;  %9628 = vmatprep.subr.mxu0 %v10082_v1  ;;  %9635 = vmatprep.mubr.msk.f32.mxu1 %vm10083_vm1, %v10082_v1 }
0x1052   : > { %9643 = vmatprep.subr.bf16.mxu1 %v10082_v1 }
0x1053   : > { %v9974_v39 = vpop.eup %9973 }
0x1054   : > { %v9976_v9 = vpop.eup %9975  ;;  %v6859_v24 = vmul.f32 %v9974_v39, %v11083_v56  ;;  %v8678_v56 = vld [vmem:[%s11334_s23 + $0x16] sm:$0x3] }
0x1055   : > { %v6856_v14 = vmul.f32 %v9976_v9, %v11085_v57  ;;  %v7604_v3 = vsel %vm930_vm0, %v8678_v56, 0 }
0x1056   : > { %9636 = vmatmul.mubr.msk.f32.vlgmr.msra.gmra.mrb[154].mxu1 %vm3334_vm6, %v6859_v24 }
0x1057   : > { %9621 = vmatmul.mubr.msk.f32.vlgmr.msra.gmra.mrb[150].mxu0 %vm3334_vm6, %v6856_v14  ;;  %9645 = vmatprep.mubr.msk.bf16.mxu1 %vm10083_vm1, %v10082_v1 }
0x1058   : > { %9629 = vmatpush3.msra.mxu0 %v6056_v25  ;;  %v6844_v26 = vpop.xlane.xlu1 %6843  ;;  %9630 = vmatprep.mubr.msk.f32.mxu0 %vm10083_vm1, %v10082_v1 }
0x1059   : > { %9979 = vrcp.f32 %v6844_v26  ;;  %9638 = vmatprep.subr.mxu0 %v10082_v1  ;;  %9644 = vmatpush3.bf16.msra.mxu1 %v7466_v55 }
0x105a   : > { %9655 = vmatprep.subr.bf16.mxu1 %v10082_v1 }
0x105b   : > { %v9978_v47 = vpop.eup %9977 }
0x105c   : > { %v6858_v51 = vmul.f32 %v9978_v47, %v11091_v2 }
0x105e   : > { %9631 = vmatmul.mubr.msk.f32.vlgmr.msra.gmra.mrb[152].mxu0 %vm3334_vm6, %v6858_v51 }
0x105f   : > { %9639 = vmatpush3.msra.mxu0 %v6160_v48  ;;  %9640 = vmatprep.mubr.msk.f32.mxu0 %vm10083_vm1, %v10082_v1 }
0x1060   : > { %9649 = vmatprep.subr.bf16.mxu0 %v10082_v1 }
0x1063   : > { %v9980_v29 = vpop.eup %9979 }
0x1064   : > { %v6860_v32 = vmul.f32 %v9980_v29, %v11095_v4  ;;  %v8680_v4 = vld [vmem:[%s11334_s23 + $0x1a] sm:$0x3] }
0x1065   : > { %v7696_v6 = vsel %vm930_vm0, %v8680_v4, 0 }
0x1066   : > { %9641 = vmatmul.mubr.msk.f32.vlgmr.msra.gmra.mrb[154].mxu0 %vm3334_vm6, %v6860_v32 }
0x1067   : > { %9651 = vmatprep.mubr.msk.bf16.mxu0 %vm10083_vm1, %v10082_v1  ;;  %9650 = vmatpush3.bf16.msra.mxu0 %v7512_v35 }
0x1068   : > { %9661 = vmatprep.subr.bf16.mxu0 %v10082_v1 }
0x1111   : > { %v6930_v41 = vpop.f32.mrb[148].mxu1 }
0x1112   : > { %v7445_v43 = vpack.c.bf16 %v6930_v41, %v6930_v41  ;;  %v9607_v44 = vpop.f32.mrb[149].mxu1 }
0x1114   : > { %9646 = vmatmul.mubr.msk.bf16.vlgmr.msra.gmra.mrb[156].mxu1 %vm926_vm2, %v7445_v43 }
0x1115   : > { %9656 = vmatpush3.bf16.msra.mxu1 %v7558_v45  ;;  %9657 = vmatprep.mubr.msk.bf16.mxu1 %vm10083_vm1, %v10082_v1 }
0x1116   : > { %9667 = vmatprep.subr.bf16.mxu1 %v10082_v1 }
0x1119   : > { %v7076_v49 = vpop.f32.mrb[150].mxu1 }
0x111a   : > { %v7447_v50 = vpack.c.bf16 %v7076_v49, %v7076_v49  ;;  %v9617_v52 = vpop.f32.mrb[151].mxu1 }
0x111c   : > { %9658 = vmatmul.mubr.msk.bf16.vlgmr.msra.gmra.mrb[160].mxu1 %vm926_vm2, %v7447_v50 }
0x111d   : > { %9668 = vmatpush3.bf16.msra.mxu1 %v7650_v53  ;;  %9669 = vmatprep.mubr.msk.bf16.mxu1 %vm10083_vm1, %v10082_v1 }
0x111e   : > { %9679 = vmatprep.subr.bf16.mxu1 %v10082_v1 }
0x1121   : > { %v7222_v57 = vpop.f32.mrb[152].mxu1 }
0x1122   : > { %v7003_v58 = vpop.f32.mrb[148].mxu0  ;;  %v7449_v59 = vpack.c.bf16 %v7222_v57, %v7222_v57  ;;  %v9627_v60 = vpop.f32.mrb[153].mxu1 }
0x1123   : > { %v7446_v62 = vpack.c.bf16 %v7003_v58, %v7003_v58  ;;  %v9612_v2 = vpop.f32.mrb[149].mxu0 }
0x1124   : > { %9670 = vmatmul.mubr.msk.bf16.vlgmr.msra.gmra.mrb[164].mxu1 %vm926_vm2, %v7449_v59 }
0x1125   : > { %9652 = vmatmul.mubr.msk.bf16.vlgmr.msra.gmra.mrb[156].mxu0 %vm926_vm2, %v7446_v62  ;;  %9680 = vmatpush3.bf16.msra.mxu1 %v7742_v61 }
0x1126   : > { %9662 = vmatpush3.bf16.msra.mxu0 %v7604_v3  ;;  %9663 = vmatprep.mubr.msk.bf16.mxu0 %vm10083_vm1, %v10082_v1 }
0x1127   : > { %9681 = vmatprep.mubr.msk.bf16.mxu1 %vm10083_vm1, %v10082_v1  ;;  %9673 = vmatprep.subr.bf16.mxu0 %v10082_v1 }
0x1128   : > { %9691 = vmatprep.subr.bf16.mxu1 %v10082_v1 }
0x1129   : > { %v7368_v5 = vpop.f32.mrb[154].mxu1 }
0x112a   : > { %v7149_v7 = vpop.f32.mrb[150].mxu0  ;;  %v7451_v0 = vpack.c.bf16 %v7368_v5, %v7368_v5  ;;  %v9637_v10 = vpop.f32.mrb[155].mxu1  ;;  %v8692_v5 = vld [vmem:[%s11335_s3 + $0x1] ss:$0 sm:$0xff]  ;;  %s904_s3 = sand.u32 1, %s10043_s10  }
0x112b   : > { %v7448_v11 = vpack.c.bf16 %v7149_v7, %v7149_v7  ;;  %v9622_v38 = vpop.f32.mrb[151].mxu0 }
0x112c   : > { %9682 = vmatmul.mubr.msk.bf16.vlgmr.msra.gmra.mrb[168].mxu1 %vm926_vm2, %v7451_v0 }
0x112d   : > { %9664 = vmatmul.mubr.msk.bf16.vlgmr.msra.gmra.mrb[160].mxu0 %vm926_vm2, %v7448_v11  ;;  %9695 = vmatprep.mubr.msk.bf16.mxu1 %vm10083_vm1, %v10082_v1 }
0x112e   : > { %9674 = vmatpush3.bf16.msra.mxu0 %v7696_v6  ;;  %9675 = vmatprep.mubr.msk.bf16.mxu0 %vm10083_vm1, %v10082_v1 }
0x112f   : > { %9685 = vmatprep.subr.bf16.mxu0 %v10082_v1 }
0x1131   : > { %v7295_v12 = vpop.f32.mrb[152].mxu0 }
0x1132   : > { %v7450_v13 = vpack.c.bf16 %v7295_v12, %v7295_v12  ;;  %v9632_v15 = vpop.f32.mrb[153].mxu0 }
0x1133   : > { %v9898_v15 = vld [vmem:[%s11336_s5 + $0x18] sm:$0xff]  }
0x1135   : > { %9676 = vmatmul.mubr.msk.bf16.vlgmr.msra.gmra.mrb[164].mxu0 %vm926_vm2, %v7450_v13  ;;  %v9897_v13 = vld [vmem:[%s11336_s5 + $0x10] sm:$0xff]   ;;  %s8272_s5 = sshll.u32 %s904_s3, 3 }
0x1136   : > { %9686 = vmatpush3.bf16.msra.mxu0 %v7788_v16  ;;  %9687 = vmatprep.mubr.msk.bf16.mxu0 %vm10083_vm1, %v10082_v1  ;;  %v9900_v16 = vld [vmem:[%s11337_s8 + $0x28] sm:$0xff]  }
0x1137   : > { %9699 = vmatprep.subr.bf16.mxu0 %v10082_v1  ;;  %9692 = vmatpush3.bf16.msra.mxu1 %v9897_v13 }
0x1138   : > { %9693 = vmatprep.subr.bf16.mxu1 %v10082_v1 }
0x1139   : > { %v7441_v30 = vpop.f32.mrb[154].mxu0 }
0x113a   : > { %v7452_v22 = vpack.c.bf16 %v7441_v30, %v7441_v30  ;;  %v9642_v17 = vpop.f32.mrb[155].mxu0 }
0x113b   : > { %9694 = vmatpush3.bf16.msra.mxu1 %v9898_v15 }
0x113c   : > { %9711 = vmatprep.subr.bf16.mxu1 %v10082_v1 }
0x113d   : > { %9688 = vmatmul.mubr.msk.bf16.vlgmr.msra.gmra.mrb[168].mxu0 %vm926_vm2, %v7452_v22 }
0x113e   : > { %9707 = vmatprep.mubr.msk.bf16.mxu0 %vm10083_vm1, %v10082_v1 }
0x11e7   : > { %v7502_v18 = vpop.f32.mrb[156].mxu1 }
0x11e8   : > { %v9647_v19 = vpop.f32.mrb[157].mxu1  ;;  %v7830_v9 = vsel %vm999_vm3, %v7502_v18, 0.0 }
0x11e9   : > { %v7505_v20 = vpop.f32.mrb[158].mxu1 }
0x11ea   : > { %v9648_v31 = vpop.f32.mrb[159].mxu1 }
0x11ef   : > { %v7594_v21 = vpop.f32.mrb[160].mxu1 }
0x11f0   : > { %v9659_v28 = vpop.f32.mrb[161].mxu1  ;;  %v7833_v51 = vsel %vm999_vm3, %v7594_v21, 0.0 }
0x11f1   : > { %v7597_v8 = vpop.f32.mrb[162].mxu1  ;;  %v8695_v28 = vld [vmem:[%s11338_s9 + $0x1] ss:$0 sm:$0xff] }
0x11f2   : > { %v9660_v40 = vpop.f32.mrb[163].mxu1 }
0x11f7   : > { %v7686_v23 = vpop.f32.mrb[164].mxu1 }
0x11f8   : > { %v7548_v39 = vpop.f32.mrb[156].mxu0  ;;  %v9671_v42 = vpop.f32.mrb[165].mxu1  ;;  %v7837_v45 = vsel %vm999_vm3, %v7686_v23, 0.0  ;;  %v8696_v23 = vld [vmem:[%s11339_s13 + $0x1] ss:$0 sm:$0xff] }
0x11f9   : > { %v7831_v24 = vsel %vm999_vm3, %v7548_v39, 0.0  ;;  %v9653_v14 = vpop.f32.mrb[157].mxu0  ;;  %v7689_v25 = vpop.f32.mrb[166].mxu1 }
0x11fa   : > { %v7832_v26 = vadd.f32 %v7831_v24, %v7830_v9  ;;  %v7551_v27 = vpop.f32.mrb[158].mxu0  ;;  %v9672_v47 = vpop.f32.mrb[167].mxu1  ;;  %v9901_v24 = vld [vmem:[%s11337_s8 + $0x30] sm:$0xff]   ;;  %v9902_v14 = vld [vmem:[%s11337_s8 + $0x38] sm:$0xff]   ;;  %v8702_v25 = vld [vmem:[%s11340_s17 + $0x1] ss:$0 sm:$0xff] }
0x11fb   : > { %v9654_v48 = vpop.f32.mrb[159].mxu0 }
0x11fc   : > { %v7834_v29 = vadd.f32 %v7833_v51, %v7832_v26 }
0x11ff   : > { %v7778_v32 = vpop.f32.mrb[168].mxu1 }
0x1200   : > { %v7640_v33 = vpop.f32.mrb[160].mxu0  ;;  %v9683_v55 = vpop.f32.mrb[169].mxu1  ;;  %v7841_v57 = vsel %vm999_vm3, %v7778_v32, 0.0 }
0x1201   : > { %v7835_v34 = vsel %vm999_vm3, %v7640_v33, 0.0  ;;  %v9665_v35 = vpop.f32.mrb[161].mxu0  ;;  %v7781_v36 = vpop.f32.mrb[170].mxu1  ;;  %v8720_v55 = vld [vmem:[%s11341_s21 + $0x1] ss:$0 sm:$0xff] }
0x1202   : > { %v7836_v41 = vadd.f32 %v7835_v34, %v7834_v29  ;;  %v7643_v43 = vpop.f32.mrb[162].mxu0  ;;  %v9684_v44 = vpop.f32.mrb[171].mxu1 }
0x1203   : > { %v9666_v46 = vpop.f32.mrb[163].mxu0 }
0x1204   : > { %v7838_v49 = vadd.f32 %v7837_v45, %v7836_v41 }
0x1208   : > { %v7732_v50 = vpop.f32.mrb[164].mxu0 }
0x1209   : > { %v7839_v52 = vsel %vm999_vm3, %v7732_v50, 0.0  ;;  %v9677_v53 = vpop.f32.mrb[165].mxu0 }
0x120a   : > { %v7840_v54 = vadd.f32 %v7839_v52, %v7838_v49  ;;  %v7735_v56 = vpop.f32.mrb[166].mxu0  ;;  %v9903_v53 = vld [vmem:[%s11320_s12] sm:$0xff]  }
0x120b   : > { %v9678_v58 = vpop.f32.mrb[167].mxu0 }
0x120c   : > { %v7842_v59 = vadd.f32 %v7841_v57, %v7840_v54  ;;  %v9904_v54 = vld [vmem:[%s11320_s12 + $0x8] sm:$0xff]   ;;  %s8155_s12 = scalar_lea.sflag [#allocation3], %s904_s3 }
0x1210   : > { %v7824_v60 = vpop.f32.mrb[168].mxu0 }
0x1211   : > { %v7843_v61 = vsel %vm999_vm3, %v7824_v60, 0.0  ;;  %v9689_v62 = vpop.f32.mrb[169].mxu0 }
0x1212   : > { %v7844_v2 = vadd.f32 %v7843_v61, %v7842_v59  ;;  %v7827_v3 = vpop.f32.mrb[170].mxu0 }
0x1213   : > { %v9690_v4 = vpop.f32.mrb[171].mxu0  ;;  %v8721_v3 = vld [vmem:[%s11342_s2] ss:$0 sm:$0xff]  ;;  %s11236_s2 = scalar_lea.hbm %s10238_s4, %s8728_s6 }
0x1214   : > { %v7845_v7 = vadd.f32 %v7844_v2, %v10779_v37  ;;  %v9899_v37 = vld [vmem:[%s11337_s8 + $0x20] sm:$0xff]   ;;  %s906_s8 = scalar_lea.vmem [#allocation2], %s8272_s5  ;;  %s10084_s5 = smov [#allocation2]  }
0x1215   : > { %9700 = vmatpush3.bf16.msra.mxu0 %v9899_v37  ;;  %s8168_s9 = sshll.u32 %s906_s8, 4  ;;  %s9993_s0 = sshll.u32 %s10084_s5, 4  ;;  %s11238_s9 = int_to_ptr.vmem [resolvable:$true] %s8168_s9  ;;  %s9994_s0 = int_to_ptr.vmem [resolvable:$false] %s9993_s0 }
0x1216   : > { %v7854_v0 = vadd.f32 %v8692_v5, %v7845_v7  ;;  %9701 = vmatprep.subr.bf16.mxu0 %v10082_v1  ;;  %v8722_v5 = vld [vmem:[%s10223_s30] ss:$0 sm:$0xff]  ;;  %s9989_s13 = scalar_lea.vmem %s11238_s9, 128  ;;  %s9995_s14 = scalar_lea.vmem %s9994_s0, 256 }
0x1217   : > { %p9990_p11 = scmp.ne.s32.totalorder %s11238_s9, %s9989_s13  ;;  %p9996_p0 = scmp.lt.s32.totalorder %s11238_s9, %s9994_s0 }
0x1218   : > { %v7859_v10 = vsel %vm999_vm3, %v7854_v0, 0.0  ;;  %p9997_p1 = scmp.lt.s32.totalorder %s9995_s14, %s9989_s13 }
0x1219   : > { %7860 = vadd.xlane.f32.xlu0 %v7859_v10  ;;  %9702 = vmatpush3.bf16.msra.mxu0 %v9900_v16  ;;  %p9991_p12 = pnand %p9990_p11, %p10278_p5 }
0x121a   : > { %9703 = vmatprep.subr.bf16.mxu0 %v10082_v1  ;;  %p9998_p2 = por %p9997_p1, %p9996_p0 }
0x121b   : > { %p9992_p13 = pneg %p9991_p12 }
0x121d   : > { %9704 = vmatpush3.bf16.msra.mxu0 %v9901_v24  ;;  %p9999_p3 = pnand %p9998_p2, %p9992_p13 }
0x121e   : > { %9705 = vmatprep.subr.bf16.mxu0 %v10082_v1 }
0x1221   : > { %9706 = vmatpush3.bf16.msra.mxu0 %v9902_v14 }
0x12a6   : > { %v7861_v11 = vpop.xlane.xlu0 %7860 }
0x12a7   : > { %v7862_v38 = vmul.f32 0.03125, %v7861_v11  ;;  %v8723_v11 = vld [vmem:[%s10233_s27] ss:$0 sm:$0xff] }
0x12a9   : > { %v7863_v6 = vsub.f32 %v7854_v0, %v7862_v38 }
0x12ab   : > { %v7864_v63 = vmul.f32 %v7863_v6, %v7863_v6  ;;  %v7875_v8 = vmul.f32 %v8695_v28, %v7863_v6 }
0x12ad   : > { %v7865_v12 = vsel %vm999_vm3, %v7864_v63, 0.0 }
0x12ae   : > { %7866 = vadd.xlane.f32.xlu1 %v7865_v12 }
0x133b   : > { %v7867_v30 = vpop.xlane.xlu1 %7866 }
0x133c   : > { %v7868_v22 = vmul.f32 0.032258064, %v7867_v30 }
0x133e   : > { %9981 = vrsqrt.f32 %v7868_v22  ;;  %vm7878_vm12 = vcmp.eq.f32.partialorder %v7868_v22, inf  ;;  %v7881_v19 = vand.u32 2147483648, %v7868_v22  ;;  %vm7880_vm13 = vcmp.eq.f32.partialorder %v7868_v22, 0.0 }
0x1348   : > { %v9982_v17 = vpop.eup %9981 }
0x1349   : > { %v7877_v18 = vmul.f32 %v9982_v17, %v7868_v22 }
0x134b   : > { %v7879_v20 = vsel %vm7878_vm12, %v7868_v22, %v7877_v18 }
0x134c   : > { %v7882_v31 = vsel %vm7880_vm13, %v7881_v19, %v7879_v20 }
0x134d   : > { %v7883_v21 = vadd.f32 1e-06, %v7882_v31 }
0x134f   : > { %9983 = vrcp.f32 %v7883_v21 }
0x1359   : > { %v9984_v40 = vpop.eup %9983 }
0x135a   : > { %v7885_v39 = vmul.f32 %v9984_v40, %v7875_v8 }
0x135c   : > { %v7892_v42 = vadd.f32 %v8696_v23, %v7885_v39 }
0x135e   : > { %v7893_v9 = vpack.c.bf16 %v7892_v42, %v7892_v42 }
0x1360   : > { %9696 = vmatmul.mubr.msk.bf16.vlgmr.msra.gmra.mrb[172].mxu1 %vm999_vm3, %v7893_v9 }
0x1361   : > { %9715 = vmatprep.mubr.msk.bf16.mxu1 %vm10083_vm1, %v10082_v1  ;;  %9712 = vmatpush3.bf16.msra.mxu1 %v9903_v53 }
0x1362   : > { %9713 = vmatprep.subr.bf16.mxu1 %v10082_v1 }
0x1365   : > { %9714 = vmatpush3.bf16.msra.mxu1 %v9904_v54 }
0x1433   : > { %v7956_v26 = vpop.f32.mrb[172].mxu1 }
0x1434   : > { %v7957_v27 = vadd.f32 %v8702_v25, %v7956_v26  ;;  %v9697_v47 = vpop.f32.mrb[173].mxu1 }
0x1435   : > { %v7959_v51 = vpop.f32.mrb[174].mxu1 }
0x1436   : > { %v7962_v48 = vmax.f32 %v7957_v27, 0.0  ;;  %v9698_v29 = vpop.f32.mrb[175].mxu1 }
0x1438   : > { %v7963_v32 = vpack.c.bf16 %v7962_v48, %v7962_v48 }
0x143a   : > { %9708 = vmatmul.mubr.msk.bf16.vlgmr.msra.gmra.mrb[172].mxu0 %vm4552_vm9, %v7963_v32 }
0x150d   : > { %v8034_v33 = vpop.f32.mrb[172].mxu0 }
0x150e   : > { %v8040_v34 = vadd.f32 %v8034_v33, %v7854_v0  ;;  %v9709_v35 = vpop.f32.mrb[173].mxu0 }
0x150f   : > { %v8037_v36 = vpop.f32.mrb[174].mxu0 }
0x1510   : > { %v9710_v41 = vpop.f32.mrb[175].mxu0  ;;  %v8049_v43 = vadd.f32 %v8720_v55, %v8040_v34 }
0x1512   : > { %v8052_v44 = vsel %vm999_vm3, %v8049_v43, 0.0 }
0x1513   : > { %8053 = vadd.xlane.f32.xlu0 %v8052_v44 }
0x15a0   : > { %v8054_v45 = vpop.xlane.xlu0 %8053 }
0x15a1   : > { %v8055_v46 = vmul.f32 0.03125, %v8054_v45 }
0x15a3   : > { %v8056_v49 = vsub.f32 %v8049_v43, %v8055_v46 }
0x15a5   : > { %v8057_v50 = vmul.f32 %v8056_v49, %v8056_v49  ;;  %v8068_v4 = vmul.f32 %v8721_v3, %v8056_v49 }
0x15a7   : > { %v8058_v52 = vsel %vm999_vm3, %v8057_v50, 0.0 }
0x15a8   : > { %8059 = vadd.xlane.f32.xlu1 %v8058_v52 }
0x1635   : > { %v8060_v56 = vpop.xlane.xlu1 %8059 }
0x1636   : > { %v8061_v57 = vmul.f32 0.032258064, %v8060_v56 }
0x1638   : > { %9985 = vrsqrt.f32 %v8061_v57  ;;  %vm8071_vm14 = vcmp.eq.f32.partialorder %v8061_v57, inf  ;;  %v8074_v60 = vand.u32 2147483648, %v8061_v57  ;;  %vm8073_vm15 = vcmp.eq.f32.partialorder %v8061_v57, 0.0 }
0x1642   : > { %v9986_v58 = vpop.eup %9985 }
0x1643   : > { %v8070_v59 = vmul.f32 %v9986_v58, %v8061_v57 }
0x1645   : > { %v8072_v61 = vsel %vm8071_vm14, %v8061_v57, %v8070_v59 }
0x1646   : > { %v8075_v62 = vsel %vm8073_vm15, %v8074_v60, %v8072_v61 }
0x1647   : > { %v8076_v2 = vadd.f32 1e-06, %v8075_v62 }
0x1649   : > { %9987 = vrcp.f32 %v8076_v2 }
0x1653   : > { %v9988_v1 = vpop.eup %9987 }
0x1654   : > { %v8078_v7 = vmul.f32 %v9988_v1, %v8068_v4 }
0x1656   : > { %v8085_v0 = vadd.f32 %v8722_v5, %v8078_v7 }
0x1658   : > { %v8086_v10 = vpack.c.bf16 %v8085_v0, %v8085_v0 }
0x165a   : > { %9716 = vmatmul.mubr.msk.bf16.vlgmr.msra.gmra.mrb[176].mxu1 %vm999_vm3, %v8086_v10 }
0x172d   : > { %v8147_v38 = vpop.f32.mrb[176].mxu1 }
0x172e   : > { %v8148_v6 = vadd.f32 %v8723_v11, %v8147_v38  ;;  %v9717_v63 = vpop.f32.mrb[177].mxu1 }
0x172f   : > { %v8150_v12 = vpop.f32.mrb[178].mxu1 }
0x1730   : > { %8153 = vst [vmem:[%s906_s8] sm:$0xff] %v8148_v6  ;;  %v9718_v13 = vpop.f32.mrb[179].mxu1 }
0x1731   : > { %10002 = shalt.err (!%p9999_p3)
}
0x1732   : > { %s10003_s3 = scalar_lea.hbm %s11236_s2, 128  ;;  %s10007_s8 = scalar_lea.hbm %s10238_s4, 256 }
0x1733   : > { %p10004_p4 = scmp.ne.s32.totalorder %s11236_s2, %s10003_s3  ;;  %p10008_p9 = scmp.lt.u32.totalorder %s11236_s2, %s10238_s4 }
0x1734   : > { %p10009_p10 = scmp.lt.u32.totalorder %s10007_s8, %s10003_s3  ;;  %p10011_p12 = scmp.lt.u32.totalorder %s10003_s3, %s11236_s2 }
0x1735   : > { %p10005_p7 = pnand %p10004_p4, %p10278_p5 }
0x1736   : > { %p10010_p11 = por %p10009_p10, %p10008_p9 }
0x1737   : > { %p10006_p8 = pneg %p10005_p7 }
0x1738   : > { %p10012_p0 = por %p10011_p12, %p10010_p11 }
0x173a   : > { %p10013_p13 = pnand %p10012_p0, %p10006_p8 }
0x173c   : > { %10016 = shalt.err (!%p10013_p13)
}
0x173d   : > { %9719 = dma.vmem_to_hbm [thread:$0]  (%p10278_p5), %s11238_s9, 128, %s11236_s2, %s8155_s12  }
0x173e PF: > { %p9725_p1 = scmp.ge.s32.totalorder %s10051_s15, 2  ;;  %s8180_s13 = sand.u32 1, %s10039_s7  }
0x173f   : > { %s8181_s14 = scalar_lea.sflag [#allocation3], %s8180_s13 }
0x1740   : > { %p9722_p2 = pnand %p9725_p1, %p10282_p6 }
0x1742   : > { %10034 = dma.done.wait (!%p9722_p2), %s8181_s14, 128  }
0x1743   : > { %10036 = vsyncadd (!%p9722_p2), %s8181_s14, 4294967168  ;;  %p69_p3 = scmp.ge.s32.totalorder %s10265_s18, 4   ;;  %s11343_s7 = smov %s10043_s10 }
0x1744   : > { %s11344_s10 = smov %s10047_s11  ;;  %s11345_s11 = smov %s10276_s26 }
0x1745   : > { %s11346_s15 = smov %s10265_s18  ;;  %71 = sbr.rel (!%p69_p3) target bundleno = 57 (0x39), region = 219 }
0x174c   :  { %8186 = vsyncpa [#allocation3], 1 }
0x174d   :  { %8188 = vsyncpa [#allocation3 + $0x1], 1 }

</bundles_post_ra>
